<compile_context>
chip_gen: v5e
topology: v5e:2x2
jax: 0.10.0
libtpu: 0.0.40
codegen_flags: <defaults>
</compile_context>

<pallas_src>
import functools

import numpy as np

import jax
import jax.numpy as jnp
from jax.experimental import pallas as pl
from jax.experimental.pallas import tpu as pltpu


_ALL_PADS = [0, 0, 1, 3, 7]
_CONSTANT_FEATURES = 16


def _round_up(x, m):
    return (x + m - 1) // m * m


def _phase_taps(k):
    """Sub-pixel decomposition of a stride-2 ConvTranspose2d (padding=k//2-1).

    Output row oy = 2*u + v only reads rows (u + off) of the input that has
    been zero-padded by k//4 on each side.  Returns, for v in {0, 1}, the list
    of (off, kernel_tap) pairs (k//2 of them).
    """
    K2, k4 = k // 2, k // 4
    taps = []
    for v in (0, 1):
        parity = (v + K2 - 1) % 2
        base = (v + K2 - 1 - parity) // 2 + k4
        taps.append([(base - j, parity + 2 * j) for j in range(K2)])
    return taps


def _union_offsets(k):
    """Sorted union of halo offsets used by the two row/col phases."""
    taps = _phase_taps(k)
    return tuple(sorted({off for v in (0, 1) for (off, _) in taps[v]}))


def _pack_union_weights(w2, k):
    """(Cin, Cout, k, k) ConvTranspose2d weight -> (nu*nu*Cin, 4*Cout).

    Rows ordered (union_off_y, union_off_x, ci); columns ordered
    (phase_y, phase_x, co).  Taps that a phase does not use are zero rows,
    so a single im2col over the union offsets produces all four phases.
    """
    taps = _phase_taps(k)
    union = _union_offsets(k)
    idx = {o: i for i, o in enumerate(union)}
    nu = len(union)
    sel = np.zeros((2, nu, k), np.float32)
    for v in (0, 1):
        for off, ky in taps[v]:
            sel[v, idx[off], ky] = 1.0
    sel = jnp.asarray(sel)
    cin, cout = w2.shape[0], w2.shape[1]
    wb = jnp.einsum('vyk,wxl,iokl->yxivwo', sel, sel, w2.astype(jnp.float32))
    return wb.reshape(nu * nu * cin, 4 * cout)


def _pack_phase_weights(w2, k):
    """(Cin, Cout, k, k) -> (4, (k//2)**2 * Cin, Cout) (used by the VPU path)."""
    taps = _phase_taps(k)
    cin, cout = w2.shape[0], w2.shape[1]
    K2 = k // 2
    phases = []
    for vy in range(2):
        for vx in range(2):
            rows = [w2[:, :, ky, kx]
                    for (_, ky) in taps[vy] for (_, kx) in taps[vx]]
            phases.append(jnp.stack(rows, axis=0).reshape(K2 * K2 * cin, cout))
    return jnp.stack(phases, axis=0)


# ----------------------------------------------------------------------------
# Fused stage kernel, Cout > 1 (MXU path):
#   conv1x1(+bias, ReLU)  ->  single unified phase GEMM (all 4 phases at once)
# ----------------------------------------------------------------------------
def _stage_gemm_kernel(x_ref, w1_ref, w2_ref, b2_ref, o_ref, hp_ref, *,
                       H, W, HP, WP, cmid, union):
    # 1x1 conv (+bias via the appended ones-channel) + ReLU over the padded
    # halo tile; the zero halo stays exactly zero.
    h = jnp.dot(x_ref[0], w1_ref[...], preferred_element_type=jnp.float32)
    h = jnp.maximum(h, 0.0)                          # (HP*WP, cmid) f32
    hp_ref[...] = h.reshape(HP, WP, cmid).astype(hp_ref.dtype)

    # One im2col over the union of sub-pixel tap offsets, one GEMM for all
    # four output phases (lane width 4*cmid instead of cmid).
    cols = []
    for dy in union:                                 # static python ints
        for dx in union:
            t = hp_ref[pl.ds(dy, H), pl.ds(dx, W), :]   # (H, W, cmid)
            cols.append(t.reshape(H * W, cmid))
    im = jnp.concatenate(cols, axis=1)               # (H*W, nu*nu*cmid) bf16
    y = jnp.dot(im, w2_ref[...], preferred_element_type=jnp.float32)
    # phase-packed, lane-dense output: (H*W, 4*cout)
    o_ref[0] = y + b2_ref[...]


def _fused_stage_gemm(x_nhwc, w1, b1, w2, b2, *, k):
    N, H, W, cin = x_nhwc.shape
    cf = w1.shape[0]
    k4 = k // 4
    union = _union_offsets(k)
    nu = len(union)
    HP = _round_up(H + 2 * k4, 8)
    WP = _round_up(W + 2 * k4, 8)
    cin1 = cin + 1

    # append ones channel (bias trick), zero-pad spatially by k//4 (+ round-up)
    ones = jnp.ones((N, H, W, 1), jnp.bfloat16)
    xa = jnp.concatenate([x_nhwc.astype(jnp.bfloat16), ones], axis=-1)
    xa = jnp.pad(xa, ((0, 0), (k4, HP - H - k4), (k4, WP - W - k4), (0, 0)))
    xa = xa.reshape(N, HP * WP, cin1)

    w1m = jnp.concatenate([w1.reshape(cf, cin).T.astype(jnp.float32),
                           b1[None, :].astype(jnp.float32)], axis=0)
    w1m = w1m.astype(jnp.bfloat16)                            # (cin1, cf)
    w2u = _pack_union_weights(w2, k).astype(jnp.bfloat16)     # (nu*nu*cf, 4*cf)
    b2v = jnp.tile(b2.reshape(1, cf), (1, 4)).astype(jnp.float32)  # (1, 4*cf)

    kern = functools.partial(_stage_gemm_kernel, H=H, W=W, HP=HP, WP=WP,
                             cmid=cf, union=union)
    out = pl.pallas_call(
        kern,
        grid=(N,),
        in_specs=[
            pl.BlockSpec((1, HP * WP, cin1), lambda n: (n, 0, 0)),
            pl.BlockSpec((cin1, cf), lambda n: (0, 0)),
            pl.BlockSpec((nu * nu * cf, 4 * cf), lambda n: (0, 0)),
            pl.BlockSpec((1, 4 * cf), lambda n: (0, 0)),
        ],
        out_specs=pl.BlockSpec((1, H * W, 4 * cf), lambda n: (n, 0, 0)),
        out_shape=jax.ShapeDtypeStruct((N, H * W, 4 * cf), jnp.float32),
        scratch_shapes=[pltpu.VMEM((HP, WP, cf), jnp.bfloat16)],
        compiler_params=pltpu.CompilerParams(
            dimension_semantics=("parallel",)),
    )(xa, w1m, w2u, b2v)

    # un-shuffle phases: (n, u*W+w, (vy*2+vx)*cf+c) -> NHWC (N, 2H, 2W, cf)
    out = out.reshape(N, H, W, 2, 2, cf).transpose(0, 1, 3, 2, 4, 5)
    return out.reshape(N, 2 * H, 2 * W, cf)


# ----------------------------------------------------------------------------
# Fused stage kernel, Cout == 1 (VPU path, no MXU): channel reduce + phase MACs
# ----------------------------------------------------------------------------
def _stage_single_kernel(x_ref, w1_ref, w2_ref, b2_ref, o_ref, *,
                         H, W, cin1, K2, taps):
    # 1x1 conv (Cin -> 1) + ReLU on the VPU; spatial width stays on lanes.
    h = x_ref[0, 0].astype(jnp.float32) * w1_ref[0]
    for c in range(1, cin1):
        h = h + x_ref[0, c].astype(jnp.float32) * w1_ref[c]
    h = jnp.maximum(h, 0.0)                          # (HP, WP), zero in halo

    b2 = b2_ref[0]
    for vy in range(2):
        rows = []
        for vx in range(2):
            acc = jnp.zeros((H, W), jnp.float32)
            ti = 0
            for dy, _ky in taps[vy]:
                for dx, _kx in taps[vx]:
                    wt = w2_ref[(vy * 2 + vx) * (K2 * K2) + ti]
                    acc = acc + h[dy:dy + H, dx:dx + W] * wt
                    ti += 1
            rows.append(acc + b2)
        # lane-dense phase-packed row plane: (H, 2*W)
        o_ref[0, vy] = jnp.concatenate(rows, axis=-1)


def _fused_stage_single(x_nhwc, w1, b1, w2, b2, *, k):
    N, H, W, cin = x_nhwc.shape
    K2, k4 = k // 2, k // 4
    HP, WP = H + 2 * k4, W + 2 * k4
    cin1 = cin + 1

    ones = jnp.ones((N, H, W, 1), jnp.bfloat16)
    xa = jnp.concatenate([x_nhwc.astype(jnp.bfloat16), ones], axis=-1)
    xa = jnp.pad(xa, ((0, 0), (k4, k4), (k4, k4), (0, 0)))
    xa = jnp.transpose(xa, (0, 3, 1, 2))             # (N, cin1, HP, WP) bf16

    w1v = jnp.concatenate([w1.reshape(-1), b1], axis=0).astype(jnp.float32)
    w2s = _pack_phase_weights(w2, k).reshape(4 * K2 * K2).astype(jnp.float32)
    b2s = b2.astype(jnp.float32)                     # (1,)

    kern = functools.partial(_stage_single_kernel, H=H, W=W, cin1=cin1,
                             K2=K2, taps=_phase_taps(k))
    out = pl.pallas_call(
        kern,
        grid=(N,),
        in_specs=[
            pl.BlockSpec((1, cin1, HP, WP), lambda n: (n, 0, 0, 0)),
            pl.BlockSpec(memory_space=pltpu.MemorySpace.SMEM),
            pl.BlockSpec(memory_space=pltpu.MemorySpace.SMEM),
            pl.BlockSpec(memory_space=pltpu.MemorySpace.SMEM),
        ],
        out_specs=pl.BlockSpec((1, 2, H, 2 * W), lambda n: (n, 0, 0, 0)),
        out_shape=jax.ShapeDtypeStruct((N, 2, H, 2 * W), jnp.float32),
        compiler_params=pltpu.CompilerParams(
            dimension_semantics=("parallel",)),
    )(xa, w1v, w2s, b2s)

    # un-shuffle: (n, vy, u, vx*W+w) -> (N, 2H, 2W, 1)
    out = out.reshape(N, 2, H, 2, W).transpose(0, 2, 1, 4, 3)
    return out.reshape(N, 2 * H, 2 * W)[..., None]


# ----------------------------------------------------------------------------
# UpConvBlock
# ----------------------------------------------------------------------------
def init_params(key, in_features, up_scale):
    """Deterministic synthetic parameters with the exact PyTorch shapes."""
    params = []
    cin = in_features
    k = 2 ** up_scale
    for i in range(up_scale):
        cout = 1 if i == up_scale - 1 else _CONSTANT_FEATURES
        key, k1, k2, k3, k4 = jax.random.split(key, 5)
        w1 = jax.random.normal(k1, (cout, cin, 1, 1), jnp.float32) / jnp.sqrt(cin)
        b1 = 0.01 * jax.random.normal(k2, (cout,), jnp.float32)
        w2 = jax.random.normal(k3, (cout, cout, k, k), jnp.float32) / jnp.sqrt(cout * k * k)
        b2 = 0.01 * jax.random.normal(k4, (cout,), jnp.float32)
        params.append((w1, b1, w2, b2))
        cin = cout
    return params


def upconv_block(x_nchw, params, *, up_scale):
    k = 2 ** up_scale
    pad = _ALL_PADS[up_scale]
    assert pad == k // 2 - 1, (pad, k)               # holds for up_scale in 1..4
    x = jnp.transpose(x_nchw.astype(jnp.float32), (0, 2, 3, 1))   # NHWC
    for (w1, b1, w2, b2) in params:
        if w1.shape[0] == 1:
            x = _fused_stage_single(x, w1, b1, w2, b2, k=k)
        else:
            x = _fused_stage_gemm(x, w1, b1, w2, b2, k=k)
    return jnp.transpose(x, (0, 3, 1, 2))


# ----------------------------------------------------------------------------
# Pure-JAX reference (conv1x1 + ReLU + transposed conv via dilated conv)
# ----------------------------------------------------------------------------
def _reference(x_nchw, params, *, up_scale):
    k = 2 ** up_scale
    p = _ALL_PADS[up_scale]
    x = jnp.transpose(x_nchw.astype(jnp.float32), (0, 2, 3, 1))
    for (w1, b1, w2, b2) in params:
        cf = w1.shape[0]
        x = jnp.maximum(
            jnp.einsum('nhwc,oc->nhwo', x, w1.reshape(cf, -1)) + b1, 0.0)
        kern = jnp.transpose(w2[:, :, ::-1, ::-1], (2, 3, 0, 1))  # HWIO, flipped
        x = jax.lax.conv_general_dilated(
            x, kern, window_strides=(1, 1),
            padding=[(k - 1 - p, k - 1 - p)] * 2,
            lhs_dilation=(2, 2), rhs_dilation=(1, 1),
            dimension_numbers=('NHWC', 'HWIO', 'NHWC')) + b2
    return jnp.transpose(x, (0, 3, 1, 2))


if __name__ == "__main__":
    key = jax.random.PRNGKey(0)
    kx, kp = jax.random.split(key)

    N, C, H, W = 2, 4, 16, 16
    up_scale = 2   # kernel_size=4, padding=1, two (conv1x1 -> relu -> convT) stages

    x = jax.random.normal(kx, (N, C, H, W), jnp.float32)
    params = init_params(kp, C, up_scale)

    fwd = jax.jit(functools.partial(upconv_block, up_scale=up_scale))
    out = jax.block_until_ready(fwd(x, params))

    expected_shape = (N, 1, H * (2 ** up_scale), W * (2 ** up_scale))
    assert out.shape == expected_shape, (out.shape, expected_shape)
    assert out.dtype == jnp.float32

    ref = _reference(x, params, up_scale=up_scale)
    err = float(jnp.max(jnp.abs(out - ref)))
    assert err < 5e-2, f"max abs err vs reference: {err}"

    print("KERNEL_OK")
</pallas_src>

<mosaic_0001>
module attributes {stable_mosaic.version = 11 : i64} {
  func.func @_stage_gemm_kernel(%arg0: i32, %arg1: memref<1x576x5xbf16, #tpu.memory_space<vmem>>, %arg2: memref<5x16xbf16, #tpu.memory_space<vmem>>, %arg3: memref<144x64xbf16, #tpu.memory_space<vmem>>, %arg4: memref<1x64xf32, #tpu.memory_space<vmem>>, %arg5: memref<1x256x64xf32, #tpu.memory_space<vmem>>, %arg6: memref<24x24x16xbf16, #tpu.memory_space<vmem>>) attributes {dimension_semantics = [#tpu.dimension_semantics<parallel>], iteration_bounds = array<i64: 2>, scalar_prefetch = 0 : i64, scratch_operands = 1 : i64, tpu.core_type = #tpu.core_type<tc>, window_params = [{transform_indices = @transform_0, window_bounds = array<i64: 1, 576, 5>}, {pipeline_mode = #tpu.pipeline_mode<synchronous>, transform_indices = @transform_1, window_bounds = array<i64: 5, 16>}, {pipeline_mode = #tpu.pipeline_mode<synchronous>, transform_indices = @transform_2, window_bounds = array<i64: 144, 64>}, {pipeline_mode = #tpu.pipeline_mode<synchronous>, transform_indices = @transform_3, window_bounds = array<i64: 1, 64>}, {transform_indices = @transform_4, window_bounds = array<i64: 1, 256, 64>}]} {
    %c0 = arith.constant 0 : index
    %c0_0 = arith.constant 0 : index
    %c0_1 = arith.constant 0 : index
    %0 = vector.load %arg1[%c0, %c0_0, %c0_1] : memref<1x576x5xbf16, #tpu.memory_space<vmem>>, vector<1x576x5xbf16>
    %1 = vector.shape_cast %0 : vector<1x576x5xbf16> to vector<576x5xbf16>
    %c0_2 = arith.constant 0 : index
    %c0_3 = arith.constant 0 : index
    %2 = vector.load %arg2[%c0_2, %c0_3] : memref<5x16xbf16, #tpu.memory_space<vmem>>, vector<5x16xbf16>
    %cst = arith.constant dense<0.000000e+00> : vector<576x16xf32>
    %3 = tpu.matmul %1, %2, %cst {dimension_numbers = #tpu.dot_dimension_numbers<[1], [0], [0], [1], [0, 0, 1, 1], [], []>} : vector<576x5xbf16>, vector<5x16xbf16>, vector<576x16xf32> -> vector<576x16xf32>
    %cst_4 = arith.constant 0.000000e+00 : f32
    %4 = vector.broadcast %cst_4 : f32 to vector<576x16xf32>
    %5 = arith.maximumf %3, %4 : vector<576x16xf32>
    %6 = vector.shape_cast %5 : vector<576x16xf32> to vector<24x24x16xf32>
    %7 = arith.truncf %6 : vector<24x24x16xf32> to vector<24x24x16xbf16>
    %c0_5 = arith.constant 0 : index
    %c0_6 = arith.constant 0 : index
    %c0_7 = arith.constant 0 : index
    %8 = vector.load %arg6[%c0_5, %c0_6, %c0_7] : memref<24x24x16xbf16, #tpu.memory_space<vmem>>, vector<24x24x16xbf16>
    tpu.vector_store %arg6[%c0_5, %c0_6, %c0_7], %7 {strides = array<i32>} : memref<24x24x16xbf16, #tpu.memory_space<vmem>>, vector<24x24x16xbf16>,
    %c0_8 = arith.constant 0 : index
    %c0_9 = arith.constant 0 : index
    %c0_10 = arith.constant 0 : index
    %9 = vector.load %arg6[%c0_8, %c0_9, %c0_10] : memref<24x24x16xbf16, #tpu.memory_space<vmem>>, vector<16x16x16xbf16>
    %10 = vector.shape_cast %9 : vector<16x16x16xbf16> to vector<256x16xbf16>
    %c0_11 = arith.constant 0 : index
    %c1 = arith.constant 1 : index
    %c0_12 = arith.constant 0 : index
    %11 = vector.load %arg6[%c0_11, %c1, %c0_12] : memref<24x24x16xbf16, #tpu.memory_space<vmem>>, vector<16x16x16xbf16>
    %12 = vector.shape_cast %11 : vector<16x16x16xbf16> to vector<256x16xbf16>
    %c0_13 = arith.constant 0 : index
    %c2 = arith.constant 2 : index
    %c0_14 = arith.constant 0 : index
    %13 = vector.load %arg6[%c0_13, %c2, %c0_14] : memref<24x24x16xbf16, #tpu.memory_space<vmem>>, vector<16x16x16xbf16>
    %14 = vector.shape_cast %13 : vector<16x16x16xbf16> to vector<256x16xbf16>
    %c1_15 = arith.constant 1 : index
    %c0_16 = arith.constant 0 : index
    %c0_17 = arith.constant 0 : index
    %15 = vector.load %arg6[%c1_15, %c0_16, %c0_17] : memref<24x24x16xbf16, #tpu.memory_space<vmem>>, vector<16x16x16xbf16>
    %16 = vector.shape_cast %15 : vector<16x16x16xbf16> to vector<256x16xbf16>
    %c1_18 = arith.constant 1 : index
    %c1_19 = arith.constant 1 : index
    %c0_20 = arith.constant 0 : index
    %17 = vector.load %arg6[%c1_18, %c1_19, %c0_20] : memref<24x24x16xbf16, #tpu.memory_space<vmem>>, vector<16x16x16xbf16>
    %18 = vector.shape_cast %17 : vector<16x16x16xbf16> to vector<256x16xbf16>
    %c1_21 = arith.constant 1 : index
    %c2_22 = arith.constant 2 : index
    %c0_23 = arith.constant 0 : index
    %19 = vector.load %arg6[%c1_21, %c2_22, %c0_23] : memref<24x24x16xbf16, #tpu.memory_space<vmem>>, vector<16x16x16xbf16>
    %20 = vector.shape_cast %19 : vector<16x16x16xbf16> to vector<256x16xbf16>
    %c2_24 = arith.constant 2 : index
    %c0_25 = arith.constant 0 : index
    %c0_26 = arith.constant 0 : index
    %21 = vector.load %arg6[%c2_24, %c0_25, %c0_26] : memref<24x24x16xbf16, #tpu.memory_space<vmem>>, vector<16x16x16xbf16>
    %22 = vector.shape_cast %21 : vector<16x16x16xbf16> to vector<256x16xbf16>
    %c2_27 = arith.constant 2 : index
    %c1_28 = arith.constant 1 : index
    %c0_29 = arith.constant 0 : index
    %23 = vector.load %arg6[%c2_27, %c1_28, %c0_29] : memref<24x24x16xbf16, #tpu.memory_space<vmem>>, vector<16x16x16xbf16>
    %24 = vector.shape_cast %23 : vector<16x16x16xbf16> to vector<256x16xbf16>
    %c2_30 = arith.constant 2 : index
    %c2_31 = arith.constant 2 : index
    %c0_32 = arith.constant 0 : index
    %25 = vector.load %arg6[%c2_30, %c2_31, %c0_32] : memref<24x24x16xbf16, #tpu.memory_space<vmem>>, vector<16x16x16xbf16>
    %26 = vector.shape_cast %25 : vector<16x16x16xbf16> to vector<256x16xbf16>
    %27 = tpu.concatenate %10, %12, %14, %16, %18, %20, %22, %24, %26 in 1 : vector<256x16xbf16>, vector<256x16xbf16>, vector<256x16xbf16>, vector<256x16xbf16>, vector<256x16xbf16>, vector<256x16xbf16>, vector<256x16xbf16>, vector<256x16xbf16>, vector<256x16xbf16> -> vector<256x144xbf16>
    %c0_33 = arith.constant 0 : index
    %c0_34 = arith.constant 0 : index
    %28 = vector.load %arg3[%c0_33, %c0_34] : memref<144x64xbf16, #tpu.memory_space<vmem>>, vector<144x64xbf16>
    %cst_35 = arith.constant dense<0.000000e+00> : vector<256x64xf32>
    %29 = tpu.matmul %27, %28, %cst_35 {dimension_numbers = #tpu.dot_dimension_numbers<[1], [0], [0], [1], [0, 0, 1, 1], [], []>} : vector<256x144xbf16>, vector<144x64xbf16>, vector<256x64xf32> -> vector<256x64xf32>
    %c0_36 = arith.constant 0 : index
    %c0_37 = arith.constant 0 : index
    %30 = vector.load %arg4[%c0_36, %c0_37] : memref<1x64xf32, #tpu.memory_space<vmem>>, vector<1x64xf32>
    %31 = vector.broadcast %30 : vector<1x64xf32> to vector<256x64xf32>
    %32 = arith.addf %29, %31 : vector<256x64xf32>
    %c0_38 = arith.constant 0 : index
    %c0_39 = arith.constant 0 : index
    %c0_40 = arith.constant 0 : index
    %33 = vector.load %arg5[%c0_38, %c0_39, %c0_40] : memref<1x256x64xf32, #tpu.memory_space<vmem>>, vector<1x256x64xf32>
    %34 = vector.shape_cast %33 : vector<1x256x64xf32> to vector<256x64xf32>
    %35 = vector.shape_cast %32 : vector<256x64xf32> to vector<1x256x64xf32>
    tpu.vector_store %arg5[%c0_38, %c0_39, %c0_40], %35 {strides = array<i32>} : memref<1x256x64xf32, #tpu.memory_space<vmem>>, vector<1x256x64xf32>,
    return
  }
  func.func @transform_0(%arg0: i32) -> (i32, i32, i32) {
    %c0_i32 = arith.constant 0 : i32
    %c0_i32_0 = arith.constant 0 : i32
    %c0_i32_1 = arith.constant 0 : i32
    return %arg0, %c0_i32, %c0_i32_0 : i32, i32, i32
  }
  func.func @transform_1(%arg0: i32) -> (i32, i32) {
    %c0_i32 = arith.constant 0 : i32
    %c0_i32_0 = arith.constant 0 : i32
    %c0_i32_1 = arith.constant 0 : i32
    return %c0_i32, %c0_i32_0 : i32, i32
  }
  func.func @transform_2(%arg0: i32) -> (i32, i32) {
    %c0_i32 = arith.constant 0 : i32
    %c0_i32_0 = arith.constant 0 : i32
    %c0_i32_1 = arith.constant 0 : i32
    return %c0_i32, %c0_i32_0 : i32, i32
  }
  func.func @transform_3(%arg0: i32) -> (i32, i32) {
    %c0_i32 = arith.constant 0 : i32
    %c0_i32_0 = arith.constant 0 : i32
    %c0_i32_1 = arith.constant 0 : i32
    return %c0_i32, %c0_i32_0 : i32, i32
  }
  func.func @transform_4(%arg0: i32) -> (i32, i32, i32) {
    %c0_i32 = arith.constant 0 : i32
    %c0_i32_0 = arith.constant 0 : i32
    %c0_i32_1 = arith.constant 0 : i32
    return %arg0, %c0_i32, %c0_i32_0 : i32, i32, i32
  }
}

module attributes {stable_mosaic.version = 11 : i64} {
  func.func @_stage_single_kernel(%arg0: i32, %arg1: memref<1x17x34x34xbf16, #tpu.memory_space<vmem>>, %arg2: memref<17xf32, #tpu.memory_space<smem>>, %arg3: memref<16xf32, #tpu.memory_space<smem>>, %arg4: memref<1xf32, #tpu.memory_space<smem>>, %arg5: memref<1x2x32x64xf32, #tpu.memory_space<vmem>>) attributes {dimension_semantics = [#tpu.dimension_semantics<parallel>], iteration_bounds = array<i64: 2>, scalar_prefetch = 0 : i64, scratch_operands = 0 : i64, tpu.core_type = #tpu.core_type<tc>, window_params = [{transform_indices = @transform_0, window_bounds = array<i64: 1, 17, 34, 34>}, {transform_indices = @transform_1, window_bounds = array<i64: 17>}, {transform_indices = @transform_2, window_bounds = array<i64: 16>}, {transform_indices = @transform_3, window_bounds = array<i64: 1>}, {transform_indices = @transform_4, window_bounds = array<i64: 1, 2, 32, 64>}]} {
    %c0 = arith.constant 0 : index
    %c0_0 = arith.constant 0 : index
    %c0_1 = arith.constant 0 : index
    %c0_2 = arith.constant 0 : index
    %0 = vector.load %arg1[%c0, %c0_0, %c0_1, %c0_2] : memref<1x17x34x34xbf16, #tpu.memory_space<vmem>>, vector<1x1x34x34xbf16>
    %1 = vector.shape_cast %0 : vector<1x1x34x34xbf16> to vector<34x34xbf16>
    %2 = arith.extf %1 : vector<34x34xbf16> to vector<34x34xf32>
    %c0_3 = arith.constant 0 : index
    %3 = memref.load %arg2[%c0_3] : memref<17xf32, #tpu.memory_space<smem>>
    %4 = vector.broadcast %3 : f32 to vector<34x34xf32>
    %5 = arith.mulf %2, %4 : vector<34x34xf32>
    %c0_4 = arith.constant 0 : index
    %c1 = arith.constant 1 : index
    %c0_5 = arith.constant 0 : index
    %c0_6 = arith.constant 0 : index
    %6 = vector.load %arg1[%c0_4, %c1, %c0_5, %c0_6] : memref<1x17x34x34xbf16, #tpu.memory_space<vmem>>, vector<1x1x34x34xbf16>
    %7 = vector.shape_cast %6 : vector<1x1x34x34xbf16> to vector<34x34xbf16>
    %8 = arith.extf %7 : vector<34x34xbf16> to vector<34x34xf32>
    %c1_7 = arith.constant 1 : index
    %9 = memref.load %arg2[%c1_7] : memref<17xf32, #tpu.memory_space<smem>>
    %10 = vector.broadcast %9 : f32 to vector<34x34xf32>
    %11 = arith.mulf %8, %10 : vector<34x34xf32>
    %12 = arith.addf %5, %11 : vector<34x34xf32>
    %c0_8 = arith.constant 0 : index
    %c2 = arith.constant 2 : index
    %c0_9 = arith.constant 0 : index
    %c0_10 = arith.constant 0 : index
    %13 = vector.load %arg1[%c0_8, %c2, %c0_9, %c0_10] : memref<1x17x34x34xbf16, #tpu.memory_space<vmem>>, vector<1x1x34x34xbf16>
    %14 = vector.shape_cast %13 : vector<1x1x34x34xbf16> to vector<34x34xbf16>
    %15 = arith.extf %14 : vector<34x34xbf16> to vector<34x34xf32>
    %c2_11 = arith.constant 2 : index
    %16 = memref.load %arg2[%c2_11] : memref<17xf32, #tpu.memory_space<smem>>
    %17 = vector.broadcast %16 : f32 to vector<34x34xf32>
    %18 = arith.mulf %15, %17 : vector<34x34xf32>
    %19 = arith.addf %12, %18 : vector<34x34xf32>
    %c0_12 = arith.constant 0 : index
    %c3 = arith.constant 3 : index
    %c0_13 = arith.constant 0 : index
    %c0_14 = arith.constant 0 : index
    %20 = vector.load %arg1[%c0_12, %c3, %c0_13, %c0_14] : memref<1x17x34x34xbf16, #tpu.memory_space<vmem>>, vector<1x1x34x34xbf16>
    %21 = vector.shape_cast %20 : vector<1x1x34x34xbf16> to vector<34x34xbf16>
    %22 = arith.extf %21 : vector<34x34xbf16> to vector<34x34xf32>
    %c3_15 = arith.constant 3 : index
    %23 = memref.load %arg2[%c3_15] : memref<17xf32, #tpu.memory_space<smem>>
    %24 = vector.broadcast %23 : f32 to vector<34x34xf32>
    %25 = arith.mulf %22, %24 : vector<34x34xf32>
    %26 = arith.addf %19, %25 : vector<34x34xf32>
    %c0_16 = arith.constant 0 : index
    %c4 = arith.constant 4 : index
    %c0_17 = arith.constant 0 : index
    %c0_18 = arith.constant 0 : index
    %27 = vector.load %arg1[%c0_16, %c4, %c0_17, %c0_18] : memref<1x17x34x34xbf16, #tpu.memory_space<vmem>>, vector<1x1x34x34xbf16>
    %28 = vector.shape_cast %27 : vector<1x1x34x34xbf16> to vector<34x34xbf16>
    %29 = arith.extf %28 : vector<34x34xbf16> to vector<34x34xf32>
    %c4_19 = arith.constant 4 : index
    %30 = memref.load %arg2[%c4_19] : memref<17xf32, #tpu.memory_space<smem>>
    %31 = vector.broadcast %30 : f32 to vector<34x34xf32>
    %32 = arith.mulf %29, %31 : vector<34x34xf32>
    %33 = arith.addf %26, %32 : vector<34x34xf32>
    %c0_20 = arith.constant 0 : index
    %c5 = arith.constant 5 : index
    %c0_21 = arith.constant 0 : index
    %c0_22 = arith.constant 0 : index
    %34 = vector.load %arg1[%c0_20, %c5, %c0_21, %c0_22] : memref<1x17x34x34xbf16, #tpu.memory_space<vmem>>, vector<1x1x34x34xbf16>
    %35 = vector.shape_cast %34 : vector<1x1x34x34xbf16> to vector<34x34xbf16>
    %36 = arith.extf %35 : vector<34x34xbf16> to vector<34x34xf32>
    %c5_23 = arith.constant 5 : index
    %37 = memref.load %arg2[%c5_23] : memref<17xf32, #tpu.memory_space<smem>>
    %38 = vector.broadcast %37 : f32 to vector<34x34xf32>
    %39 = arith.mulf %36, %38 : vector<34x34xf32>
    %40 = arith.addf %33, %39 : vector<34x34xf32>
    %c0_24 = arith.constant 0 : index
    %c6 = arith.constant 6 : index
    %c0_25 = arith.constant 0 : index
    %c0_26 = arith.constant 0 : index
    %41 = vector.load %arg1[%c0_24, %c6, %c0_25, %c0_26] : memref<1x17x34x34xbf16, #tpu.memory_space<vmem>>, vector<1x1x34x34xbf16>
    %42 = vector.shape_cast %41 : vector<1x1x34x34xbf16> to vector<34x34xbf16>
    %43 = arith.extf %42 : vector<34x34xbf16> to vector<34x34xf32>
    %c6_27 = arith.constant 6 : index
    %44 = memref.load %arg2[%c6_27] : memref<17xf32, #tpu.memory_space<smem>>
    %45 = vector.broadcast %44 : f32 to vector<34x34xf32>
    %46 = arith.mulf %43, %45 : vector<34x34xf32>
    %47 = arith.addf %40, %46 : vector<34x34xf32>
    %c0_28 = arith.constant 0 : index
    %c7 = arith.constant 7 : index
    %c0_29 = arith.constant 0 : index
    %c0_30 = arith.constant 0 : index
    %48 = vector.load %arg1[%c0_28, %c7, %c0_29, %c0_30] : memref<1x17x34x34xbf16, #tpu.memory_space<vmem>>, vector<1x1x34x34xbf16>
    %49 = vector.shape_cast %48 : vector<1x1x34x34xbf16> to vector<34x34xbf16>
    %50 = arith.extf %49 : vector<34x34xbf16> to vector<34x34xf32>
    %c7_31 = arith.constant 7 : index
    %51 = memref.load %arg2[%c7_31] : memref<17xf32, #tpu.memory_space<smem>>
    %52 = vector.broadcast %51 : f32 to vector<34x34xf32>
    %53 = arith.mulf %50, %52 : vector<34x34xf32>
    %54 = arith.addf %47, %53 : vector<34x34xf32>
    %c0_32 = arith.constant 0 : index
    %c8 = arith.constant 8 : index
    %c0_33 = arith.constant 0 : index
    %c0_34 = arith.constant 0 : index
    %55 = vector.load %arg1[%c0_32, %c8, %c0_33, %c0_34] : memref<1x17x34x34xbf16, #tpu.memory_space<vmem>>, vector<1x1x34x34xbf16>
    %56 = vector.shape_cast %55 : vector<1x1x34x34xbf16> to vector<34x34xbf16>
    %57 = arith.extf %56 : vector<34x34xbf16> to vector<34x34xf32>
    %c8_35 = arith.constant 8 : index
    %58 = memref.load %arg2[%c8_35] : memref<17xf32, #tpu.memory_space<smem>>
    %59 = vector.broadcast %58 : f32 to vector<34x34xf32>
    %60 = arith.mulf %57, %59 : vector<34x34xf32>
    %61 = arith.addf %54, %60 : vector<34x34xf32>
    %c0_36 = arith.constant 0 : index
    %c9 = arith.constant 9 : index
    %c0_37 = arith.constant 0 : index
    %c0_38 = arith.constant 0 : index
    %62 = vector.load %arg1[%c0_36, %c9, %c0_37, %c0_38] : memref<1x17x34x34xbf16, #tpu.memory_space<vmem>>, vector<1x1x34x34xbf16>
    %63 = vector.shape_cast %62 : vector<1x1x34x34xbf16> to vector<34x34xbf16>
    %64 = arith.extf %63 : vector<34x34xbf16> to vector<34x34xf32>
    %c9_39 = arith.constant 9 : index
    %65 = memref.load %arg2[%c9_39] : memref<17xf32, #tpu.memory_space<smem>>
    %66 = vector.broadcast %65 : f32 to vector<34x34xf32>
    %67 = arith.mulf %64, %66 : vector<34x34xf32>
    %68 = arith.addf %61, %67 : vector<34x34xf32>
    %c0_40 = arith.constant 0 : index
    %c10 = arith.constant 10 : index
    %c0_41 = arith.constant 0 : index
    %c0_42 = arith.constant 0 : index
    %69 = vector.load %arg1[%c0_40, %c10, %c0_41, %c0_42] : memref<1x17x34x34xbf16, #tpu.memory_space<vmem>>, vector<1x1x34x34xbf16>
    %70 = vector.shape_cast %69 : vector<1x1x34x34xbf16> to vector<34x34xbf16>
    %71 = arith.extf %70 : vector<34x34xbf16> to vector<34x34xf32>
    %c10_43 = arith.constant 10 : index
    %72 = memref.load %arg2[%c10_43] : memref<17xf32, #tpu.memory_space<smem>>
    %73 = vector.broadcast %72 : f32 to vector<34x34xf32>
    %74 = arith.mulf %71, %73 : vector<34x34xf32>
    %75 = arith.addf %68, %74 : vector<34x34xf32>
    %c0_44 = arith.constant 0 : index
    %c11 = arith.constant 11 : index
    %c0_45 = arith.constant 0 : index
    %c0_46 = arith.constant 0 : index
    %76 = vector.load %arg1[%c0_44, %c11, %c0_45, %c0_46] : memref<1x17x34x34xbf16, #tpu.memory_space<vmem>>, vector<1x1x34x34xbf16>
    %77 = vector.shape_cast %76 : vector<1x1x34x34xbf16> to vector<34x34xbf16>
    %78 = arith.extf %77 : vector<34x34xbf16> to vector<34x34xf32>
    %c11_47 = arith.constant 11 : index
    %79 = memref.load %arg2[%c11_47] : memref<17xf32, #tpu.memory_space<smem>>
    %80 = vector.broadcast %79 : f32 to vector<34x34xf32>
    %81 = arith.mulf %78, %80 : vector<34x34xf32>
    %82 = arith.addf %75, %81 : vector<34x34xf32>
    %c0_48 = arith.constant 0 : index
    %c12 = arith.constant 12 : index
    %c0_49 = arith.constant 0 : index
    %c0_50 = arith.constant 0 : index
    %83 = vector.load %arg1[%c0_48, %c12, %c0_49, %c0_50] : memref<1x17x34x34xbf16, #tpu.memory_space<vmem>>, vector<1x1x34x34xbf16>
    %84 = vector.shape_cast %83 : vector<1x1x34x34xbf16> to vector<34x34xbf16>
    %85 = arith.extf %84 : vector<34x34xbf16> to vector<34x34xf32>
    %c12_51 = arith.constant 12 : index
    %86 = memref.load %arg2[%c12_51] : memref<17xf32, #tpu.memory_space<smem>>
    %87 = vector.broadcast %86 : f32 to vector<34x34xf32>
    %88 = arith.mulf %85, %87 : vector<34x34xf32>
    %89 = arith.addf %82, %88 : vector<34x34xf32>
    %c0_52 = arith.constant 0 : index
    %c13 = arith.constant 13 : index
    %c0_53 = arith.constant 0 : index
    %c0_54 = arith.constant 0 : index
    %90 = vector.load %arg1[%c0_52, %c13, %c0_53, %c0_54] : memref<1x17x34x34xbf16, #tpu.memory_space<vmem>>, vector<1x1x34x34xbf16>
    %91 = vector.shape_cast %90 : vector<1x1x34x34xbf16> to vector<34x34xbf16>
    %92 = arith.extf %91 : vector<34x34xbf16> to vector<34x34xf32>
    %c13_55 = arith.constant 13 : index
    %93 = memref.load %arg2[%c13_55] : memref<17xf32, #tpu.memory_space<smem>>
    %94 = vector.broadcast %93 : f32 to vector<34x34xf32>
    %95 = arith.mulf %92, %94 : vector<34x34xf32>
    %96 = arith.addf %89, %95 : vector<34x34xf32>
    %c0_56 = arith.constant 0 : index
    %c14 = arith.constant 14 : index
    %c0_57 = arith.constant 0 : index
    %c0_58 = arith.constant 0 : index
    %97 = vector.load %arg1[%c0_56, %c14, %c0_57, %c0_58] : memref<1x17x34x34xbf16, #tpu.memory_space<vmem>>, vector<1x1x34x34xbf16>
    %98 = vector.shape_cast %97 : vector<1x1x34x34xbf16> to vector<34x34xbf16>
    %99 = arith.extf %98 : vector<34x34xbf16> to vector<34x34xf32>
    %c14_59 = arith.constant 14 : index
    %100 = memref.load %arg2[%c14_59] : memref<17xf32, #tpu.memory_space<smem>>
    %101 = vector.broadcast %100 : f32 to vector<34x34xf32>
    %102 = arith.mulf %99, %101 : vector<34x34xf32>
    %103 = arith.addf %96, %102 : vector<34x34xf32>
    %c0_60 = arith.constant 0 : index
    %c15 = arith.constant 15 : index
    %c0_61 = arith.constant 0 : index
    %c0_62 = arith.constant 0 : index
    %104 = vector.load %arg1[%c0_60, %c15, %c0_61, %c0_62] : memref<1x17x34x34xbf16, #tpu.memory_space<vmem>>, vector<1x1x34x34xbf16>
    %105 = vector.shape_cast %104 : vector<1x1x34x34xbf16> to vector<34x34xbf16>
    %106 = arith.extf %105 : vector<34x34xbf16> to vector<34x34xf32>
    %c15_63 = arith.constant 15 : index
    %107 = memref.load %arg2[%c15_63] : memref<17xf32, #tpu.memory_space<smem>>
    %108 = vector.broadcast %107 : f32 to vector<34x34xf32>
    %109 = arith.mulf %106, %108 : vector<34x34xf32>
    %110 = arith.addf %103, %109 : vector<34x34xf32>
    %c0_64 = arith.constant 0 : index
    %c16 = arith.constant 16 : index
    %c0_65 = arith.constant 0 : index
    %c0_66 = arith.constant 0 : index
    %111 = vector.load %arg1[%c0_64, %c16, %c0_65, %c0_66] : memref<1x17x34x34xbf16, #tpu.memory_space<vmem>>, vector<1x1x34x34xbf16>
    %112 = vector.shape_cast %111 : vector<1x1x34x34xbf16> to vector<34x34xbf16>
    %113 = arith.extf %112 : vector<34x34xbf16> to vector<34x34xf32>
    %c16_67 = arith.constant 16 : index
    %114 = memref.load %arg2[%c16_67] : memref<17xf32, #tpu.memory_space<smem>>
    %115 = vector.broadcast %114 : f32 to vector<34x34xf32>
    %116 = arith.mulf %113, %115 : vector<34x34xf32>
    %117 = arith.addf %110, %116 : vector<34x34xf32>
    %cst = arith.constant 0.000000e+00 : f32
    %118 = vector.broadcast %cst : f32 to vector<34x34xf32>
    %119 = arith.maximumf %117, %118 : vector<34x34xf32>
    %c0_68 = arith.constant 0 : index
    %120 = memref.load %arg4[%c0_68] : memref<1xf32, #tpu.memory_space<smem>>
    %cst_69 = arith.constant 0.000000e+00 : f32
    %121 = vector.broadcast %cst_69 : f32 to vector<32x32xf32>
    %c0_70 = arith.constant 0 : index
    %122 = memref.load %arg3[%c0_70] : memref<16xf32, #tpu.memory_space<smem>>
    %123 = vector.extract_strided_slice %119 {offsets = [1, 1], sizes = [32, 32], strides = [1, 1]} : vector<34x34xf32> to vector<32x32xf32>
    %124 = vector.broadcast %122 : f32 to vector<32x32xf32>
    %125 = arith.mulf %123, %124 : vector<32x32xf32>
    %126 = arith.addf %121, %125 : vector<32x32xf32>
    %c1_71 = arith.constant 1 : index
    %127 = memref.load %arg3[%c1_71] : memref<16xf32, #tpu.memory_space<smem>>
    %128 = vector.extract_strided_slice %119 {offsets = [1, 0], sizes = [32, 32], strides = [1, 1]} : vector<34x34xf32> to vector<32x32xf32>
    %129 = vector.broadcast %127 : f32 to vector<32x32xf32>
    %130 = arith.mulf %128, %129 : vector<32x32xf32>
    %131 = arith.addf %126, %130 : vector<32x32xf32>
    %c2_72 = arith.constant 2 : index
    %132 = memref.load %arg3[%c2_72] : memref<16xf32, #tpu.memory_space<smem>>
    %133 = vector.extract_strided_slice %119 {offsets = [0, 1], sizes = [32, 32], strides = [1, 1]} : vector<34x34xf32> to vector<32x32xf32>
    %134 = vector.broadcast %132 : f32 to vector<32x32xf32>
    %135 = arith.mulf %133, %134 : vector<32x32xf32>
    %136 = arith.addf %131, %135 : vector<32x32xf32>
    %c3_73 = arith.constant 3 : index
    %137 = memref.load %arg3[%c3_73] : memref<16xf32, #tpu.memory_space<smem>>
    %138 = vector.extract_strided_slice %119 {offsets = [0, 0], sizes = [32, 32], strides = [1, 1]} : vector<34x34xf32> to vector<32x32xf32>
    %139 = vector.broadcast %137 : f32 to vector<32x32xf32>
    %140 = arith.mulf %138, %139 : vector<32x32xf32>
    %141 = arith.addf %136, %140 : vector<32x32xf32>
    %142 = vector.broadcast %120 : f32 to vector<32x32xf32>
    %143 = arith.addf %141, %142 : vector<32x32xf32>
    %cst_74 = arith.constant 0.000000e+00 : f32
    %144 = vector.broadcast %cst_74 : f32 to vector<32x32xf32>
    %c4_75 = arith.constant 4 : index
    %145 = memref.load %arg3[%c4_75] : memref<16xf32, #tpu.memory_space<smem>>
    %146 = vector.extract_strided_slice %119 {offsets = [1, 2], sizes = [32, 32], strides = [1, 1]} : vector<34x34xf32> to vector<32x32xf32>
    %147 = vector.broadcast %145 : f32 to vector<32x32xf32>
    %148 = arith.mulf %146, %147 : vector<32x32xf32>
    %149 = arith.addf %144, %148 : vector<32x32xf32>
    %c5_76 = arith.constant 5 : index
    %150 = memref.load %arg3[%c5_76] : memref<16xf32, #tpu.memory_space<smem>>
    %151 = vector.extract_strided_slice %119 {offsets = [1, 1], sizes = [32, 32], strides = [1, 1]} : vector<34x34xf32> to vector<32x32xf32>
    %152 = vector.broadcast %150 : f32 to vector<32x32xf32>
    %153 = arith.mulf %151, %152 : vector<32x32xf32>
    %154 = arith.addf %149, %153 : vector<32x32xf32>
    %c6_77 = arith.constant 6 : index
    %155 = memref.load %arg3[%c6_77] : memref<16xf32, #tpu.memory_space<smem>>
    %156 = vector.extract_strided_slice %119 {offsets = [0, 2], sizes = [32, 32], strides = [1, 1]} : vector<34x34xf32> to vector<32x32xf32>
    %157 = vector.broadcast %155 : f32 to vector<32x32xf32>
    %158 = arith.mulf %156, %157 : vector<32x32xf32>
    %159 = arith.addf %154, %158 : vector<32x32xf32>
    %c7_78 = arith.constant 7 : index
    %160 = memref.load %arg3[%c7_78] : memref<16xf32, #tpu.memory_space<smem>>
    %161 = vector.extract_strided_slice %119 {offsets = [0, 1], sizes = [32, 32], strides = [1, 1]} : vector<34x34xf32> to vector<32x32xf32>
    %162 = vector.broadcast %160 : f32 to vector<32x32xf32>
    %163 = arith.mulf %161, %162 : vector<32x32xf32>
    %164 = arith.addf %159, %163 : vector<32x32xf32>
    %165 = vector.broadcast %120 : f32 to vector<32x32xf32>
    %166 = arith.addf %164, %165 : vector<32x32xf32>
    %167 = tpu.concatenate %143, %166 in 1 : vector<32x32xf32>, vector<32x32xf32> -> vector<32x64xf32>
    %c0_79 = arith.constant 0 : index
    %c0_80 = arith.constant 0 : index
    %c0_81 = arith.constant 0 : index
    %c0_82 = arith.constant 0 : index
    %168 = vector.load %arg5[%c0_79, %c0_80, %c0_81, %c0_82] : memref<1x2x32x64xf32, #tpu.memory_space<vmem>>, vector<1x1x32x64xf32>
    %169 = vector.shape_cast %168 : vector<1x1x32x64xf32> to vector<32x64xf32>
    %170 = vector.shape_cast %167 : vector<32x64xf32> to vector<1x1x32x64xf32>
    tpu.vector_store %arg5[%c0_79, %c0_80, %c0_81, %c0_82], %170 {strides = array<i32>} : memref<1x2x32x64xf32, #tpu.memory_space<vmem>>, vector<1x1x32x64xf32>,
    %cst_83 = arith.constant 0.000000e+00 : f32
    %171 = vector.broadcast %cst_83 : f32 to vector<32x32xf32>
    %c8_84 = arith.constant 8 : index
    %172 = memref.load %arg3[%c8_84] : memref<16xf32, #tpu.memory_space<smem>>
    %173 = vector.extract_strided_slice %119 {offsets = [2, 1], sizes = [32, 32], strides = [1, 1]} : vector<34x34xf32> to vector<32x32xf32>
    %174 = vector.broadcast %172 : f32 to vector<32x32xf32>
    %175 = arith.mulf %173, %174 : vector<32x32xf32>
    %176 = arith.addf %171, %175 : vector<32x32xf32>
    %c9_85 = arith.constant 9 : index
    %177 = memref.load %arg3[%c9_85] : memref<16xf32, #tpu.memory_space<smem>>
    %178 = vector.extract_strided_slice %119 {offsets = [2, 0], sizes = [32, 32], strides = [1, 1]} : vector<34x34xf32> to vector<32x32xf32>
    %179 = vector.broadcast %177 : f32 to vector<32x32xf32>
    %180 = arith.mulf %178, %179 : vector<32x32xf32>
    %181 = arith.addf %176, %180 : vector<32x32xf32>
    %c10_86 = arith.constant 10 : index
    %182 = memref.load %arg3[%c10_86] : memref<16xf32, #tpu.memory_space<smem>>
    %183 = vector.extract_strided_slice %119 {offsets = [1, 1], sizes = [32, 32], strides = [1, 1]} : vector<34x34xf32> to vector<32x32xf32>
    %184 = vector.broadcast %182 : f32 to vector<32x32xf32>
    %185 = arith.mulf %183, %184 : vector<32x32xf32>
    %186 = arith.addf %181, %185 : vector<32x32xf32>
    %c11_87 = arith.constant 11 : index
    %187 = memref.load %arg3[%c11_87] : memref<16xf32, #tpu.memory_space<smem>>
    %188 = vector.extract_strided_slice %119 {offsets = [1, 0], sizes = [32, 32], strides = [1, 1]} : vector<34x34xf32> to vector<32x32xf32>
    %189 = vector.broadcast %187 : f32 to vector<32x32xf32>
    %190 = arith.mulf %188, %189 : vector<32x32xf32>
    %191 = arith.addf %186, %190 : vector<32x32xf32>
    %192 = vector.broadcast %120 : f32 to vector<32x32xf32>
    %193 = arith.addf %191, %192 : vector<32x32xf32>
    %cst_88 = arith.constant 0.000000e+00 : f32
    %194 = vector.broadcast %cst_88 : f32 to vector<32x32xf32>
    %c12_89 = arith.constant 12 : index
    %195 = memref.load %arg3[%c12_89] : memref<16xf32, #tpu.memory_space<smem>>
    %196 = vector.extract_strided_slice %119 {offsets = [2, 2], sizes = [32, 32], strides = [1, 1]} : vector<34x34xf32> to vector<32x32xf32>
    %197 = vector.broadcast %195 : f32 to vector<32x32xf32>
    %198 = arith.mulf %196, %197 : vector<32x32xf32>
    %199 = arith.addf %194, %198 : vector<32x32xf32>
    %c13_90 = arith.constant 13 : index
    %200 = memref.load %arg3[%c13_90] : memref<16xf32, #tpu.memory_space<smem>>
    %201 = vector.extract_strided_slice %119 {offsets = [2, 1], sizes = [32, 32], strides = [1, 1]} : vector<34x34xf32> to vector<32x32xf32>
    %202 = vector.broadcast %200 : f32 to vector<32x32xf32>
    %203 = arith.mulf %201, %202 : vector<32x32xf32>
    %204 = arith.addf %199, %203 : vector<32x32xf32>
    %c14_91 = arith.constant 14 : index
    %205 = memref.load %arg3[%c14_91] : memref<16xf32, #tpu.memory_space<smem>>
    %206 = vector.extract_strided_slice %119 {offsets = [1, 2], sizes = [32, 32], strides = [1, 1]} : vector<34x34xf32> to vector<32x32xf32>
    %207 = vector.broadcast %205 : f32 to vector<32x32xf32>
    %208 = arith.mulf %206, %207 : vector<32x32xf32>
    %209 = arith.addf %204, %208 : vector<32x32xf32>
    %c15_92 = arith.constant 15 : index
    %210 = memref.load %arg3[%c15_92] : memref<16xf32, #tpu.memory_space<smem>>
    %211 = vector.extract_strided_slice %119 {offsets = [1, 1], sizes = [32, 32], strides = [1, 1]} : vector<34x34xf32> to vector<32x32xf32>
    %212 = vector.broadcast %210 : f32 to vector<32x32xf32>
    %213 = arith.mulf %211, %212 : vector<32x32xf32>
    %214 = arith.addf %209, %213 : vector<32x32xf32>
    %215 = vector.broadcast %120 : f32 to vector<32x32xf32>
    %216 = arith.addf %214, %215 : vector<32x32xf32>
    %217 = tpu.concatenate %193, %216 in 1 : vector<32x32xf32>, vector<32x32xf32> -> vector<32x64xf32>
    %c0_93 = arith.constant 0 : index
    %c1_94 = arith.constant 1 : index
    %c0_95 = arith.constant 0 : index
    %c0_96 = arith.constant 0 : index
    %218 = vector.load %arg5[%c0_93, %c1_94, %c0_95, %c0_96] : memref<1x2x32x64xf32, #tpu.memory_space<vmem>>, vector<1x1x32x64xf32>
    %219 = vector.shape_cast %218 : vector<1x1x32x64xf32> to vector<32x64xf32>
    %220 = vector.shape_cast %217 : vector<32x64xf32> to vector<1x1x32x64xf32>
    tpu.vector_store %arg5[%c0_93, %c1_94, %c0_95, %c0_96], %220 {strides = array<i32>} : memref<1x2x32x64xf32, #tpu.memory_space<vmem>>, vector<1x1x32x64xf32>,
    return
  }
  func.func @transform_0(%arg0: i32) -> (i32, i32, i32, i32) {
    %c0_i32 = arith.constant 0 : i32
    %c0_i32_0 = arith.constant 0 : i32
    %c0_i32_1 = arith.constant 0 : i32
    %c0_i32_2 = arith.constant 0 : i32
    return %arg0, %c0_i32, %c0_i32_0, %c0_i32_1 : i32, i32, i32, i32
  }
  func.func @transform_1(%arg0: i32) -> i32 {
    %c0_i32 = arith.constant 0 : i32
    %c0_i32_0 = arith.constant 0 : i32
    return %c0_i32 : i32
  }
  func.func @transform_2(%arg0: i32) -> i32 {
    %c0_i32 = arith.constant 0 : i32
    %c0_i32_0 = arith.constant 0 : i32
    return %c0_i32 : i32
  }
  func.func @transform_3(%arg0: i32) -> i32 {
    %c0_i32 = arith.constant 0 : i32
    %c0_i32_0 = arith.constant 0 : i32
    return %c0_i32 : i32
  }
  func.func @transform_4(%arg0: i32) -> (i32, i32, i32, i32) {
    %c0_i32 = arith.constant 0 : i32
    %c0_i32_0 = arith.constant 0 : i32
    %c0_i32_1 = arith.constant 0 : i32
    %c0_i32_2 = arith.constant 0 : i32
    return %arg0, %c0_i32, %c0_i32_0, %c0_i32_1 : i32, i32, i32, i32
  }
}

</mosaic_0001>

<bundles_post_ra>
// kernel: upconv_block.2
= control target key start
LH: loop header
LB: loop body
LE: loop exit
PB: predicated region body
PF: predicated region fallthrough
CT: control target
= control target key end

     0   :  { %s4799_s15 = smov 0   ;;  %s6151_s0 = inlined_call_operand.vmem [shape: bf16[2,576,5], index: 0, kind: input, shape index: {}]   ;;  %s6152_s1 = inlined_call_operand.vmem [shape: bf16[5,16], index: 1, kind: input, shape index: {}]   ;;  %s6153_s2 = inlined_call_operand.vmem [shape: bf16[144,64], index: 2, kind: input, shape index: {}]   ;;  %s6154_s3 = inlined_call_operand.vmem [shape: f32[1,64], index: 3, kind: input, shape index: {}]   ;;  %s6155_s4 = inlined_call_operand.vmem [shape: f32[2,256,64], index: 4, kind: output, shape index: {}]  }
   0x1 LB: > { %s4162_s16 = sadd.s32 4294967295, %s4764_s15   ;;  %p4166_p0 = scmp.ge.s32.totalorder %s4764_s15, 1  ;;  %s4764_s15 = sphi %s4799_s15, %s14_s15  }
   0x2   : > { %p162_p1 = scmp.lt.s32.totalorder %s4764_s15, 3 }
   0x4   : > { %p163_p2 = pnand %p4166_p0, %p162_p1 }
   0x5   : > { %p188_p3 = scmp.lt.s32.totalorder (!%p163_p2), %s4162_s16, 1  ;;  %s4767_s23 = smov (!%p163_p2), 96  }
   0x6   : > { %166 = sbr.rel (%p163_p2) target bundleno = 839 (0x347), region = 36  ;;  %s4768_s24 = smov (!%p163_p2), 32  }
   0x7   : > { %s4769_s25 = smov (!%p163_p2), 16   ;;  %s4770_s26 = smov (!%p163_p2), 48  }
   0x8   : > { %s4771_s29 = smov (!%p163_p2), 80   ;;  %s4772_s30 = smov (!%p163_p2), 64  }
   0x9   : > { %s4773_s5 = smov (!%p163_p2), 112  }
   0xb   : > { %v271_v0 = vld [vmem:[%s6152_s1] sm:$0x7]  ;;  %vm561_vm0 = vcmask 1041408   ;;  %vm562_vm1 = vcmask 1042432   ;;  %v4766_v1 = vmov 65535   ;;  %s6161_s16 = smov (!%p188_p3, %s4162_s16), 1 }
   0xc   : > { %v563_v2 = vsel %vm561_vm0, 4294967295, %v4766_v1  ;;  %s4739_s19 = smul.u32 288, %s6161_s16  ;;  %vm452_vm2 = vcmask 39936   ;;  %vm901_vm3 = vcmask 125952   ;;  %vm1474_vm4 = vcmask 1046532   ;;  %s4644_s8 = sshll.u32 %s6161_s16, 8 }
   0xd   : > { %v564_v3 = vsel %vm562_vm1, %v563_v2, 0  ;;  %vm4849_vm5 = vmor %vm562_vm1, %vm1474_vm4  ;;  %vm1022_vm6 = vsmask.f32 3328  ;;  %vm1023_vm7 = vsmask.f32 7440  ;;  %vm3510_vm9 = vcmask 130048   ;;  %s5745_s10 = scalar_lea.vmem %s6155_s4, %s4644_s8 }
   0xe   : > { %v566_v4 = vand.u32 %v564_v3, %v271_v0  ;;  %s4817_s22 = scalar_lea.vmem %s6151_s0, %s4739_s19  ;;  %vm4860_vm8 = vmor %vm1022_vm6, %vm1023_vm7  ;;  %vm3559_vm10 = vcmask 261120   ;;  %vm3592_vm11 = vcmask 392192   ;;  %vm3625_vm12 = vcmask 523264  }
   0xf   : > { %v4645_v5 = vld [vmem:[%s4817_s22] sm:$0xff]  ;;  %v4663_v6 = vld [vmem:[%s4817_s22 + $0x90] sm:$0xff]  ;;  %v4646_v7 = vld [vmem:[%s4817_s22 + $0x8] sm:$0xff]  ;;  %vm3658_vm13 = vcmask 654336   ;;  %vm3691_vm14 = vcmask 785408   ;;  %vm3724_vm15 = vcmask 916480  }
  0x10   : > { %575 = vmatpush.bf16.msra.mxu0 %v566_v4  ;;  %4738 = vmatpush.bf16.msra.mxu3 %v566_v4  ;;  %v4647_v8 = vld [vmem:[%s4817_s22 + $0x10] sm:$0xff]  ;;  %v4664_v9 = vld [vmem:[%s4817_s22 + $0x98] sm:$0xff]  ;;  %v4649_v11 = vld [vmem:[%s4817_s22 + $0x20] sm:$0xff] }
  0x11   : > { %v4648_v10 = vld [vmem:[%s4817_s22 + $0x18] sm:$0xff]  ;;  %v4650_v12 = vld [vmem:[%s4817_s22 + $0x28] sm:$0xff]  ;;  %v4651_v13 = vld [vmem:[%s4817_s22 + $0x30] sm:$0xff] }
  0x12   : > { %v4652_v14 = vld [vmem:[%s4817_s22 + $0x38] sm:$0xff]  ;;  %v4653_v15 = vld [vmem:[%s4817_s22 + $0x40] sm:$0xff]  ;;  %v4654_v27 = vld [vmem:[%s4817_s22 + $0x48] sm:$0xff] }
  0x13   : > { %4314 = vmatmul.msk.bf16.vlgmr.msra.gmra.mxu0 %vm452_vm2, %v4645_v5  ;;  %4332 = vmatmul.msk.bf16.vlgmr.msra.gmra.mxu3 %vm452_vm2, %v4663_v6  ;;  %v4655_v56 = vld [vmem:[%s4817_s22 + $0x50] sm:$0xff]  ;;  %v4676_v2 = vld [vmem:[%s4817_s22 + $0xf8] sm:$0xff] }
  0x23   : > { %4315 = vmatmul.msk.bf16.gmra.mxu0 %vm452_vm2, %v4646_v7  ;;  %4333 = vmatmul.msk.bf16.gmra.mxu3 %vm452_vm2, %v4664_v9 }
  0x33   : > { %4316 = vmatmul.msk.bf16.gmra.mxu0 %vm452_vm2, %v4647_v8 }
  0x43   : > { %4317 = vmatmul.msk.bf16.gmra.mxu0 %vm452_vm2, %v4648_v10 }
  0x53   : > { %4318 = vmatmul.msk.bf16.gmra.mxu0 %vm452_vm2, %v4649_v11 }
  0x63   : > { %4319 = vmatmul.msk.bf16.gmra.mxu0 %vm452_vm2, %v4650_v12 }
  0x73   : > { %4320 = vmatmul.msk.bf16.gmra.mxu0 %vm452_vm2, %v4651_v13 }
  0x83   : > { %4321 = vmatmul.msk.bf16.gmra.mxu0 %vm452_vm2, %v4652_v14 }
  0x90   : > { %v577_v16 = vpop.f32.mrf.mxu0 }
  0x91   : > { %v757_v17 = vmax.f32 %v577_v16, 0.0 }
  0x93   : > { %v829_v18 = vpack.c.bf16 %v757_v17, %v757_v17  ;;  %4322 = vmatmul.msk.bf16.gmra.mxu0 %vm452_vm2, %v4653_v15 }
  0x95   : > { %902 = vst.msk [vmem:[#allocation2] sm:$0xf] %vm901_vm3, %v829_v18 }
  0x96   : > { %v667_v19 = vpop.f32.mrf.mxu3 }
  0x97   : > { %v793_v20 = vmax.f32 %v667_v19, 0.0 }
  0x98   : > { %v579_v21 = vpop.f32.mrf.mxu0 }
  0x99   : > { %v865_v22 = vpack.c.bf16 %v793_v20, %v793_v20  ;;  %v758_v23 = vmax.f32 %v579_v21, 0.0 }
  0x9b   : > { %938 = vst.msk [vmem:[#allocation2 + $0x90] sm:$0xf] %vm901_vm3, %v865_v22  ;;  %v830_v24 = vpack.c.bf16 %v758_v23, %v758_v23 }
  0x9c   : > { %v974_v33 = vld [vmem:[#allocation2] sm:$0xf] }
  0x9d   : > { %903 = vst.msk [vmem:[#allocation2 + $0x4] sm:$0xf] %vm901_vm3, %v830_v24  ;;  %v1409_v36 = vld [vmem:[#allocation2] sm:$0xe]  ;;  %v1026_v37 = vshrl.u32 %v974_v33, 16  ;;  %v1029_v38 = vshll.u32 %v974_v33, 16 }
  0x9e   : > { %v669_v25 = vpop.f32.mrf.mxu3  ;;  %v4350_v46 = vrot.slane %v1409_v36, 9 }
  0x9f   : > { %v794_v26 = vmax.f32 %v669_v25, 0.0  ;;  %v1028_v48 = vrot.slane %v1026_v37, 4  ;;  %v1031_v49 = vrot.slane %v1029_v38, 5 }
  0xa0   : > { %v582_v28 = vpop.f32.mrf.mxu0 }
  0xa1   : > { %v866_v29 = vpack.c.bf16 %v794_v26, %v794_v26  ;;  %v759_v30 = vmax.f32 %v582_v28, 0.0  ;;  %v1032_v58 = vor.u32 %v1031_v49, %v1028_v48 }
  0xa3   : > { %939 = vst.msk [vmem:[#allocation2 + $0x94] sm:$0xf] %vm901_vm3, %v866_v29  ;;  %v831_v31 = vpack.c.bf16 %v759_v30, %v759_v30  ;;  %4323 = vmatmul.msk.bf16.gmra.mxu0 %vm452_vm2, %v4654_v27  ;;  %v1033_v4 = vrot.slane %v1032_v58, 4 }
  0xa4   : > { %v975_v32 = vld [vmem:[#allocation2 + $0x4] sm:$0xf] }
  0xa5   : > { %904 = vst.msk [vmem:[#allocation2 + $0x8] sm:$0xf] %vm901_vm3, %v831_v31  ;;  %v1035_v34 = vshll.u32 %v975_v32, 16  ;;  %v1039_v35 = vshrl.u32 %v975_v32, 16  ;;  %v1478_v40 = vrot.slane %v975_v32, 5  ;;  %v4656_v31 = vld [vmem:[%s4817_s22 + $0x58] sm:$0xff] }
  0xa6   : > { %v672_v25 = vpop.f32.mrf.mxu3 }
  0xa7   : > { %v1037_v43 = vrot.slane %v1035_v34, 5  ;;  %v1041_v44 = vrot.slane %v1039_v35, 4  ;;  %v1479_v51 = vsel %vm4849_vm5, %v4350_v46, %v1478_v40  ;;  %v1480_v52 = vrot.slane %v1478_v40, 4  ;;  %v4737_v46 = vld [vmem:[%s6153_s2 + $0x40] sm:$0xff] }
  0xa8   : > { %v584_v39 = vpop.f32.mrf.mxu0  ;;  %v2950_v61 = vunpack.c.l.b16 %v1479_v51  ;;  %v795_v30 = vmax.f32 %v672_v25, 0.0  ;;  %3993 = vmatpush.bf16.msra.mxu2 %v4737_v46 }
  0xa9   : > { %v760_v42 = vmax.f32 %v584_v39, 0.0  ;;  %v1042_v54 = vor.u32 %v1041_v44, %v1037_v43  ;;  %v1038_v7 = vsel %vm4860_vm8, %v1033_v4, %v1037_v43 }
  0xaa   : > { %v4723_v45 = vld [vmem:[#allocation2 + $0x90] sm:$0xff]  ;;  %v2870_v12 = vunpack.c.l.b16 %v1038_v7 }
  0xab   : > { %v832_v47 = vpack.c.bf16 %v760_v42, %v760_v42  ;;  %3370 = vrot.lane.b32.xlu0 %v4723_v45, %s4767_s23  ;;  %v1043_v0 = vrot.slane %v1042_v54, 4  ;;  %v867_v45 = vpack.c.bf16 %v795_v30, %v795_v30 }
  0xac   : > { %v1006_v50 = vld [vmem:[#allocation2 + $0x8] sm:$0x1] }
  0xad   : > { %905 = vst.msk [vmem:[#allocation2 + $0xc] sm:$0xf] %vm901_vm3, %v832_v47  ;;  %v1481_v53 = vrot.slane %v1006_v50, 5  ;;  %v1045_v55 = vshll.u32 %v1006_v50, 16 }
  0xae   : > { %940 = vst.msk [vmem:[#allocation2 + $0x98] sm:$0xf] %vm901_vm3, %v867_v45 }
  0xaf   : > { %v1482_v57 = vsel %vm4849_vm5, %v1480_v52, %v1481_v53  ;;  %v1047_v59 = vrot.slane %v1045_v55, 5 }
  0xb0   : > { %v587_v60 = vpop.f32.mrf.mxu0  ;;  %v2951_v62 = vunpack.c.l.b16 %v1482_v57 }
  0xb1   : > { %v761_v63 = vmax.f32 %v587_v60, 0.0  ;;  %v1048_v5 = vsel %vm4860_vm8, %v1043_v0, %v1047_v59 }
  0xb2   : > { %v2982_v1 = vpack.c.b16 %v2951_v62, %v2950_v61  ;;  %v2871_v8 = vunpack.c.l.b16 %v1048_v5 }
  0xb3   : > { %v833_v3 = vpack.c.bf16 %v761_v63, %v761_v63  ;;  %4324 = vmatmul.msk.bf16.gmra.mxu0 %vm452_vm2, %v4655_v56 }
  0xb4   : > { %2998 = vrot.lane.b32.xlu0 %v2982_v1, %s4768_s24  ;;  %v1589_v6 = vld [vmem:[#allocation2 + $0xc] sm:$0xf]  ;;  %v2902_v14 = vpack.c.b16 %v2871_v8, %v2870_v12 }
  0xb5   : > { %906 = vst.msk [vmem:[#allocation2 + $0x10] sm:$0xf] %vm901_vm3, %v833_v3  ;;  %v1638_v9 = vshrl.u32 %v1589_v6, 16  ;;  %v1641_v10 = vshll.u32 %v1589_v6, 16  ;;  %v976_v15 = vld [vmem:[#allocation2 + $0xc] sm:$0xf] }
  0xb6   : > { %v1050_v24 = vshrl.u32 %v976_v15, 16  ;;  %v2021_v26 = vld [vmem:[#allocation2 + $0xc] sm:$0xe]  ;;  %v1053_v27 = vshll.u32 %v976_v15, 16 }
  0xb7   : > { %v1640_v17 = vrot.slane %v1638_v9, 4  ;;  %v1643_v18 = vrot.slane %v1641_v10, 5  ;;  %v4366_v38 = vrot.slane %v2021_v26, 9  ;;  %v1410_v63 = vld [vmem:[#allocation2 + $0xc] sm:$0xe]  ;;  %v4657_v26 = vld [vmem:[%s4817_s22 + $0x60] sm:$0xff] }
  0xb8   : > { %v589_v11 = vpop.f32.mrf.mxu0  ;;  %v1052_v39 = vrot.slane %v1050_v24, 4  ;;  %v1055_v43 = vrot.slane %v1053_v27, 5 }
  0xb9   : > { %v762_v13 = vmax.f32 %v589_v11, 0.0  ;;  %v1644_v33 = vor.u32 %v1643_v18, %v1640_v17 }
  0xba   : > { %v1056_v60 = vor.u32 %v1055_v43, %v1052_v39 }
  0xbb   : > { %v834_v16 = vpack.c.bf16 %v762_v13, %v762_v13  ;;  %v1645_v49 = vrot.slane %v1644_v33, 4  ;;  %v4351_v13 = vrot.slane %v1410_v63, 9 }
  0xbc   : > { %2918 = vrot.lane.b32.xlu0 %v2902_v14, %s4769_s25  ;;  %v4697_v19 = vld [vmem:[#allocation2 + $0xc] sm:$0xff] }
  0xbd   : > { %v1590_v20 = vld [vmem:[#allocation2 + $0x10] sm:$0xf]  ;;  %907 = vst.msk [vmem:[#allocation2 + $0x14] sm:$0xf] %vm901_vm3, %v834_v16  ;;  %3094 = vrot.lane.b32.xlu1 %v4697_v19, %s4770_s26  ;;  %v1057_v16 = vrot.slane %v1056_v60, 4 }
  0xbe   : > { %v4872_v21 = vld [vmem:[#allocation2 + $0x10] sm:$0xf]  ;;  %v1651_v22 = vshrl.u32 %v1590_v20, 16  ;;  %v1647_v23 = vshll.u32 %v1590_v20, 16  ;;  %v2087_v32 = vrot.slane %v1590_v20, 5 }
  0xbf   : > { %v1059_v28 = vshll.u32 %v4872_v21, 16  ;;  %v1063_v29 = vshrl.u32 %v4872_v21, 16  ;;  %v1485_v50 = vrot.slane %v4872_v21, 5 }
  0xc0   : > { %v1649_v34 = vrot.slane %v1647_v23, 5  ;;  %v1653_v35 = vrot.slane %v1651_v22, 4  ;;  %v592_v36 = vpop.f32.mrf.mxu0  ;;  %v2089_v48 = vrot.slane %v2087_v32, 4  ;;  %v2088_v52 = vsel %vm4849_vm5, %v4366_v38, %v2087_v32 }
  0xc1   : > { %v763_v37 = vmax.f32 %v592_v36, 0.0  ;;  %v4879_v40 = vrot.slane %v1059_v28, 5  ;;  %v1065_v44 = vrot.slane %v1063_v29, 4  ;;  %v3206_v4 = vunpack.c.l.b16 %v2088_v52 }
  0xc2   : > { %v1654_v42 = vor.u32 %v1653_v35, %v1649_v34  ;;  %v1650_v58 = vsel %vm4860_vm8, %v1645_v49, %v1649_v34  ;;  %v1487_v8 = vrot.slane %v1485_v50, 4  ;;  %v1486_v19 = vsel %vm4849_vm5, %v4351_v13, %v1485_v50 }
  0xc3   : > { %v835_v47 = vpack.c.bf16 %v763_v37, %v763_v37  ;;  %4325 = vmatmul.msk.bf16.gmra.mxu0 %vm452_vm2, %v4656_v31  ;;  %v1066_v56 = vor.u32 %v1065_v44, %v4879_v40  ;;  %v3126_v11 = vunpack.c.l.b16 %v1650_v58  ;;  %v1062_v20 = vsel %vm4860_vm8, %v1057_v16, %v4879_v40 }
  0xc4   : > { %v1621_v51 = vld [vmem:[#allocation2 + $0x14] sm:$0x1]  ;;  %v1655_v59 = vrot.slane %v1654_v42, 4  ;;  %v2952_v32 = vunpack.c.l.b16 %v1486_v19  ;;  %v2872_v33 = vunpack.c.l.b16 %v1062_v20 }
  0xc5   : > { %v1007_v53 = vld [vmem:[#allocation2 + $0x14] sm:$0x1]  ;;  %908 = vst.msk [vmem:[#allocation2 + $0x18] sm:$0xf] %vm901_vm3, %v835_v47  ;;  %v2090_v54 = vrot.slane %v1621_v51, 5  ;;  %v1657_v55 = vshll.u32 %v1621_v51, 16 }
  0xc6   : > { %v1069_v57 = vshll.u32 %v1007_v53, 16  ;;  %v1488_v0 = vrot.slane %v1007_v53, 5  ;;  %v1067_v9 = vrot.slane %v1066_v56, 4 }
  0xc7   : > { %v2091_v61 = vsel %vm4849_vm5, %v2089_v48, %v2090_v54  ;;  %v1659_v62 = vrot.slane %v1657_v55, 5 }
  0xc8   : > { %v1071_v1 = vrot.slane %v1069_v57, 5  ;;  %v594_v3 = vpop.f32.mrf.mxu0  ;;  %v3207_v5 = vunpack.c.l.b16 %v2091_v61  ;;  %v1489_v15 = vsel %vm4849_vm5, %v1487_v8, %v1488_v0 }
  0xc9   : > { %v764_v6 = vmax.f32 %v594_v3, 0.0  ;;  %v1660_v7 = vsel %vm4860_vm8, %v1655_v59, %v1659_v62  ;;  %v2953_v21 = vunpack.c.l.b16 %v1489_v15 }
  0xca   : > { %v3238_v10 = vpack.c.b16 %v3207_v5, %v3206_v4  ;;  %v3127_v12 = vunpack.c.l.b16 %v1660_v7  ;;  %v1072_v17 = vsel %vm4860_vm8, %v1067_v9, %v1071_v1 }
  0xcb   : > { %v836_v14 = vpack.c.bf16 %v764_v6, %v764_v6  ;;  %v2873_v22 = vunpack.c.l.b16 %v1072_v17  ;;  %v2983_v40 = vpack.c.b16 %v2953_v21, %v2952_v32 }
  0xcc   : > { %3254 = vrot.lane.b32.xlu2 %v3238_v10, %s4771_s29  ;;  %v3158_v18 = vpack.c.b16 %v3127_v12, %v3126_v11  ;;  %v1591_v23 = vld [vmem:[#allocation2 + $0x18] sm:$0xf] }
  0xcd   : > { %909 = vst.msk [vmem:[#allocation2 + $0x1c] sm:$0xf] %vm901_vm3, %v836_v14  ;;  %v2198_v24 = vld [vmem:[#allocation2 + $0x18] sm:$0xf]  ;;  %v1662_v27 = vshrl.u32 %v1591_v23, 16  ;;  %v1665_v28 = vshll.u32 %v1591_v23, 16  ;;  %v2903_v44 = vpack.c.b16 %v2873_v22, %v2872_v33 }
  0xce   : > { %3174 = vrot.lane.b32.xlu1 %v3158_v18, %s4772_s30  ;;  %v978_v25 = vld [vmem:[#allocation2 + $0x18] sm:$0xf]  ;;  %v2247_v29 = vshrl.u32 %v2198_v24, 16  ;;  %v2250_v30 = vshll.u32 %v2198_v24, 16 }
  0xcf   : > { %v1074_v34 = vshrl.u32 %v978_v25, 16  ;;  %v1077_v35 = vshll.u32 %v978_v25, 16  ;;  %v1664_v37 = vrot.slane %v1662_v27, 4  ;;  %v1667_v38 = vrot.slane %v1665_v28, 5  ;;  %v2630_v45 = vld [vmem:[#allocation2 + $0x18] sm:$0xe] }
  0xd0   : > { %v597_v31 = vpop.f32.mrf.mxu0  ;;  %v2249_v39 = vrot.slane %v2247_v29, 4  ;;  %v2252_v42 = vrot.slane %v2250_v30, 5  ;;  %v2022_v46 = vld [vmem:[#allocation2 + $0x18] sm:$0xe]  ;;  %v4382_v56 = vrot.slane %v2630_v45, 9 }
  0xd1   : > { %v765_v36 = vmax.f32 %v597_v31, 0.0  ;;  %v1411_v47 = vld [vmem:[#allocation2 + $0x18] sm:$0xe]  ;;  %v1668_v50 = vor.u32 %v1667_v38, %v1664_v37  ;;  %v4912_v52 = vrot.slane %v1074_v34, 4  ;;  %v4914_v53 = vrot.slane %v1077_v35, 5  ;;  %v4658_v35 = vld [vmem:[%s4817_s22 + $0x68] sm:$0xff] }
  0xd2   : > { %v2253_v51 = vor.u32 %v2252_v42, %v2249_v39  ;;  %v4367_v61 = vrot.slane %v2022_v46, 9  ;;  %v4352_v62 = vrot.slane %v1411_v47, 9 }
  0xd3   : > { %v837_v43 = vpack.c.bf16 %v765_v36, %v765_v36  ;;  %4326 = vmatmul.msk.bf16.gmra.mxu0 %vm452_vm2, %v4657_v26  ;;  %v1669_v3 = vrot.slane %v1668_v50, 4  ;;  %v1080_v6 = vor.u32 %v4914_v53, %v4912_v52 }
  0xd4   : > { %3000 = vrot.lane.b32.xlu2 %v2983_v40, %s4768_s24  ;;  %v4698_v48 = vld [vmem:[#allocation2 + $0x18] sm:$0xff]  ;;  %v4922_v5 = vrot.slane %v2253_v51, 4 }
  0xd5   : > { %v2199_v49 = vld [vmem:[#allocation2 + $0x1c] sm:$0xf]  ;;  %910 = vst.msk [vmem:[#allocation2 + $0x20] sm:$0xf] %vm901_vm3, %v837_v43  ;;  %3096 = vrot.lane.b32.xlu0 %v4698_v48, %s4770_s26 }
  0xd6   : > { %v2696_v54 = vrot.slane %v2199_v49, 5  ;;  %v1592_v55 = vld [vmem:[#allocation2 + $0x1c] sm:$0xf]  ;;  %2920 = vrot.lane.b32.xlu1 %v2903_v44, %s4769_s25  ;;  %v2256_v0 = vshll.u32 %v2199_v49, 16  ;;  %v2260_v19 = vshrl.u32 %v2199_v49, 16 }
  0xd7   : > { %v2094_v57 = vrot.slane %v1592_v55, 5  ;;  %v4919_v58 = vld [vmem:[#allocation2 + $0x1c] sm:$0xf]  ;;  %v1671_v59 = vshll.u32 %v1592_v55, 16  ;;  %v1675_v60 = vshrl.u32 %v1592_v55, 16 }
  0xd8   : > { %v1492_v63 = vrot.slane %v4919_v58, 5  ;;  %v599_v1 = vpop.f32.mrf.mxu0  ;;  %v2697_v8 = vsel %vm4849_vm5, %v4382_v56, %v2696_v54  ;;  %v4713_v11 = vld [vmem:[#allocation2 + $0x18] sm:$0xff]  ;;  %v2698_v12 = vrot.slane %v2696_v54, 4  ;;  %v2258_v18 = vrot.slane %v2256_v0, 5 }
  0xd9   : > { %v1673_v4 = vrot.slane %v1671_v59, 5  ;;  %v766_v7 = vmax.f32 %v599_v1, 0.0  ;;  %v2095_v9 = vsel %vm4849_vm5, %v4367_v61, %v2094_v57  ;;  %v2096_v13 = vrot.slane %v2094_v57, 4 }
  0xda   : > { %v1493_v10 = vsel %vm4849_vm5, %v4352_v62, %v1492_v63  ;;  %v1494_v14 = vrot.slane %v1492_v63, 4  ;;  %v1677_v15 = vrot.slane %v1675_v60, 4  ;;  %v3462_v21 = vunpack.c.l.b16 %v2697_v8 }
  0xdb   : > { %v838_v16 = vpack.c.bf16 %v766_v7, %v766_v7  ;;  %v1674_v17 = vsel %vm4860_vm8, %v1669_v3, %v1673_v4  ;;  %v3208_v23 = vunpack.c.l.b16 %v2095_v9  ;;  %v2954_v25 = vunpack.c.l.b16 %v1493_v10  ;;  %v4665_v7 = vld [vmem:[%s4817_s22 + $0xa0] sm:$0xff] }
  0xdc   : > { %3350 = vrot.lane.b32.xlu2 %v4713_v11, %s4767_s23  ;;  %v2230_v20 = vld [vmem:[#allocation2 + $0x20] sm:$0x1]  ;;  %v1678_v26 = vor.u32 %v1677_v15, %v1673_v4  ;;  %v3128_v32 = vunpack.c.l.b16 %v1674_v17  ;;  %v2262_v33 = vrot.slane %v2260_v19, 4  ;;  %v1083_v49 = vshll.u32 %v4919_v58, 16  ;;  %4334 = vmatmul.msk.bf16.gmra.mxu3 %vm452_vm2, %v4665_v7 }
  0xdd   : > { %v1622_v22 = vld [vmem:[#allocation2 + $0x20] sm:$0x1]  ;;  %911 = vst.msk [vmem:[#allocation2 + $0x24] sm:$0xf] %vm901_vm3, %v838_v16  ;;  %v2699_v27 = vrot.slane %v2230_v20, 5  ;;  %v2266_v34 = vshll.u32 %v2230_v20, 16  ;;  %v2259_v63 = vsel %vm4860_vm8, %v4922_v5, %v2258_v18 }
  0xde   : > { %v1008_v24 = vld [vmem:[#allocation2 + $0x20] sm:$0x1]  ;;  %v2097_v28 = vrot.slane %v1622_v22, 5  ;;  %v1681_v30 = vshll.u32 %v1622_v22, 16  ;;  %v1679_v31 = vrot.slane %v1678_v26, 4  ;;  %v2263_v45 = vor.u32 %v2262_v33, %v2258_v18 }
  0xdf   : > { %v1495_v29 = vrot.slane %v1008_v24, 5  ;;  %v2700_v36 = vsel %vm4849_vm5, %v2698_v12, %v2699_v27  ;;  %v2268_v48 = vrot.slane %v2266_v34, 5  ;;  %v1085_v59 = vrot.slane %v1083_v49, 5 }
  0xe0   : > { %v2098_v37 = vsel %vm4849_vm5, %v2096_v13, %v2097_v28  ;;  %v1683_v39 = vrot.slane %v1681_v30, 5  ;;  %v602_v40 = vpop.f32.mrf.mxu0  ;;  %v3463_v42 = vunpack.c.l.b16 %v2700_v36  ;;  %v2264_v57 = vrot.slane %v2263_v45, 4 }
  0xe1   : > { %v1496_v38 = vsel %vm4849_vm5, %v1494_v14, %v1495_v29  ;;  %v3209_v43 = vunpack.c.l.b16 %v2098_v37  ;;  %v767_v46 = vmax.f32 %v602_v40, 0.0  ;;  %v1087_v60 = vshrl.u32 %v4919_v58, 16 }
  0xe2   : > { %v2955_v44 = vunpack.c.l.b16 %v1496_v38  ;;  %v1684_v47 = vsel %vm4860_vm8, %v1679_v31, %v1683_v39  ;;  %v3494_v50 = vpack.c.b16 %v3463_v42, %v3462_v21  ;;  %v1093_v62 = vshll.u32 %v1008_v24, 16 }
  0xe3   : > { %v3239_v51 = vpack.c.b16 %v3209_v43, %v3208_v23  ;;  %v3129_v55 = vunpack.c.l.b16 %v1684_v47  ;;  %v839_v56 = vpack.c.bf16 %v767_v46, %v767_v46  ;;  %4327 = vmatmul.msk.bf16.gmra.mxu0 %vm452_vm2, %v4658_v35  ;;  %v2269_v0 = vsel %vm4860_vm8, %v2264_v57, %v2268_v48 }
  0xe4   : > { %v2984_v54 = vpack.c.b16 %v2955_v44, %v2954_v25  ;;  %4626 = vmatmul.msk.bf16.vlgmr.msra.gmra.mxu2 %vm3510_vm9, %v3494_v50  ;;  %v1089_v1 = vrot.slane %v1087_v60, 4  ;;  %v3383_v58 = vunpack.c.l.b16 %v2269_v0  ;;  %v1081_v3 = vrot.slane %v1080_v6, 4  ;;  %v1593_v4 = vld [vmem:[#allocation2 + $0x24] sm:$0xf]  ;;  %v4659_v44 = vld [vmem:[%s4817_s22 + $0x70] sm:$0xff] }
  0xe5   : > { %3256 = vrot.lane.b32.xlu2 %v3239_v51, %s4771_s29  ;;  %v3159_v61 = vpack.c.b16 %v3129_v55, %v3128_v32  ;;  %912 = vst.msk [vmem:[#allocation2 + $0x28] sm:$0xf] %vm901_vm3, %v839_v56  ;;  %v1095_v9 = vrot.slane %v1093_v62, 5  ;;  %v1686_v10 = vshrl.u32 %v1593_v4, 16  ;;  %v1689_v11 = vshll.u32 %v1593_v4, 16 }
  0xe6   : > { %3002 = vrot.lane.b32.xlu0 %v2984_v54, %s4768_s24  ;;  %v1090_v8 = vor.u32 %v1089_v1, %v1085_v59  ;;  %v2200_v12 = vld [vmem:[#allocation2 + $0x24] sm:$0xf]  ;;  %v3382_v5 = vunpack.c.l.b16 %v2259_v63  ;;  %v1086_v14 = vsel %vm4860_vm8, %v1081_v3, %v1085_v59 }
  0xe7   : > { %3176 = vrot.lane.b32.xlu1 %v3159_v61, %s4772_s30  ;;  %v2271_v15 = vshrl.u32 %v2200_v12, 16  ;;  %v2274_v16 = vshll.u32 %v2200_v12, 16  ;;  %v1688_v52 = vrot.slane %v1686_v10, 4  ;;  %v1691_v53 = vrot.slane %v1689_v11, 5  ;;  %v980_v6 = vld [vmem:[#allocation2 + $0x24] sm:$0xf] }
  0xe8   : > { %v604_v13 = vpop.f32.mrf.mxu0  ;;  %v1091_v18 = vrot.slane %v1090_v8, 4  ;;  %v2631_v19 = vld [vmem:[#allocation2 + $0x24] sm:$0xe]  ;;  %v3414_v23 = vpack.c.b16 %v3383_v58, %v3382_v5  ;;  %v2874_v25 = vunpack.c.l.b16 %v1086_v14  ;;  %v1098_v32 = vshrl.u32 %v980_v6, 16 }
  0xe9   : > { %v768_v17 = vmax.f32 %v604_v13, 0.0  ;;  %v2273_v20 = vrot.slane %v2271_v15, 4  ;;  %v2276_v21 = vrot.slane %v2274_v16, 5  ;;  %v2023_v26 = vld [vmem:[#allocation2 + $0x24] sm:$0xe]  ;;  %v1692_v31 = vor.u32 %v1691_v53, %v1688_v52 }
  0xea   : > { %v1096_v24 = vsel %vm4860_vm8, %v1091_v18, %v1095_v9  ;;  %v1412_v27 = vld [vmem:[#allocation2 + $0x24] sm:$0xe]  ;;  %v1101_v33 = vshll.u32 %v980_v6, 16  ;;  %v4383_v34 = vrot.slane %v2631_v19, 9  ;;  %v4368_v46 = vrot.slane %v2023_v26, 9  ;;  %v4666_v19 = vld [vmem:[%s4817_s22 + $0xa8] sm:$0xff] }
  0xeb   : > { %v840_v22 = vpack.c.bf16 %v768_v17, %v768_v17  ;;  %v2875_v28 = vunpack.c.l.b16 %v1096_v24  ;;  %v2277_v37 = vor.u32 %v2276_v21, %v2273_v20  ;;  %v4353_v47 = vrot.slane %v1412_v27, 9 }
  0xec   : > { %v4699_v29 = vld [vmem:[#allocation2 + $0x24] sm:$0xff]  ;;  %v1693_v50 = vrot.slane %v1692_v31, 4  ;;  %v4977_v54 = vrot.slane %v1098_v32, 4  ;;  %v4979_v55 = vrot.slane %v1101_v33, 5  ;;  %4335 = vmatmul.msk.bf16.gmra.mxu3 %vm452_vm2, %v4666_v19 }
  0xed   : > { %v2201_v30 = vld [vmem:[#allocation2 + $0x28] sm:$0xf]  ;;  %913 = vst.msk [vmem:[#allocation2 + $0x2c] sm:$0xf] %vm901_vm3, %v840_v22  ;;  %v2904_v38 = vpack.c.b16 %v2875_v28, %v2874_v25  ;;  %v2278_v63 = vrot.slane %v2277_v37, 4 }
  0xee   : > { %3430 = vrot.lane.b32.xlu0 %v3414_v23, %s4773_s5  ;;  %v2703_v35 = vrot.slane %v2201_v30, 5  ;;  %v1594_v36 = vld [vmem:[#allocation2 + $0x28] sm:$0xf]  ;;  %v2280_v0 = vshll.u32 %v2201_v30, 16  ;;  %v2284_v7 = vshrl.u32 %v2201_v30, 16 }
  0xef   : > { %3098 = vrot.lane.b32.xlu1 %v4699_v29, %s4770_s26  ;;  %v2101_v39 = vrot.slane %v1594_v36, 5  ;;  %v4970_v40 = vld [vmem:[#allocation2 + $0x28] sm:$0xf]  ;;  %v1695_v42 = vshll.u32 %v1594_v36, 16  ;;  %v1699_v43 = vshrl.u32 %v1594_v36, 16  ;;  %2922 = vrot.lane.b32.xlu2 %v2904_v38, %s4769_s25 }
  0xf0   : > { %v2704_v45 = vsel %vm4849_vm5, %v4383_v34, %v2703_v35  ;;  %v1499_v48 = vrot.slane %v4970_v40, 5  ;;  %v607_v49 = vpop.f32.mrf.mxu0  ;;  %v2705_v57 = vrot.slane %v2703_v35, 4  ;;  %v4714_v58 = vld [vmem:[#allocation2 + $0x24] sm:$0xff]  ;;  %v2282_v52 = vrot.slane %v2280_v0, 5 }
  0xf1   : > { %v1697_v51 = vrot.slane %v1695_v42, 5  ;;  %v769_v56 = vmax.f32 %v607_v49, 0.0  ;;  %v2102_v59 = vsel %vm4849_vm5, %v4368_v46, %v2101_v39  ;;  %v3464_v61 = vunpack.c.l.b16 %v2704_v45 }
  0xf2   : > { %v1500_v60 = vsel %vm4849_vm5, %v4353_v47, %v1499_v48  ;;  %v1701_v62 = vrot.slane %v1699_v43, 4  ;;  %v2103_v3 = vrot.slane %v2101_v39, 4  ;;  %v1501_v4 = vrot.slane %v1499_v48, 4 }
  0xf3   : > { %v841_v1 = vpack.c.bf16 %v769_v56, %v769_v56  ;;  %4328 = vmatmul.msk.bf16.gmra.mxu0 %vm452_vm2, %v4659_v44  ;;  %v3210_v10 = vunpack.c.l.b16 %v2102_v59  ;;  %v2956_v12 = vunpack.c.l.b16 %v1500_v60  ;;  %v1698_v13 = vsel %vm4860_vm8, %v1693_v50, %v1697_v51 }
  0xf4   : > { %v2231_v8 = vld [vmem:[#allocation2 + $0x2c] sm:$0x1]  ;;  %v1702_v5 = vor.u32 %v1701_v62, %v1697_v51  ;;  %v2286_v53 = vrot.slane %v2284_v7, 4  ;;  %v3130_v28 = vunpack.c.l.b16 %v1698_v13  ;;  %v2283_v38 = vsel %vm4860_vm8, %v2278_v63, %v2282_v52  ;;  %v4660_v51 = vld [vmem:[%s4817_s22 + $0x78] sm:$0xff] }
  0xf5   : > { %v1623_v9 = vld [vmem:[#allocation2 + $0x2c] sm:$0x1]  ;;  %914 = vst.msk [vmem:[#allocation2 + $0x30] sm:$0xf] %vm901_vm3, %v841_v1  ;;  %v2706_v14 = vrot.slane %v2231_v8, 5  ;;  %v2290_v6 = vshll.u32 %v2231_v8, 16  ;;  %v1104_v42 = vor.u32 %v4979_v55, %v4977_v54  ;;  %v3384_v54 = vunpack.c.l.b16 %v2283_v38 }
  0xf6   : > { %v1009_v11 = vld [vmem:[#allocation2 + $0x2c] sm:$0x1]  ;;  %3352 = vrot.lane.b32.xlu0 %v4714_v58, %s4767_s23  ;;  %v2104_v15 = vrot.slane %v1623_v9, 5  ;;  %v1705_v17 = vshll.u32 %v1623_v9, 16  ;;  %v1703_v18 = vrot.slane %v1702_v5, 4  ;;  %v2287_v31 = vor.u32 %v2286_v53, %v2282_v52 }
  0xf7   : > { %v1502_v16 = vrot.slane %v1009_v11, 5  ;;  %v2707_v20 = vsel %vm4849_vm5, %v2705_v57, %v2706_v14  ;;  %v2292_v32 = vrot.slane %v2290_v6, 5  ;;  %v1107_v44 = vshll.u32 %v4970_v40, 16 }
  0xf8   : > { %v2105_v21 = vsel %vm4849_vm5, %v2103_v3, %v2104_v15  ;;  %v1707_v23 = vrot.slane %v1705_v17, 5  ;;  %v609_v24 = vpop.f32.mrf.mxu0  ;;  %v3465_v25 = vunpack.c.l.b16 %v2707_v20  ;;  %v2288_v39 = vrot.slane %v2287_v31, 4 }
  0xf9   : > { %v1503_v22 = vsel %vm4849_vm5, %v1501_v4, %v1502_v16  ;;  %v3211_v26 = vunpack.c.l.b16 %v2105_v21  ;;  %v770_v29 = vmax.f32 %v609_v24, 0.0  ;;  %v1111_v45 = vshrl.u32 %v4970_v40, 16 }
  0xfa   : > { %v2957_v27 = vunpack.c.l.b16 %v1503_v22  ;;  %v1708_v30 = vsel %vm4860_vm8, %v1703_v18, %v1707_v23  ;;  %v3495_v33 = vpack.c.b16 %v3465_v25, %v3464_v61  ;;  %v1117_v46 = vshll.u32 %v1009_v11, 16 }
  0xfb   : > { %v3240_v34 = vpack.c.b16 %v3211_v26, %v3210_v10  ;;  %v3131_v36 = vunpack.c.l.b16 %v1708_v30  ;;  %v842_v37 = vpack.c.bf16 %v770_v29, %v770_v29  ;;  %v2293_v47 = vsel %vm4860_vm8, %v2288_v39, %v2292_v32  ;;  %v4667_v32 = vld [vmem:[%s4817_s22 + $0xb0] sm:$0xff] }
  0xfc   : > { %v2985_v35 = vpack.c.b16 %v2957_v27, %v2956_v12  ;;  %4627 = vmatmul.msk.bf16.gmra.mxu2 %vm3510_vm9, %v3495_v33  ;;  %v3385_v48 = vunpack.c.l.b16 %v2293_v47  ;;  %v1109_v49 = vrot.slane %v1107_v44, 5  ;;  %v1113_v50 = vrot.slane %v1111_v45, 4  ;;  %v1595_v56 = vld [vmem:[#allocation2 + $0x30] sm:$0xf]  ;;  %4336 = vmatmul.msk.bf16.gmra.mxu3 %vm452_vm2, %v4667_v32 }
  0xfd   : > { %v3160_v43 = vpack.c.b16 %v3131_v36, %v3130_v28  ;;  %915 = vst.msk [vmem:[#allocation2 + $0x34] sm:$0xf] %vm901_vm3, %v842_v37  ;;  %v1105_v55 = vrot.slane %v1104_v42, 4  ;;  %v2202_v57 = vld [vmem:[#allocation2 + $0x30] sm:$0xf]  ;;  %v1119_v60 = vrot.slane %v1117_v46, 5 }
  0xfe   : > { %3004 = vrot.lane.b32.xlu1 %v2985_v35, %s4768_s24  ;;  %3258 = vrot.lane.b32.xlu0 %v3240_v34, %s4771_s29  ;;  %v1114_v40 = vor.u32 %v1113_v50, %v1109_v49  ;;  %v2632_v61 = vld [vmem:[#allocation2 + $0x30] sm:$0xe]  ;;  %v1710_v63 = vshrl.u32 %v1595_v56, 16  ;;  %v3415_v1 = vpack.c.b16 %v3385_v48, %v3384_v54  ;;  %v1713_v58 = vshll.u32 %v1595_v56, 16 }
  0xff   : > { %3178 = vrot.lane.b32.xlu2 %v3160_v43, %s4772_s30  ;;  %v2024_v62 = vld [vmem:[#allocation2 + $0x30] sm:$0xe]  ;;  %v2295_v3 = vshrl.u32 %v2202_v57, 16  ;;  %v1110_v7 = vsel %vm4860_vm8, %v1105_v55, %v1109_v49  ;;  %v2298_v11 = vshll.u32 %v2202_v57, 16  ;;  %v4384_v13 = vrot.slane %v2632_v61, 9 }
 0x100   : > { %v612_v59 = vpop.f32.mrf.mxu0  ;;  %v5014_v4 = vld [vmem:[#allocation2 + $0x30] sm:$0xf]  ;;  %v1115_v8 = vrot.slane %v1114_v40, 4  ;;  %v1712_v10 = vrot.slane %v1710_v63, 4  ;;  %v1715_v5 = vrot.slane %v1713_v58, 5  ;;  %v4369_v18 = vrot.slane %v2024_v62, 9 }
 0x101   : > { %v771_v0 = vmax.f32 %v612_v59, 0.0  ;;  %v1413_v9 = vld [vmem:[#allocation2 + $0x30] sm:$0xe]  ;;  %v2297_v14 = vrot.slane %v2295_v3, 4  ;;  %v2300_v52 = vrot.slane %v2298_v11, 5  ;;  %v1122_v53 = vshrl.u32 %v5014_v4, 16 }
 0x102   : > { %v1120_v15 = vsel %vm4860_vm8, %v1115_v8, %v1119_v60  ;;  %v2876_v6 = vunpack.c.l.b16 %v1110_v7  ;;  %v4354_v22 = vrot.slane %v1413_v9, 9  ;;  %v1716_v25 = vor.u32 %v1715_v5, %v1712_v10  ;;  %v4661_v8 = vld [vmem:[%s4817_s22 + $0x80] sm:$0xff] }
 0x103   : > { %v843_v12 = vpack.c.bf16 %v771_v0, %v771_v0  ;;  %4329 = vmatmul.msk.bf16.gmra.mxu0 %vm452_vm2, %v4660_v51  ;;  %v2877_v19 = vunpack.c.l.b16 %v1120_v15  ;;  %v2301_v30 = vor.u32 %v2300_v52, %v2297_v14  ;;  %v5031_v36 = vrot.slane %v1122_v53, 4 }
 0x104   : > { %v4700_v16 = vld [vmem:[#allocation2 + $0x30] sm:$0xff]  ;;  %v1125_v37 = vshll.u32 %v5014_v4, 16  ;;  %v1717_v46 = vrot.slane %v1716_v25, 4 }
 0x105   : > { %v2203_v17 = vld [vmem:[#allocation2 + $0x34] sm:$0xf]  ;;  %916 = vst.msk [vmem:[#allocation2 + $0x38] sm:$0xf] %vm901_vm3, %v843_v12  ;;  %v2905_v28 = vpack.c.b16 %v2877_v19, %v2876_v6  ;;  %v5040_v50 = vrot.slane %v2301_v30, 4 }
 0x106   : > { %3432 = vrot.lane.b32.xlu1 %v3415_v1, %s4773_s5  ;;  %v2710_v20 = vrot.slane %v2203_v17, 5  ;;  %v1596_v21 = vld [vmem:[#allocation2 + $0x34] sm:$0xf]  ;;  %v2304_v31 = vshll.u32 %v2203_v17, 16  ;;  %v2308_v54 = vshrl.u32 %v2203_v17, 16  ;;  %v1127_v7 = vrot.slane %v1125_v37, 5 }
 0x107   : > { %3100 = vrot.lane.b32.xlu2 %v4700_v16, %s4770_s26  ;;  %v2108_v23 = vrot.slane %v1596_v21, 5  ;;  %v5025_v24 = vld [vmem:[#allocation2 + $0x34] sm:$0xf]  ;;  %v1719_v26 = vshll.u32 %v1596_v21, 16  ;;  %v1723_v27 = vshrl.u32 %v1596_v21, 16  ;;  %2924 = vrot.lane.b32.xlu0 %v2905_v28, %s4769_s25 }
 0x108   : > { %v1506_v29 = vrot.slane %v5025_v24, 5  ;;  %v614_v33 = vpop.f32.mrf.mxu0  ;;  %v2711_v34 = vsel %vm4849_vm5, %v4384_v13, %v2710_v20  ;;  %v2712_v35 = vrot.slane %v2710_v20, 4  ;;  %v4715_v44 = vld [vmem:[#allocation2 + $0x30] sm:$0xff]  ;;  %v5042_v51 = vrot.slane %v2304_v31, 5 }
 0x109   : > { %v772_v38 = vmax.f32 %v614_v33, 0.0  ;;  %v2109_v39 = vsel %vm4849_vm5, %v4369_v18, %v2108_v23  ;;  %v2110_v42 = vrot.slane %v2108_v23, 4  ;;  %v1721_v47 = vrot.slane %v1719_v26, 5 }
 0x10a   : > { %v1507_v43 = vsel %vm4849_vm5, %v4354_v22, %v1506_v29  ;;  %v1508_v45 = vrot.slane %v1506_v29, 4  ;;  %v1725_v48 = vrot.slane %v1723_v27, 4  ;;  %v3466_v56 = vunpack.c.l.b16 %v2711_v34 }
 0x10b   : > { %v844_v49 = vpack.c.bf16 %v772_v38, %v772_v38  ;;  %v3212_v59 = vunpack.c.l.b16 %v2109_v39  ;;  %v2958_v60 = vunpack.c.l.b16 %v1507_v43  ;;  %v1722_v58 = vsel %vm4860_vm8, %v1717_v46, %v1721_v47 }
 0x10c   : > { %v2232_v55 = vld [vmem:[#allocation2 + $0x38] sm:$0x1]  ;;  %v1726_v61 = vor.u32 %v1725_v48, %v1721_v47  ;;  %v2310_v4 = vrot.slane %v2308_v54, 4  ;;  %v3132_v52 = vunpack.c.l.b16 %v1722_v58  ;;  %v1128_v26 = vor.u32 %v1127_v7, %v5031_v36 }
 0x10d   : > { %v1624_v57 = vld [vmem:[#allocation2 + $0x38] sm:$0x1]  ;;  %917 = vst.msk [vmem:[#allocation2 + $0x3c] sm:$0xf] %vm901_vm3, %v844_v49  ;;  %v2713_v62 = vrot.slane %v2232_v55, 5  ;;  %v2314_v53 = vshll.u32 %v2232_v55, 16  ;;  %v2307_v34 = vsel %vm4860_vm8, %v5040_v50, %v5042_v51 }
 0x10e   : > { %3354 = vrot.lane.b32.xlu1 %v4715_v44, %s4767_s23  ;;  %v1010_v40 = vld [vmem:[#allocation2 + $0x38] sm:$0x1]  ;;  %v2111_v63 = vrot.slane %v1624_v57, 5  ;;  %v1729_v1 = vshll.u32 %v1624_v57, 16  ;;  %v1727_v3 = vrot.slane %v1726_v61, 4  ;;  %v2311_v16 = vor.u32 %v2310_v4, %v5042_v51 }
 0x10f   : > { %v1509_v0 = vrot.slane %v1010_v40, 5  ;;  %v2714_v9 = vsel %vm4849_vm5, %v2712_v35, %v2713_v62  ;;  %v2316_v25 = vrot.slane %v2314_v53, 5  ;;  %v1131_v28 = vshll.u32 %v5025_v24, 16  ;;  %v4668_v51 = vld [vmem:[%s4817_s22 + $0xb8] sm:$0xff] }
 0x110   : > { %v2112_v10 = vsel %vm4849_vm5, %v2110_v42, %v2111_v63  ;;  %v1731_v12 = vrot.slane %v1729_v1, 5  ;;  %v617_v13 = vpop.f32.mrf.mxu0  ;;  %v3467_v5 = vunpack.c.l.b16 %v2714_v9  ;;  %v2312_v23 = vrot.slane %v2311_v16, 4  ;;  %4337 = vmatmul.msk.bf16.gmra.mxu3 %vm452_vm2, %v4668_v51 }
 0x111   : > { %v1510_v11 = vsel %vm4849_vm5, %v1508_v45, %v1509_v0  ;;  %v3213_v14 = vunpack.c.l.b16 %v2112_v10  ;;  %v773_v17 = vmax.f32 %v617_v13, 0.0  ;;  %v1135_v29 = vshrl.u32 %v5025_v24, 16 }
 0x112   : > { %v2959_v15 = vunpack.c.l.b16 %v1510_v11  ;;  %v1732_v18 = vsel %vm4860_vm8, %v1727_v3, %v1731_v12  ;;  %v3496_v6 = vpack.c.b16 %v3467_v5, %v3466_v56  ;;  %v1141_v30 = vshll.u32 %v1010_v40, 16 }
 0x113   : > { %v3241_v19 = vpack.c.b16 %v3213_v14, %v3212_v59  ;;  %v3133_v21 = vunpack.c.l.b16 %v1732_v18  ;;  %v845_v22 = vpack.c.bf16 %v773_v17, %v773_v17  ;;  %4330 = vmatmul.msk.bf16.gmra.mxu0 %vm452_vm2, %v4661_v8  ;;  %v2317_v32 = vsel %vm4860_vm8, %v2312_v23, %v2316_v25 }
 0x114   : > { %v2986_v20 = vpack.c.b16 %v2959_v15, %v2958_v60  ;;  %4628 = vmatmul.msk.bf16.gmra.mxu2 %vm3510_vm9, %v3496_v6  ;;  %v2633_v31 = vld [vmem:[#allocation2 + $0x3c] sm:$0xe]  ;;  %v1133_v35 = vrot.slane %v1131_v28, 5  ;;  %v1137_v24 = vrot.slane %v1135_v29, 4  ;;  %v3387_v36 = vunpack.c.l.b16 %v2317_v32 }
 0x115   : > { %v3161_v27 = vpack.c.b16 %v3133_v21, %v3132_v52  ;;  %918 = vst.msk [vmem:[#allocation2 + $0x40] sm:$0xf] %vm901_vm3, %v845_v22  ;;  %v5068_v33 = vld [vmem:[#allocation2 + $0x3c] sm:$0xe]  ;;  %v1129_v37 = vrot.slane %v1128_v26, 4  ;;  %v1143_v38 = vrot.slane %v1141_v30, 5  ;;  %v3386_v54 = vunpack.c.l.b16 %v2307_v34 }
 0x116   : > { %3260 = vrot.lane.b32.xlu1 %v3241_v19, %s4771_s29  ;;  %3006 = vrot.lane.b32.xlu2 %v2986_v20, %s4768_s24  ;;  %v4385_v39 = vrot.slane %v2633_v31, 9  ;;  %v1597_v42 = vld [vmem:[#allocation2 + $0x3c] sm:$0xf]  ;;  %v1138_v44 = vor.u32 %v1137_v24, %v1133_v35  ;;  %v4370_v45 = vrot.slane %v5068_v33, 9  ;;  %v4662_v52 = vld [vmem:[%s4817_s22 + $0x88] sm:$0xff] }
 0x117   : > { %3180 = vrot.lane.b32.xlu0 %v3161_v27, %s4772_s30  ;;  %v1414_v46 = vld [vmem:[#allocation2 + $0x3c] sm:$0xe]  ;;  %v1734_v47 = vshrl.u32 %v1597_v42, 16  ;;  %v1737_v55 = vshll.u32 %v1597_v42, 16  ;;  %v1134_v57 = vsel %vm4860_vm8, %v1129_v37, %v1133_v35  ;;  %v3416_v62 = vpack.c.b16 %v3387_v36, %v3386_v54 }
 0x118   : > { %v619_v43 = vpop.f32.mrf.mxu0  ;;  %v2204_v48 = vld [vmem:[#allocation2 + $0x3c] sm:$0xf]  ;;  %v1139_v59 = vrot.slane %v1138_v44, 4  ;;  %v4355_v4 = vrot.slane %v1414_v46, 9  ;;  %v2878_v9 = vunpack.c.l.b16 %v1134_v57 }
 0x119   : > { %v774_v49 = vmax.f32 %v619_v43, 0.0  ;;  %v2319_v56 = vshrl.u32 %v2204_v48, 16  ;;  %v5076_v50 = vld [vmem:[#allocation2 + $0x3c] sm:$0xf]  ;;  %v1736_v40 = vrot.slane %v1734_v47, 4  ;;  %v2322_v60 = vshll.u32 %v2204_v48, 16 }
 0x11a   : > { %v1739_v63 = vrot.slane %v1737_v55, 5  ;;  %v1144_v1 = vsel %vm4860_vm8, %v1139_v59, %v1143_v38  ;;  %v1146_v8 = vshrl.u32 %v5076_v50, 16  ;;  %v1149_v25 = vshll.u32 %v5076_v50, 16  ;;  %v4736_v59 = vld [vmem:[%s6153_s2 + $0x38] sm:$0xff] }
 0x11b   : > { %v846_v61 = vpack.c.bf16 %v774_v49, %v774_v49  ;;  %v2321_v0 = vrot.slane %v2319_v56, 4  ;;  %v2324_v7 = vrot.slane %v2322_v60, 5  ;;  %v2879_v10 = vunpack.c.l.b16 %v1144_v1  ;;  %3897 = vmatpush.bf16.msra.mxu1 %v4736_v59 }
 0x11c   : > { %v4701_v58 = vld [vmem:[#allocation2 + $0x3c] sm:$0xff]  ;;  %v1740_v13 = vor.u32 %v1739_v63, %v1736_v40  ;;  %v5094_v23 = vrot.slane %v1146_v8, 4  ;;  %v1151_v57 = vrot.slane %v1149_v25, 5 }
 0x11d   : > { %v2205_v3 = vld [vmem:[#allocation2 + $0x40] sm:$0xf]  ;;  %919 = vst.msk [vmem:[#allocation2 + $0x44] sm:$0xf] %vm901_vm3, %v846_v61  ;;  %v2906_v18 = vpack.c.b16 %v2879_v10, %v2878_v9  ;;  %v2325_v19 = vor.u32 %v2324_v7, %v2321_v0  ;;  %v5111_v47 = vpop.permute.xlu0 %3370 }
 0x11e   : > { %3434 = vrot.lane.b32.xlu2 %v3416_v62, %s4773_s5  ;;  %v2717_v11 = vrot.slane %v2205_v3, 5  ;;  %v1598_v12 = vld [vmem:[#allocation2 + $0x40] sm:$0xf]  ;;  %v2328_v17 = vshll.u32 %v2205_v3, 16  ;;  %v1741_v31 = vrot.slane %v1740_v13, 4  ;;  %v2332_v37 = vshrl.u32 %v2205_v3, 16 }
 0x11f   : > { %3102 = vrot.lane.b32.xlu0 %v4701_v58, %s4770_s26  ;;  %v2115_v5 = vrot.slane %v1598_v12, 5  ;;  %v5088_v14 = vld [vmem:[#allocation2 + $0x40] sm:$0xf]  ;;  %v1743_v15 = vshll.u32 %v1598_v12, 16  ;;  %v1747_v16 = vshrl.u32 %v1598_v12, 16  ;;  %2926 = vrot.lane.b32.xlu1 %v2906_v18, %s4769_s25  ;;  %v5103_v24 = vrot.slane %v2325_v19, 4 }
 0x120   : > { %v2718_v53 = vsel %vm4849_vm5, %v4385_v39, %v2717_v11  ;;  %v1513_v6 = vrot.slane %v5088_v14, 5  ;;  %v622_v20 = vpop.f32.mrf.mxu0  ;;  %v2719_v21 = vrot.slane %v2717_v11, 4  ;;  %v4716_v35 = vld [vmem:[#allocation2 + $0x3c] sm:$0xff]  ;;  %v5105_v36 = vrot.slane %v2328_v17, 5  ;;  %v4735_v11 = vld [vmem:[%s6153_s2 + $0x30] sm:$0xff] }
 0x121   : > { %v3468_v22 = vunpack.c.l.b16 %v2718_v53  ;;  %v775_v26 = vmax.f32 %v622_v20, 0.0  ;;  %v2116_v27 = vsel %vm4849_vm5, %v4370_v45, %v2115_v5  ;;  %v2117_v28 = vrot.slane %v2115_v5, 4  ;;  %v4669_v63 = vld [vmem:[%s4817_s22 + $0xc0] sm:$0xff]  ;;  %3898 = vmatpush.bf16.msra.mxu1 %v4735_v11 }
 0x122   : > { %v1514_v29 = vsel %vm4849_vm5, %v4355_v4, %v1513_v6  ;;  %v1515_v30 = vrot.slane %v1513_v6, 4  ;;  %v1745_v32 = vrot.slane %v1743_v15, 5  ;;  %v1749_v33 = vrot.slane %v1747_v16, 4  ;;  %4338 = vmatmul.msk.bf16.gmra.mxu3 %vm452_vm2, %v4669_v63 }
 0x123   : > { %v847_v34 = vpack.c.bf16 %v775_v26, %v775_v26  ;;  %4331 = vmatmul.msk.bf16.gmra.mxu0 %vm452_vm2, %v4662_v52  ;;  %v3214_v42 = vunpack.c.l.b16 %v2116_v27  ;;  %v2960_v44 = vunpack.c.l.b16 %v1514_v29  ;;  %v2334_v51 = vrot.slane %v2332_v37, 4 }
 0x124   : > { %v2233_v38 = vld [vmem:[#allocation2 + $0x44] sm:$0x1]  ;;  %v1746_v45 = vsel %vm4860_vm8, %v1741_v31, %v1745_v32  ;;  %v1750_v46 = vor.u32 %v1749_v33, %v1745_v32  ;;  %v2331_v9 = vsel %vm4860_vm8, %v5103_v24, %v5105_v36  ;;  %v1152_v52 = vor.u32 %v1151_v57, %v5094_v23  ;;  %v4734_v23 = vld [vmem:[%s6153_s2 + $0x28] sm:$0xff] }
 0x125   : > { %v1625_v39 = vld [vmem:[#allocation2 + $0x44] sm:$0x1]  ;;  %920 = vst.msk [vmem:[#allocation2 + $0x48] sm:$0xf] %vm901_vm3, %v847_v34  ;;  %v2720_v48 = vrot.slane %v2233_v38, 5  ;;  %v3134_v50 = vunpack.c.l.b16 %v1746_v45  ;;  %v2335_v4 = vor.u32 %v2334_v51, %v5105_v36  ;;  %v2338_v10 = vshll.u32 %v2233_v38, 16  ;;  %3899 = vmatpush.bf16.msra.mxu1 %v4734_v23 }
 0x126   : > { %v5107_v43 = vld [vmem:[#allocation2 + $0x44] sm:$0x1]  ;;  %3356 = vrot.lane.b32.xlu2 %v4716_v35, %s4767_s23  ;;  %v2118_v49 = vrot.slane %v1625_v39, 5  ;;  %v1753_v55 = vshll.u32 %v1625_v39, 16  ;;  %v1751_v56 = vrot.slane %v1750_v46, 4  ;;  %v1155_v6 = vshll.u32 %v5088_v14, 16  ;;  %v5153_v27 = vpop.permute.xlu0 %2998 }
 0x127   : > { %v1516_v54 = vrot.slane %v5107_v43, 5  ;;  %v2721_v40 = vsel %vm4849_vm5, %v2719_v21, %v2720_v48  ;;  %v2336_v17 = vrot.slane %v2335_v4, 4  ;;  %v2340_v18 = vrot.slane %v2338_v10, 5  ;;  %v5143_v21 = vpop.permute.xlu2 %3254  ;;  %v4733_v38 = vld [vmem:[%s6153_s2 + $0x20] sm:$0xff] }
 0x128   : > { %v2119_v60 = vsel %vm4849_vm5, %v2117_v28, %v2118_v49  ;;  %v1755_v62 = vrot.slane %v1753_v55, 5  ;;  %v624_v0 = vpop.f32.mrf.mxu0  ;;  %v3469_v1 = vunpack.c.l.b16 %v2721_v40  ;;  %v1159_v19 = vshrl.u32 %v5088_v14, 16  ;;  %v4681_v23 = vld [vmem:[#allocation2] sm:$0xff] }
 0x129   : > { %v1517_v61 = vsel %vm4849_vm5, %v1515_v30, %v1516_v54  ;;  %v3215_v58 = vunpack.c.l.b16 %v2119_v60  ;;  %v776_v7 = vmax.f32 %v624_v0, 0.0  ;;  %v1165_v20 = vshll.u32 %v5107_v43, 16  ;;  %3900 = vmatpush.bf16.msra.mxu1 %v4733_v38 }
 0x12a   : > { %v2961_v3 = vunpack.c.l.b16 %v1517_v61  ;;  %v1756_v8 = vsel %vm4860_vm8, %v1751_v56, %v1755_v62  ;;  %v3497_v12 = vpack.c.b16 %v3469_v1, %v3468_v22  ;;  %v2341_v22 = vsel %vm4860_vm8, %v2336_v17, %v2340_v18 }
 0x12b   : > { %v3242_v13 = vpack.c.b16 %v3215_v58, %v3214_v42  ;;  %v3135_v15 = vunpack.c.l.b16 %v1756_v8  ;;  %v848_v16 = vpack.c.bf16 %v776_v7, %v776_v7  ;;  %v3389_v25 = vunpack.c.l.b16 %v2341_v22  ;;  %v4732_v7 = vld [vmem:[%s6153_s2 + $0x18] sm:$0xff]  ;;  %v4731_v22 = vld [vmem:[%s6153_s2 + $0x10] sm:$0xff] }
 0x12c   : > { %v2987_v5 = vpack.c.b16 %v2961_v3, %v2960_v44  ;;  %4629 = vmatmul.msk.bf16.gmra.mxu2 %vm3510_vm9, %v3497_v12  ;;  %v1157_v14 = vrot.slane %v1155_v6, 5  ;;  %v1161_v26 = vrot.slane %v1159_v19, 4  ;;  %v3388_v28 = vunpack.c.l.b16 %v2331_v9  ;;  %v1599_v29 = vld [vmem:[#allocation2 + $0x48] sm:$0xf] }
 0x12d   : > { %v3162_v53 = vpack.c.b16 %v3135_v15, %v3134_v50  ;;  %921 = vst.msk [vmem:[#allocation2 + $0x4c] sm:$0xf] %vm901_vm3, %v848_v16  ;;  %v1153_v31 = vrot.slane %v1152_v52, 4  ;;  %v1167_v33 = vrot.slane %v1165_v20, 5  ;;  %v2634_v34 = vld [vmem:[#allocation2 + $0x48] sm:$0xe]  ;;  %3901 = vmatpush.bf16.msra.mxu1 %v4732_v7 }
 0x12e   : > { %3008 = vrot.lane.b32.xlu0 %v2987_v5, %s4768_s24  ;;  %3262 = vrot.lane.b32.xlu2 %v3242_v13, %s4771_s29  ;;  %v1162_v32 = vor.u32 %v1161_v26, %v1157_v14  ;;  %v2026_v35 = vld [vmem:[#allocation2 + $0x48] sm:$0xe]  ;;  %v3417_v36 = vpack.c.b16 %v3389_v25, %v3388_v28  ;;  %v1758_v44 = vshrl.u32 %v1599_v29, 16  ;;  %v1761_v45 = vshll.u32 %v1599_v29, 16  ;;  %v2919_v52 = vpop.permute.xlu0 %2918 }
 0x12f   : > { %3182 = vrot.lane.b32.xlu1 %v3162_v53, %s4772_s30  ;;  %v2206_v37 = vld [vmem:[#allocation2 + $0x48] sm:$0xf]  ;;  %v1158_v39 = vsel %vm4860_vm8, %v1153_v31, %v1157_v14  ;;  %v4386_v48 = vrot.slane %v2634_v34, 9  ;;  %v4371_v49 = vrot.slane %v2026_v35, 9  ;;  %v5175_v8 = vpop.permute.xlu2 %3000  ;;  %v5199_v35 = vsel %vm3510_vm9, %v4681_v23, %v2919_v52 }
 0x130   : > { %v627_v30 = vpop.f32.mrf.mxu0  ;;  %v1163_v42 = vrot.slane %v1162_v32, 4  ;;  %v1415_v43 = vld [vmem:[#allocation2 + $0x48] sm:$0xe]  ;;  %v1760_v51 = vrot.slane %v1758_v44, 4  ;;  %v1763_v57 = vrot.slane %v1761_v45, 5  ;;  %v2343_v59 = vshrl.u32 %v2206_v37, 16 }
 0x131   : > { %v777_v24 = vmax.f32 %v627_v30, 0.0  ;;  %v5160_v54 = vld [vmem:[#allocation2 + $0x48] sm:$0xf]  ;;  %v2880_v40 = vunpack.c.l.b16 %v1158_v39  ;;  %v4356_v63 = vrot.slane %v1415_v43, 9  ;;  %v2346_v11 = vshll.u32 %v2206_v37, 16  ;;  %v5193_v30 = vpop.permute.xlu1 %3094  ;;  %3902 = vmatpush.bf16.msra.mxu1 %v4731_v22 }
 0x132   : > { %v1168_v55 = vsel %vm4860_vm8, %v1163_v42, %v1167_v33  ;;  %v1764_v58 = vor.u32 %v1763_v57, %v1760_v51  ;;  %v1170_v12 = vshrl.u32 %v5160_v54, 16  ;;  %v4670_v13 = vld [vmem:[%s4817_s22 + $0xc8] sm:$0xff]  ;;  %v5182_v17 = vrot.slane %v2343_v59, 4 }
 0x133   : > { %v849_v46 = vpack.c.bf16 %v777_v24, %v777_v24  ;;  %v2881_v60 = vunpack.c.l.b16 %v1168_v55  ;;  %v1173_v18 = vshll.u32 %v5160_v54, 16  ;;  %v2348_v32 = vrot.slane %v2346_v11, 5  ;;  %4339 = vmatmul.msk.bf16.gmra.mxu3 %vm452_vm2, %v4670_v13 }
 0x134   : > { %v4702_v56 = vld [vmem:[#allocation2 + $0x48] sm:$0xff]  ;;  %v1765_v20 = vrot.slane %v1764_v58, 4 }
 0x135   : > { %v5165_v50 = vld [vmem:[#allocation2 + $0x4c] sm:$0xf]  ;;  %922 = vst.msk [vmem:[#allocation2 + $0x50] sm:$0xf] %vm901_vm3, %v849_v46  ;;  %v2907_v9 = vpack.c.b16 %v2881_v60, %v2880_v40 }
 0x136   : > { %3436 = vrot.lane.b32.xlu0 %v3417_v36, %s4773_s5  ;;  %v2724_v61 = vrot.slane %v5165_v50, 5  ;;  %v1600_v62 = vld [vmem:[#allocation2 + $0x4c] sm:$0xf]  ;;  %v2352_v33 = vshll.u32 %v5165_v50, 16  ;;  %v2356_v34 = vshrl.u32 %v5165_v50, 16 }
 0x137   : > { %3104 = vrot.lane.b32.xlu1 %v4702_v56, %s4770_s26  ;;  %v2122_v0 = vrot.slane %v1600_v62, 5  ;;  %v5170_v1 = vld [vmem:[#allocation2 + $0x4c] sm:$0xf]  ;;  %v1767_v3 = vshll.u32 %v1600_v62, 16  ;;  %v1771_v4 = vshrl.u32 %v1600_v62, 16  ;;  %2928 = vrot.lane.b32.xlu2 %v2907_v9, %s4769_s25  ;;  %v5218_v58 = vpop.permute.xlu2 %3350  ;;  %v1172_v9 = vrot.slane %v1170_v12, 4 }
 0x138   : > { %v1520_v10 = vrot.slane %v5170_v1, 5  ;;  %v629_v5 = vpop.f32.mrf.mxu0  ;;  %v2725_v15 = vsel %vm4849_vm5, %v4386_v48, %v2724_v61  ;;  %v2726_v16 = vrot.slane %v2724_v61, 4  ;;  %v4717_v25 = vld [vmem:[#allocation2 + $0x48] sm:$0xff]  ;;  %v2354_v56 = vrot.slane %v2352_v33, 5 }
 0x139   : > { %v778_v53 = vmax.f32 %v629_v5, 0.0  ;;  %v2123_v6 = vsel %vm4849_vm5, %v4371_v49, %v2122_v0  ;;  %v2124_v19 = vrot.slane %v2122_v0, 4  ;;  %v1769_v28 = vrot.slane %v1767_v3, 5  ;;  %v4730_v50 = vld [vmem:[%s6153_s2 + $0x8] sm:$0xff] }
 0x13a   : > { %v1521_v14 = vsel %vm4849_vm5, %v4356_v63, %v1520_v10  ;;  %v1522_v26 = vrot.slane %v1520_v10, 4  ;;  %v1773_v29 = vrot.slane %v1771_v4, 4  ;;  %v3470_v36 = vunpack.c.l.b16 %v2725_v15  ;;  %3903 = vmatpush.bf16.msra.mxu1 %v4730_v50  ;;  %v4729_v10 = vld [vmem:[%s6153_s2] sm:$0xff] }
 0x13b   : > { %v850_v31 = vpack.c.bf16 %v778_v53, %v778_v53  ;;  %v3216_v38 = vunpack.c.l.b16 %v2123_v6  ;;  %v2962_v48 = vunpack.c.l.b16 %v1521_v14  ;;  %v1770_v49 = vsel %vm4860_vm8, %v1765_v20, %v1769_v28 }
 0x13c   : > { %v2234_v24 = vld [vmem:[#allocation2 + $0x50] sm:$0x1]  ;;  %v1774_v42 = vor.u32 %v1773_v29, %v1769_v28  ;;  %v2349_v0 = vor.u32 %v2348_v32, %v5182_v17  ;;  %v2358_v7 = vrot.slane %v2356_v34, 4  ;;  %v3136_v15 = vunpack.c.l.b16 %v1770_v49 }
 0x13d   : > { %v1626_v37 = vld [vmem:[#allocation2 + $0x50] sm:$0x1]  ;;  %923 = vst.msk [vmem:[#allocation2 + $0x54] sm:$0xf] %vm901_vm3, %v850_v31  ;;  %v2727_v43 = vrot.slane %v2234_v24, 5  ;;  %v2362_v6 = vshll.u32 %v2234_v24, 16 }
 0x13e   : > { %3358 = vrot.lane.b32.xlu0 %v4717_v25, %s4767_s23  ;;  %v5202_v39 = vld [vmem:[#allocation2 + $0x50] sm:$0x1]  ;;  %v2125_v44 = vrot.slane %v1626_v37, 5  ;;  %v1777_v46 = vshll.u32 %v1626_v37, 16  ;;  %v1775_v55 = vrot.slane %v1774_v42, 4  ;;  %v2359_v53 = vor.u32 %v2358_v7, %v2354_v56  ;;  %3904 = vmatpush.bf16.msra.mxu1 %v4729_v10 }
 0x13f   : > { %v1523_v45 = vrot.slane %v5202_v39, 5  ;;  %v2728_v51 = vsel %vm4849_vm5, %v2726_v16, %v2727_v43  ;;  %v1175_v12 = vrot.slane %v1173_v18, 5  ;;  %v1179_v20 = vshll.u32 %v5170_v1, 16 }
 0x140   : > { %v2126_v57 = vsel %vm4849_vm5, %v2124_v19, %v2125_v44  ;;  %v1779_v40 = vrot.slane %v1777_v46, 5  ;;  %v632_v60 = vpop.f32.mrf.mxu0  ;;  %v3471_v61 = vunpack.c.l.b16 %v2728_v51  ;;  %v3175_v16 = vpop.permute.xlu1 %3174  ;;  %v2350_v19 = vrot.slane %v2349_v0, 4  ;;  %v4682_v51 = vld [vmem:[#allocation2 + $0xc] sm:$0xff] }
 0x141   : > { %v1524_v59 = vsel %vm4849_vm5, %v1522_v26, %v1523_v45  ;;  %v3217_v62 = vunpack.c.l.b16 %v2126_v57  ;;  %v779_v3 = vmax.f32 %v632_v60, 0.0  ;;  %v1183_v22 = vshrl.u32 %v5170_v1, 16  ;;  %v5246_v46 = vpop.permute.xlu2 %3256 }
 0x142   : > { %v2963_v63 = vunpack.c.l.b16 %v1524_v59  ;;  %v1780_v4 = vsel %vm4860_vm8, %v1775_v55, %v1779_v40  ;;  %v3498_v11 = vpack.c.b16 %v3471_v61, %v3470_v36  ;;  %v2360_v25 = vrot.slane %v2359_v53, 4 }
 0x143   : > { %v3243_v13 = vpack.c.b16 %v3217_v62, %v3216_v38  ;;  %v851_v52 = vpack.c.bf16 %v779_v3, %v779_v3  ;;  %v3137_v17 = vunpack.c.l.b16 %v1780_v4  ;;  %v2364_v14 = vrot.slane %v2362_v6, 5 }
 0x144   : > { %v2988_v5 = vpack.c.b16 %v2963_v63, %v2962_v48  ;;  %4630 = vmatmul.msk.bf16.gmra.mxu2 %vm3510_vm9, %v3498_v11  ;;  %v1189_v26 = vshll.u32 %v5202_v39, 16  ;;  %v2355_v28 = vsel %vm4860_vm8, %v2350_v19, %v2354_v56  ;;  %v1176_v29 = vor.u32 %v1175_v12, %v1172_v9  ;;  %v1601_v32 = vld [vmem:[#allocation2 + $0x54] sm:$0xf] }
 0x145   : > { %924 = vst.msk [vmem:[#allocation2 + $0x58] sm:$0xf] %vm901_vm3, %v851_v52  ;;  %v3163_v23 = vpack.c.b16 %v3137_v17, %v3136_v15  ;;  %v1181_v54 = vrot.slane %v1179_v20, 5  ;;  %v1185_v18 = vrot.slane %v1183_v22, 4  ;;  %v3561_v1 = vsel %vm3559_vm10, %v5199_v35, %v5153_v27  ;;  %v2635_v44 = vld [vmem:[#allocation2 + $0x54] sm:$0xe] }
 0x146   : > { %3264 = vrot.lane.b32.xlu0 %v3243_v13, %s4771_s29  ;;  %3010 = vrot.lane.b32.xlu1 %v2988_v5, %s4768_s24  ;;  %v2365_v31 = vsel %vm4860_vm8, %v2360_v25, %v2364_v14  ;;  %v1177_v24 = vrot.slane %v1176_v29, 4  ;;  %v1191_v37 = vrot.slane %v1189_v26, 5  ;;  %v3390_v39 = vunpack.c.l.b16 %v2355_v28  ;;  %v2027_v55 = vld [vmem:[#allocation2 + $0x54] sm:$0xe] }
 0x147   : > { %3184 = vrot.lane.b32.xlu2 %v3163_v23, %s4772_s30  ;;  %v3391_v34 = vunpack.c.l.b16 %v2365_v31  ;;  %v1186_v36 = vor.u32 %v1185_v18, %v1181_v54  ;;  %v1782_v42 = vshrl.u32 %v1601_v32, 16  ;;  %v1785_v43 = vshll.u32 %v1601_v32, 16  ;;  %v1416_v56 = vld [vmem:[#allocation2 + $0x54] sm:$0xe] }
 0x148   : > { %v634_v33 = vpop.f32.mrf.mxu0  ;;  %v1182_v27 = vsel %vm4860_vm8, %v1177_v24, %v1181_v54  ;;  %v3594_v45 = vsel %vm3592_vm11, %v3561_v1, %v5193_v30  ;;  %v2921_v30 = vpop.permute.xlu1 %2920  ;;  %v4387_v0 = vrot.slane %v2635_v44, 9  ;;  %v4671_v5 = vld [vmem:[%s4817_s22 + $0xd0] sm:$0xff]  ;;  %v4372_v17 = vrot.slane %v2027_v55, 9 }
 0x149   : > { %v780_v38 = vmax.f32 %v634_v33, 0.0  ;;  %v1187_v35 = vrot.slane %v1186_v36, 4  ;;  %v3418_v49 = vpack.c.b16 %v3391_v34, %v3390_v39  ;;  %v3627_v50 = vsel %vm3625_vm12, %v3594_v45, %v3175_v16  ;;  %v5261_v16 = vpop.permute.xlu0 %3096  ;;  %v2208_v22 = vld [vmem:[#allocation2 + $0x54] sm:$0xf]  ;;  %4340 = vmatmul.msk.bf16.gmra.mxu3 %vm452_vm2, %v4671_v5 }
 0x14a   : > { %v1784_v60 = vrot.slane %v1782_v42, 4  ;;  %v1787_v61 = vrot.slane %v1785_v43, 5  ;;  %v2882_v62 = vunpack.c.l.b16 %v1182_v27  ;;  %v3660_v15 = vsel %vm3658_vm13, %v3627_v50, %v5143_v21  ;;  %v2923_v43 = vpop.permute.xlu2 %2922 }
 0x14b   : > { %v852_v48 = vpack.c.bf16 %v780_v38, %v780_v38  ;;  %v1192_v57 = vsel %vm4860_vm8, %v1187_v35, %v1191_v37  ;;  %v3516_v6 = vsel %vm3510_vm9, %v4682_v51, %v2921_v30  ;;  %v4357_v20 = vrot.slane %v1416_v56, 9 }
 0x14c   : > { %v4703_v59 = vld [vmem:[#allocation2 + $0x54] sm:$0xff]  ;;  %v2883_v63 = vunpack.c.l.b16 %v1192_v57  ;;  %v1788_v10 = vor.u32 %v1787_v61, %v1784_v60  ;;  %v2367_v32 = vshrl.u32 %v2208_v22, 16  ;;  %v2370_v33 = vshll.u32 %v2208_v22, 16 }
 0x14d   : > { %v5251_v40 = vld [vmem:[#allocation2 + $0x58] sm:$0xf]  ;;  %925 = vst.msk [vmem:[#allocation2 + $0x5c] sm:$0xf] %vm901_vm3, %v852_v48  ;;  %v5276_v34 = vsel %vm3559_vm10, %v3516_v6, %v5175_v8 }
 0x14e   : > { %3438 = vrot.lane.b32.xlu1 %v3418_v49, %s4773_s5  ;;  %v2731_v3 = vrot.slane %v5251_v40, 5  ;;  %v1602_v4 = vld [vmem:[#allocation2 + $0x58] sm:$0xf]  ;;  %v2908_v52 = vpack.c.b16 %v2883_v63, %v2882_v62  ;;  %v1789_v28 = vrot.slane %v1788_v10, 4  ;;  %v2369_v49 = vrot.slane %v2367_v32, 4 }
 0x14f   : > { %v2129_v7 = vrot.slane %v1602_v4, 5  ;;  %v5256_v9 = vld [vmem:[#allocation2 + $0x58] sm:$0xf]  ;;  %v1791_v11 = vshll.u32 %v1602_v4, 16  ;;  %v1795_v13 = vshrl.u32 %v1602_v4, 16  ;;  %3106 = vrot.lane.b32.xlu2 %v4703_v59, %s4770_s26  ;;  %v2372_v55 = vrot.slane %v2370_v33, 5 }
 0x150   : > { %v1527_v53 = vrot.slane %v5256_v9, 5  ;;  %v637_v19 = vpop.f32.mrf.mxu0  ;;  %v2732_v12 = vsel %vm4849_vm5, %v4387_v0, %v2731_v3  ;;  %2930 = vrot.lane.b32.xlu0 %v2908_v52, %s4769_s25  ;;  %v2733_v23 = vrot.slane %v2731_v3, 4  ;;  %v4718_v1 = vld [vmem:[#allocation2 + $0x54] sm:$0xff]  ;;  %v3693_v3 = vsel %vm3691_vm14, %v3660_v15, %v5218_v58 }
 0x151   : > { %v781_v21 = vmax.f32 %v637_v19, 0.0  ;;  %v2130_v25 = vsel %vm4849_vm5, %v4372_v17, %v2129_v7  ;;  %v2131_v14 = vrot.slane %v2129_v7, 4  ;;  %v1793_v29 = vrot.slane %v1791_v11, 5  ;;  %v988_v10 = vld [vmem:[#allocation2 + $0x54] sm:$0xf] }
 0x152   : > { %v1528_v26 = vsel %vm4849_vm5, %v4357_v20, %v1527_v53  ;;  %v1797_v54 = vrot.slane %v1795_v13, 4  ;;  %v1529_v31 = vrot.slane %v1527_v53, 4  ;;  %v3472_v36 = vunpack.c.l.b16 %v2732_v12 }
 0x153   : > { %v853_v18 = vpack.c.bf16 %v781_v21, %v781_v21  ;;  %v3218_v38 = vunpack.c.l.b16 %v2130_v25  ;;  %v2964_v48 = vunpack.c.l.b16 %v1528_v26  ;;  %v1794_v62 = vsel %vm4860_vm8, %v1789_v28, %v1793_v29  ;;  %v4683_v21 = vld [vmem:[#allocation2 + $0x18] sm:$0xff]  ;;  %v5303_v28 = vld [vmem:[#allocation2 + $0x90] sm:$0xf] }
 0x154   : > { %v2235_v24 = vld [vmem:[#allocation2 + $0x5c] sm:$0x1]  ;;  %v1798_v42 = vor.u32 %v1797_v54, %v1793_v29  ;;  %v2373_v4 = vor.u32 %v2372_v55, %v2369_v49  ;;  %v2376_v7 = vshll.u32 %v5251_v40, 16  ;;  %v3138_v53 = vunpack.c.l.b16 %v1794_v62 }
 0x155   : > { %v1627_v37 = vld [vmem:[#allocation2 + $0x5c] sm:$0x1]  ;;  %926 = vst.msk [vmem:[#allocation2 + $0x60] sm:$0xf] %vm901_vm3, %v853_v18  ;;  %v2734_v27 = vrot.slane %v2235_v24, 5  ;;  %v2380_v12 = vshrl.u32 %v5251_v40, 16 }
 0x156   : > { %v5278_v39 = vld [vmem:[#allocation2 + $0x5c] sm:$0x1]  ;;  %3360 = vrot.lane.b32.xlu1 %v4718_v1, %s4767_s23  ;;  %v2132_v35 = vrot.slane %v1627_v37, 5  ;;  %v1801_v45 = vshll.u32 %v1627_v37, 16  ;;  %v1799_v8 = vrot.slane %v1798_v42, 4  ;;  %v2378_v19 = vrot.slane %v2376_v7, 5 }
 0x157   : > { %v1530_v44 = vrot.slane %v5278_v39, 5  ;;  %v2735_v50 = vsel %vm4849_vm5, %v2733_v23, %v2734_v27  ;;  %v2386_v58 = vshll.u32 %v2235_v24, 16  ;;  %v1194_v15 = vshrl.u32 %v988_v10, 16 }
 0x158   : > { %v3003_v56 = vpop.permute.xlu0 %3002  ;;  %v2133_v51 = vsel %vm4849_vm5, %v2131_v14, %v2132_v35  ;;  %v1803_v59 = vrot.slane %v1801_v45, 5  ;;  %v3473_v60 = vunpack.c.l.b16 %v2735_v50  ;;  %v639_v63 = vpop.f32.mrf.mxu0  ;;  %v1197_v22 = vshll.u32 %v988_v10, 16 }
 0x159   : > { %v1531_v57 = vsel %vm4849_vm5, %v1529_v31, %v1530_v44  ;;  %v3219_v61 = vunpack.c.l.b16 %v2133_v51  ;;  %v782_v11 = vmax.f32 %v639_v63, 0.0  ;;  %v3177_v17 = vpop.permute.xlu1 %3176  ;;  %v5299_v23 = vpop.permute.xlu2 %3178  ;;  %v2382_v14 = vrot.slane %v2380_v12, 4 }
 0x15a   : > { %v2965_v30 = vunpack.c.l.b16 %v1531_v57  ;;  %v1804_v0 = vsel %vm4860_vm8, %v1799_v8, %v1803_v59  ;;  %v3499_v13 = vpack.c.b16 %v3473_v60, %v3472_v36  ;;  %v1203_v26 = vshll.u32 %v5256_v9, 16 }
 0x15b   : > { %v3244_v5 = vpack.c.b16 %v3219_v61, %v3218_v38  ;;  %v3139_v6 = vunpack.c.l.b16 %v1804_v0  ;;  %v854_v20 = vpack.c.bf16 %v782_v11, %v782_v11  ;;  %v2374_v40 = vrot.slane %v2373_v4, 4 }
 0x15c   : > { %v2989_v52 = vpack.c.b16 %v2965_v30, %v2964_v48  ;;  %4631 = vmatmul.msk.bf16.gmra.mxu2 %vm3510_vm9, %v3499_v13  ;;  %v2388_v29 = vrot.slane %v2386_v58, 5  ;;  %v1196_v54 = vrot.slane %v1194_v15, 4  ;;  %v1199_v18 = vrot.slane %v1197_v22, 5  ;;  %v1603_v42 = vld [vmem:[#allocation2 + $0x60] sm:$0xf] }
 0x15d   : > { %v3164_v25 = vpack.c.b16 %v3139_v6, %v3138_v53  ;;  %927 = vst.msk [vmem:[#allocation2 + $0x64] sm:$0xf] %vm901_vm3, %v854_v20  ;;  %v2383_v31 = vor.u32 %v2382_v14, %v2378_v19  ;;  %v1205_v32 = vrot.slane %v1203_v26, 5  ;;  %v1207_v33 = vshrl.u32 %v5256_v9, 16  ;;  %v2636_v55 = vld [vmem:[#allocation2 + $0x60] sm:$0xe] }
 0x15e   : > { %3012 = vrot.lane.b32.xlu2 %v2989_v52, %s4768_s24  ;;  %3266 = vrot.lane.b32.xlu1 %v3244_v5, %s4771_s29  ;;  %v1213_v24 = vshll.u32 %v5278_v39, 16  ;;  %v3519_v36 = vsel %vm3510_vm9, %v4683_v21, %v2923_v43  ;;  %v1200_v38 = vor.u32 %v1199_v18, %v1196_v54  ;;  %v2487_v27 = vshrl.u32 %v5303_v28, 16  ;;  %v2028_v61 = vld [vmem:[#allocation2 + $0x60] sm:$0xe] }
 0x15f   : > { %3186 = vrot.lane.b32.xlu0 %v3164_v25, %s4772_s30  ;;  %v3596_v35 = vsel %vm3592_vm11, %v5276_v34, %v5261_v16  ;;  %v2379_v45 = vsel %vm4860_vm8, %v2374_v40, %v2378_v19  ;;  %v2384_v9 = vrot.slane %v2383_v31, 4  ;;  %v1209_v48 = vrot.slane %v1207_v33, 4  ;;  %v1417_v30 = vld [vmem:[#allocation2 + $0x60] sm:$0xe] }
 0x160   : > { %v3431_v1 = vpop.permute.xlu0 %3430  ;;  %v642_v44 = vpop.f32.mrf.mxu0  ;;  %v3565_v39 = vsel %vm3559_vm10, %v3519_v36, %v3003_v56  ;;  %v3629_v43 = vsel %vm3625_vm12, %v3596_v35, %v3177_v17  ;;  %v1215_v49 = vrot.slane %v1213_v24, 5  ;;  %v1201_v51 = vrot.slane %v1200_v38, 4  ;;  %v2210_v18 = vld [vmem:[#allocation2 + $0x60] sm:$0xf] }
 0x161   : > { %v3726_v37 = vsel %vm3724_vm15, %v3693_v3, %v3431_v1  ;;  %v783_v8 = vmax.f32 %v642_v44, 0.0  ;;  %v2389_v50 = vsel %vm4860_vm8, %v2384_v9, %v2388_v29  ;;  %v1210_v57 = vor.u32 %v1209_v48, %v1205_v32  ;;  %v3099_v63 = vpop.permute.xlu1 %3098  ;;  %v5329_v53 = vpop.permute.xlu2 %3100 }
 0x162   : > { %3905 = vmatmul.bf16.vlgmr.msra.gmra.mxu1 %v3726_v37  ;;  %v1806_v16 = vshrl.u32 %v1603_v42, 16  ;;  %v3392_v59 = vunpack.c.l.b16 %v2379_v45  ;;  %v3393_v60 = vunpack.c.l.b16 %v2389_v50  ;;  %v1809_v62 = vshll.u32 %v1603_v42, 16  ;;  %v5351_v50 = vpop.f32.mrf.mxu3 }
 0x163   : > { %v855_v34 = vpack.c.bf16 %v783_v8, %v783_v8  ;;  %v1206_v56 = vsel %vm4860_vm8, %v1201_v51, %v1205_v32  ;;  %v1211_v0 = vrot.slane %v1210_v57, 4  ;;  %v4388_v7 = vrot.slane %v2636_v55, 9 }
 0x164   : > { %v4704_v3 = vld [vmem:[#allocation2 + $0x60] sm:$0xff]  ;;  %v1808_v10 = vrot.slane %v1806_v16, 4  ;;  %v3419_v11 = vpack.c.b16 %v3393_v60, %v3392_v59  ;;  %v3662_v13 = vsel %vm3658_vm13, %v3629_v43, %v5246_v46  ;;  %v1811_v17 = vrot.slane %v1809_v62, 5 }
 0x165   : > { %v5323_v4 = vld [vmem:[#allocation2 + $0x64] sm:$0xf]  ;;  %928 = vst.msk [vmem:[#allocation2 + $0x68] sm:$0xf] %vm901_vm3, %v855_v34  ;;  %v1216_v6 = vsel %vm4860_vm8, %v1211_v0, %v1215_v49  ;;  %v5337_v22 = vsel %vm3592_vm11, %v3565_v39, %v3099_v63  ;;  %v2884_v46 = vunpack.c.l.b16 %v1206_v56  ;;  %v4373_v25 = vrot.slane %v2028_v61, 9 }
 0x166   : > { %v2738_v5 = vrot.slane %v5323_v4, 5  ;;  %v1604_v52 = vld [vmem:[#allocation2 + $0x64] sm:$0xf]  ;;  %3440 = vrot.lane.b32.xlu2 %v3419_v11, %s4773_s5  ;;  %v2885_v21 = vunpack.c.l.b16 %v1216_v6  ;;  %v4358_v29 = vrot.slane %v1417_v30, 9  ;;  %v1812_v33 = vor.u32 %v1811_v17, %v1808_v10 }
 0x167   : > { %3108 = vrot.lane.b32.xlu0 %v4704_v3, %s4770_s26  ;;  %v2136_v12 = vrot.slane %v1604_v52, 5  ;;  %v5334_v20 = vld [vmem:[#allocation2 + $0x64] sm:$0xf]  ;;  %v1815_v58 = vshll.u32 %v1604_v52, 16  ;;  %v1819_v15 = vshrl.u32 %v1604_v52, 16  ;;  %v2391_v45 = vshrl.u32 %v2210_v18, 16 }
 0x168   : > { %v3353_v19 = vpop.permute.xlu0 %3352  ;;  %v644_v14 = vpop.f32.mrf.mxu0  ;;  %v2739_v26 = vsel %vm4849_vm5, %v4388_v7, %v2738_v5  ;;  %v2740_v40 = vrot.slane %v2738_v5, 4  ;;  %v1534_v54 = vrot.slane %v5334_v20, 5  ;;  %v2909_v1 = vpack.c.b16 %v2885_v21, %v2884_v46  ;;  %v4719_v51 = vld [vmem:[#allocation2 + $0x60] sm:$0xff] }
 0x169   : > { %v784_v31 = vmax.f32 %v644_v14, 0.0  ;;  %v2137_v32 = vsel %vm4849_vm5, %v4373_v25, %v2136_v12  ;;  %v2138_v24 = vrot.slane %v2136_v12, 4  ;;  %v1817_v37 = vrot.slane %v1815_v58, 5  ;;  %v990_v46 = vld [vmem:[#allocation2 + $0x60] sm:$0xf] }
 0x16a   : > { %v1535_v36 = vsel %vm4849_vm5, %v4358_v29, %v1534_v54  ;;  %v1821_v38 = vrot.slane %v1819_v15, 4  ;;  %2932 = vrot.lane.b32.xlu1 %v2909_v1, %s4769_s25  ;;  %v1536_v35 = vrot.slane %v1534_v54, 4  ;;  %v1813_v44 = vrot.slane %v1812_v33, 4 }
 0x16b   : > { %v856_v42 = vpack.c.bf16 %v784_v31, %v784_v31  ;;  %v3695_v9 = vsel %vm3691_vm14, %v3662_v13, %v3353_v19  ;;  %v3474_v39 = vunpack.c.l.b16 %v2739_v26  ;;  %v3220_v8 = vunpack.c.l.b16 %v2137_v32 }
 0x16c   : > { %v2236_v48 = vld [vmem:[#allocation2 + $0x68] sm:$0x1]  ;;  %v1822_v55 = vor.u32 %v1821_v38, %v1817_v37  ;;  %v1818_v60 = vsel %vm4860_vm8, %v1813_v44, %v1817_v37  ;;  %v2966_v30 = vunpack.c.l.b16 %v1535_v36  ;;  %v2393_v10 = vrot.slane %v2391_v45, 4 }
 0x16d   : > { %v1628_v43 = vld [vmem:[#allocation2 + $0x68] sm:$0x1]  ;;  %929 = vst.msk [vmem:[#allocation2 + $0x6c] sm:$0xf] %vm901_vm3, %v856_v42  ;;  %v2741_v16 = vrot.slane %v2236_v48, 5  ;;  %v3140_v56 = vunpack.c.l.b16 %v1818_v60  ;;  %v2394_v12 = vshll.u32 %v2210_v18, 16 }
 0x16e   : > { %v5349_v49 = vld [vmem:[#allocation2 + $0x68] sm:$0x1]  ;;  %v2139_v34 = vrot.slane %v1628_v43, 5  ;;  %v1823_v62 = vrot.slane %v1822_v55, 4  ;;  %v1825_v63 = vshll.u32 %v1628_v43, 16  ;;  %3362 = vrot.lane.b32.xlu2 %v4719_v51, %s4767_s23  ;;  %v2400_v58 = vshll.u32 %v5323_v4, 16  ;;  %v677_v43 = vpop.f32.mrf.mxu3 }
 0x16f   : > { %v1537_v59 = vrot.slane %v5349_v49, 5  ;;  %v2742_v0 = vsel %vm4849_vm5, %v2740_v40, %v2741_v16  ;;  %v2404_v15 = vshrl.u32 %v5323_v4, 16  ;;  %v2396_v54 = vrot.slane %v2394_v12, 5  ;;  %v4684_v60 = vld [vmem:[#allocation2 + $0x24] sm:$0xff] }
 0x170   : > { %v5354_v57 = vpop.permute.xlu1 %3004  ;;  %v5359_v61 = vpop.permute.xlu2 %3006  ;;  %v2140_v3 = vsel %vm4849_vm5, %v2138_v24, %v2139_v34  ;;  %v3475_v5 = vunpack.c.l.b16 %v2742_v0  ;;  %v1827_v6 = vrot.slane %v1825_v63, 5  ;;  %v2402_v1 = vrot.slane %v2400_v58, 5 }
 0x171   : > { %v1538_v7 = vsel %vm4849_vm5, %v1536_v35, %v1537_v59  ;;  %v5368_v11 = vpop.permute.xlu0 %3258  ;;  %v647_v13 = vpop.f32.mrf.mxu0  ;;  %v3221_v52 = vunpack.c.l.b16 %v2140_v3  ;;  %v2406_v18 = vrot.slane %v2404_v15, 4  ;;  %v2410_v31 = vshll.u32 %v2236_v48, 16 }
 0x172   : > { %v2967_v17 = vunpack.c.l.b16 %v1538_v7  ;;  %v785_v19 = vmax.f32 %v647_v13, 0.0  ;;  %v3500_v21 = vpack.c.b16 %v3475_v5, %v3474_v39  ;;  %v1828_v26 = vsel %vm4860_vm8, %v1823_v62, %v1827_v6 }
 0x173   : > { %v3245_v25 = vpack.c.b16 %v3221_v52, %v3220_v8  ;;  %v3141_v29 = vunpack.c.l.b16 %v1828_v26  ;;  %v1218_v32 = vshrl.u32 %v990_v46, 16  ;;  %v1221_v33 = vshll.u32 %v990_v46, 16 }
 0x174   : > { %v2990_v14 = vpack.c.b16 %v2967_v17, %v2966_v30  ;;  %v857_v40 = vpack.c.bf16 %v785_v19, %v785_v19  ;;  %4632 = vmatmul.msk.bf16.gmra.mxu2 %vm3510_vm9, %v3500_v21  ;;  %v2397_v36 = vor.u32 %v2396_v54, %v2393_v10  ;;  %v1227_v37 = vshll.u32 %v5334_v20, 16  ;;  %v2637_v17 = vld [vmem:[#allocation2 + $0x6c] sm:$0xe] }
 0x175   : > { %v3165_v24 = vpack.c.b16 %v3141_v29, %v3140_v56  ;;  %v1231_v38 = vshrl.u32 %v5334_v20, 16  ;;  %v2407_v44 = vor.u32 %v2406_v18, %v2402_v1  ;;  %v2412_v45 = vrot.slane %v2410_v31, 5  ;;  %v2029_v6 = vld [vmem:[#allocation2 + $0x6c] sm:$0xe] }
 0x176   : > { %3014 = vrot.lane.b32.xlu0 %v2990_v14, %s4768_s24  ;;  %930 = vst.msk [vmem:[#allocation2 + $0x70] sm:$0xf] %vm901_vm3, %v857_v40  ;;  %v1220_v39 = vrot.slane %v1218_v32, 4  ;;  %3268 = vrot.lane.b32.xlu2 %v3245_v25, %s4771_s29  ;;  %v2398_v48 = vrot.slane %v2397_v36, 4  ;;  %v1223_v8 = vrot.slane %v1221_v33, 5  ;;  %v1229_v55 = vrot.slane %v1227_v37, 5 }
 0x177   : > { %3188 = vrot.lane.b32.xlu1 %v3165_v24, %s4772_s30  ;;  %v1233_v51 = vrot.slane %v1231_v38, 4  ;;  %v2408_v34 = vrot.slane %v2407_v44, 4  ;;  %v1237_v20 = vshll.u32 %v5349_v49, 16  ;;  %v796_v59 = vmax.f32 %v5351_v50, 0.0  ;;  %v1418_v46 = vld [vmem:[#allocation2 + $0x6c] sm:$0xe]  ;;  %v679_v38 = vpop.f32.mrf.mxu3 }
 0x178   : > { %v3433_v4 = vpop.permute.xlu1 %3432  ;;  %v5379_v42 = vpop.permute.xlu2 %3434  ;;  %v2403_v62 = vsel %vm4860_vm8, %v2398_v48, %v2402_v1  ;;  %v1224_v63 = vor.u32 %v1223_v8, %v1220_v39  ;;  %v3631_v19 = vsel %vm3625_vm12, %v5337_v22, %v5299_v23  ;;  %v4374_v33 = vrot.slane %v2029_v6, 9 }
 0x179   : > { %v3729_v35 = vsel %vm3724_vm15, %v3695_v9, %v3433_v4  ;;  %v649_v16 = vpop.f32.mrf.mxu0  ;;  %v797_v9 = vmax.f32 %v677_v43, 0.0  ;;  %v1234_v56 = vor.u32 %v1233_v51, %v1229_v55  ;;  %v2925_v0 = vpop.permute.xlu0 %2924  ;;  %v2413_v3 = vsel %vm4860_vm8, %v2408_v34, %v2412_v45 }
 0x17a   : > { %3910 = vmatmul.bf16.gmra.mxu1 %v3729_v35  ;;  %v786_v30 = vmax.f32 %v649_v16, 0.0  ;;  %v3394_v7 = vunpack.c.l.b16 %v2403_v62  ;;  %v1239_v10 = vrot.slane %v1237_v20, 5  ;;  %v868_v13 = vpack.c.bf16 %v796_v59, %v796_v59  ;;  %v1605_v35 = vld [vmem:[#allocation2 + $0x6c] sm:$0xf] }
 0x17b   : > { %v3522_v5 = vsel %vm3510_vm9, %v4684_v60, %v2925_v0  ;;  %v3395_v52 = vunpack.c.l.b16 %v2413_v3  ;;  %v1225_v50 = vrot.slane %v1224_v63, 4  ;;  %v1235_v12 = vrot.slane %v1234_v56, 4 }
 0x17c   : > { %v858_v49 = vpack.c.bf16 %v786_v30, %v786_v30  ;;  %941 = vst.msk [vmem:[#allocation2 + $0x9c] sm:$0xf] %vm901_vm3, %v868_v13  ;;  %v869_v15 = vpack.c.bf16 %v797_v9, %v797_v9  ;;  %v3664_v21 = vsel %vm3658_vm13, %v3631_v19, %v5368_v11  ;;  %v3567_v23 = vsel %vm3559_vm10, %v3522_v5, %v5354_v57 }
 0x17d   : > { %v4705_v58 = vld [vmem:[#allocation2 + $0x6c] sm:$0xff]  ;;  %v3420_v25 = vpack.c.b16 %v3395_v52, %v3394_v7  ;;  %v1230_v14 = vsel %vm4860_vm8, %v1225_v50, %v1229_v55  ;;  %v1240_v22 = vsel %vm4860_vm8, %v1235_v12, %v1239_v10  ;;  %v4389_v11 = vrot.slane %v2637_v17, 9 }
 0x17e   : > { %931 = vst.msk [vmem:[#allocation2 + $0x74] sm:$0xf] %vm901_vm3, %v858_v49  ;;  %v5400_v40 = vld [vmem:[#allocation2 + $0x70] sm:$0xf]  ;;  %v2886_v31 = vunpack.c.l.b16 %v1230_v14  ;;  %v2887_v32 = vunpack.c.l.b16 %v1240_v22  ;;  %v4359_v36 = vrot.slane %v1418_v46, 9  ;;  %v5421_v44 = vrot.slane %v2487_v27, 4 }
 0x17f   : > { %v5402_v29 = vld [vmem:[#allocation2 + $0x70] sm:$0xf]  ;;  %942 = vst.msk [vmem:[#allocation2 + $0xa0] sm:$0xf] %vm901_vm3, %v869_v15  ;;  %v2745_v1 = vrot.slane %v5400_v40, 5  ;;  %3442 = vrot.lane.b32.xlu0 %v3420_v25, %s4773_s5  ;;  %3110 = vrot.lane.b32.xlu1 %v4705_v58, %s4770_s26  ;;  %v3600_v8 = vsel %vm3592_vm11, %v3567_v23, %v5329_v53  ;;  %v798_v20 = vmax.f32 %v679_v38, 0.0 }
 0x180   : > { %v3355_v26 = vpop.permute.xlu1 %3354  ;;  %v5408_v54 = vpop.permute.xlu2 %3356  ;;  %v5412_v18 = vld [vmem:[#allocation2 + $0x70] sm:$0xf]  ;;  %v2143_v57 = vrot.slane %v5402_v29, 5  ;;  %v2910_v45 = vpack.c.b16 %v2887_v32, %v2886_v31  ;;  %v1830_v59 = vshrl.u32 %v1605_v35, 16  ;;  %v1833_v49 = vshll.u32 %v1605_v35, 16 }
 0x181   : > { %v3697_v4 = vsel %vm3691_vm14, %v3664_v21, %v3355_v26  ;;  %v652_v24 = vpop.f32.mrf.mxu0  ;;  %v1541_v37 = vrot.slane %v5412_v18, 5  ;;  %v2746_v43 = vsel %vm4849_vm5, %v4389_v11, %v2745_v1  ;;  %v2747_v55 = vrot.slane %v2745_v1, 4  ;;  %v4720_v0 = vld [vmem:[#allocation2 + $0x6c] sm:$0xff]  ;;  %v5457_v35 = vpop.f32.mrf.mxu3 }
 0x182   : > { %v787_v39 = vmax.f32 %v652_v24, 0.0  ;;  %v2144_v48 = vsel %vm4849_vm5, %v4374_v33, %v2143_v57  ;;  %v2145_v51 = vrot.slane %v2143_v57, 4  ;;  %2934 = vrot.lane.b32.xlu2 %v2910_v45, %s4769_s25  ;;  %v3732_v9 = vsel %vm3724_vm15, %v3697_v4, %v5379_v42  ;;  %v992_v4 = vld [vmem:[#allocation2 + $0x6c] sm:$0xf] }
 0x183   : > { %v1542_v16 = vsel %vm4849_vm5, %v4359_v36, %v1541_v37  ;;  %v1543_v34 = vrot.slane %v1541_v37, 4  ;;  %v3476_v30 = vunpack.c.l.b16 %v2746_v43  ;;  %v3222_v63 = vunpack.c.l.b16 %v2144_v48 }
 0x184   : > { %v859_v27 = vpack.c.bf16 %v787_v39, %v787_v39  ;;  %v2968_v56 = vunpack.c.l.b16 %v1542_v16  ;;  %v870_v13 = vpack.c.bf16 %v798_v20, %v798_v20  ;;  %v1832_v5 = vrot.slane %v1830_v59, 4 }
 0x185   : > { %v5434_v60 = vld [vmem:[#allocation2 + $0x74] sm:$0x1]  ;;  %v1839_v42 = vshll.u32 %v5402_v29, 16  ;;  %v1843_v52 = vshrl.u32 %v5402_v29, 16  ;;  %v2212_v29 = vld [vmem:[#allocation2 + $0x6c] sm:$0xf] }
 0x186   : > { %v1629_v62 = vld [vmem:[#allocation2 + $0x74] sm:$0x1]  ;;  %932 = vst.msk [vmem:[#allocation2 + $0x78] sm:$0xf] %vm901_vm3, %v859_v27  ;;  %v2748_v3 = vrot.slane %v5434_v60, 5  ;;  %v1835_v11 = vrot.slane %v1833_v49, 5 }
 0x187   : > { %v5436_v53 = vld [vmem:[#allocation2 + $0x74] sm:$0x1]  ;;  %v2146_v7 = vrot.slane %v1629_v62, 5  ;;  %3364 = vrot.lane.b32.xlu0 %v4720_v0, %s4767_s23  ;;  %943 = vst.msk [vmem:[#allocation2 + $0xa4] sm:$0xf] %vm901_vm3, %v870_v13  ;;  %v1849_v58 = vshll.u32 %v1629_v62, 16 }
 0x188   : > { %v1544_v10 = vrot.slane %v5436_v53, 5  ;;  %v3261_v50 = vpop.permute.xlu1 %3260  ;;  %v2749_v6 = vsel %vm4849_vm5, %v2747_v55, %v2748_v3  ;;  %v5451_v15 = vpop.permute.xlu2 %3262  ;;  %v1841_v1 = vrot.slane %v1839_v42, 5  ;;  %v1845_v57 = vrot.slane %v1843_v52, 4 }
 0x189   : > { %v3181_v17 = vpop.permute.xlu0 %3180  ;;  %v2147_v19 = vsel %vm4849_vm5, %v2145_v51, %v2146_v7  ;;  %v654_v21 = vpop.f32.mrf.mxu0  ;;  %v3477_v25 = vunpack.c.l.b16 %v2749_v6  ;;  %v1836_v36 = vor.u32 %v1835_v11, %v1832_v5  ;;  %v1851_v37 = vrot.slane %v1849_v58, 5  ;;  %v4685_v7 = vld [vmem:[#allocation2 + $0x30] sm:$0xff] }
 0x18a   : > { %v1545_v12 = vsel %vm4849_vm5, %v1543_v34, %v1544_v10  ;;  %v3633_v46 = vsel %vm3625_vm12, %v3600_v8, %v3181_v17  ;;  %3915 = vmatmul.bf16.gmra.mxu1 %v3732_v9  ;;  %v3223_v14 = vunpack.c.l.b16 %v2147_v19  ;;  %v788_v22 = vmax.f32 %v654_v21, 0.0  ;;  %v4686_v10 = vld [vmem:[#allocation2 + $0x3c] sm:$0xff] }
 0x18b   : > { %v2969_v26 = vunpack.c.l.b16 %v1545_v12  ;;  %v5455_v23 = vsel %vm3658_vm13, %v3633_v46, %v3261_v50  ;;  %v3501_v31 = vpack.c.b16 %v3477_v25, %v3476_v30  ;;  %v2415_v38 = vshrl.u32 %v2212_v29, 16 }
 0x18c   : > { %v3246_v32 = vpack.c.b16 %v3223_v14, %v3222_v63  ;;  %v860_v24 = vpack.c.bf16 %v788_v22, %v788_v22  ;;  %v1846_v45 = vor.u32 %v1845_v57, %v1841_v1  ;;  %v2418_v39 = vshll.u32 %v2212_v29, 16 }
 0x18d   : > { %v2991_v33 = vpack.c.b16 %v2969_v26, %v2968_v56  ;;  %4633 = vmatmul.msk.bf16.gmra.mxu2 %vm3510_vm9, %v3501_v31  ;;  %v2424_v43 = vshll.u32 %v5400_v40, 16  ;;  %v2428_v48 = vshrl.u32 %v5400_v40, 16  ;;  %v1837_v8 = vrot.slane %v1836_v36, 4 }
 0x18e   : > { %933 = vst.msk [vmem:[#allocation2 + $0x7c] sm:$0xf] %vm901_vm3, %v860_v24  ;;  %v2417_v55 = vrot.slane %v2415_v38, 4  ;;  %v2434_v51 = vshll.u32 %v5434_v60, 16  ;;  %v1242_v16 = vshrl.u32 %v992_v4, 16  ;;  %v1847_v27 = vrot.slane %v1846_v45, 4 }
 0x18f   : > { %3016 = vrot.lane.b32.xlu1 %v2991_v33, %s4768_s24  ;;  %v2420_v34 = vrot.slane %v2418_v39, 5  ;;  %v2426_v20 = vrot.slane %v2424_v43, 5  ;;  %v2430_v59 = vrot.slane %v2428_v48, 4  ;;  %3270 = vrot.lane.b32.xlu0 %v3246_v32, %s4771_s29  ;;  %v1842_v9 = vsel %vm4860_vm8, %v1837_v8, %v1841_v1  ;;  %v684_v33 = vpop.f32.mrf.mxu3 }
 0x190   : > { %v2436_v30 = vrot.slane %v2434_v51, 5  ;;  %v1244_v62 = vrot.slane %v1242_v16, 4  ;;  %v1245_v63 = vshll.u32 %v992_v4, 16  ;;  %v1852_v40 = vsel %vm4860_vm8, %v1847_v27, %v1851_v37  ;;  %v2638_v27 = vld [vmem:[#allocation2 + $0x78] sm:$0xe] }
 0x191   : > { %v3142_v56 = vunpack.c.l.b16 %v1842_v9  ;;  %v657_v0 = vpop.f32.mrf.mxu0  ;;  %v2421_v3 = vor.u32 %v2420_v34, %v2417_v55  ;;  %v2431_v60 = vor.u32 %v2430_v59, %v2426_v20  ;;  %v3143_v13 = vunpack.c.l.b16 %v1852_v40  ;;  %v3103_v49 = vpop.permute.xlu0 %3102  ;;  %v1419_v9 = vld [vmem:[#allocation2 + $0x78] sm:$0xe] }
 0x192   : > { %v789_v5 = vmax.f32 %v657_v0, 0.0  ;;  %v1247_v42 = vrot.slane %v1245_v63, 5  ;;  %v1251_v52 = vshll.u32 %v5412_v18, 16  ;;  %v2927_v50 = vpop.permute.xlu1 %2926  ;;  %v2929_v17 = vpop.permute.xlu2 %2928  ;;  %v1255_v12 = vshrl.u32 %v5412_v18, 16  ;;  %v5483_v18 = vld [vmem:[#allocation2 + $0x94] sm:$0xf] }
 0x193   : > { %v2422_v6 = vrot.slane %v2421_v3, 4  ;;  %v2432_v19 = vrot.slane %v2431_v60, 4  ;;  %v1261_v58 = vshll.u32 %v5436_v53, 16  ;;  %v3525_v46 = vsel %vm3510_vm9, %v4685_v7, %v2927_v50 }
 0x194   : > { %v5475_v21 = vsel %vm3510_vm9, %v4686_v10, %v2929_v17  ;;  %v3166_v25 = vpack.c.b16 %v3143_v13, %v3142_v56  ;;  %v861_v14 = vpack.c.bf16 %v789_v5, %v789_v5  ;;  %v3569_v26 = vsel %vm3559_vm10, %v3525_v46, %v5359_v61  ;;  %v5490_v61 = vld [vmem:[#allocation2 + $0x98] sm:$0x1] }
 0x195   : > { %v2427_v29 = vsel %vm4860_vm8, %v2422_v6, %v2426_v20  ;;  %v2437_v22 = vsel %vm4860_vm8, %v2432_v19, %v2436_v30  ;;  %v1248_v11 = vor.u32 %v1247_v42, %v1244_v62  ;;  %v5488_v53 = vsel %vm3592_vm11, %v3569_v26, %v3103_v49  ;;  %v5499_v16 = vld [vmem:[#allocation2 + $0x7c] sm:$0xf] }
 0x196   : > { %3190 = vrot.lane.b32.xlu2 %v3166_v25, %s4772_s30  ;;  %934 = vst.msk [vmem:[#allocation2 + $0x80] sm:$0xf] %vm901_vm3, %v861_v14  ;;  %v3396_v1 = vunpack.c.l.b16 %v2427_v29  ;;  %v3397_v31 = vunpack.c.l.b16 %v2437_v22  ;;  %v1253_v32 = vrot.slane %v1251_v52, 5  ;;  %v1257_v4 = vrot.slane %v1255_v12, 4  ;;  %v4706_v34 = vld [vmem:[#allocation2 + $0x78] sm:$0xff] }
 0x197   : > { %v1249_v57 = vrot.slane %v1248_v11, 4  ;;  %v1263_v24 = vrot.slane %v1261_v58, 5  ;;  %v799_v36 = vmax.f32 %v5457_v35, 0.0  ;;  %v2490_v38 = vshll.u32 %v5303_v28, 16  ;;  %v5505_v7 = vld [vmem:[#allocation2 + $0x7c] sm:$0xf] }
 0x198   : > { %v3421_v37 = vpack.c.b16 %v3397_v31, %v3396_v1  ;;  %v2496_v45 = vshll.u32 %v5483_v18, 16  ;;  %v2500_v39 = vshrl.u32 %v5483_v18, 16  ;;  %v1258_v48 = vor.u32 %v1257_v4, %v1253_v32  ;;  %v1607_v1 = vld [vmem:[#allocation2 + $0x78] sm:$0xf]  ;;  %v687_v31 = vpop.f32.mrf.mxu3 }
 0x199   : > { %v1254_v43 = vsel %vm4860_vm8, %v1249_v57, %v1253_v32  ;;  %v659_v8 = vpop.f32.mrf.mxu0  ;;  %v871_v55 = vpack.c.bf16 %v799_v36, %v799_v36  ;;  %v2506_v51 = vshll.u32 %v5490_v61, 16  ;;  %v2492_v20 = vrot.slane %v2490_v38, 5 }
 0x19a   : > { %3444 = vrot.lane.b32.xlu1 %v3421_v37, %s4773_s5  ;;  %v2888_v35 = vunpack.c.l.b16 %v1254_v43  ;;  %v790_v28 = vmax.f32 %v659_v8, 0.0  ;;  %v2498_v59 = vrot.slane %v2496_v45, 5  ;;  %v1259_v30 = vrot.slane %v1258_v48, 4 }
 0x19b   : > { %944 = vst.msk [vmem:[#allocation2 + $0xa8] sm:$0xf] %vm901_vm3, %v871_v55  ;;  %v2502_v62 = vrot.slane %v2500_v39, 4  ;;  %v2508_v63 = vrot.slane %v2506_v51, 5  ;;  %v800_v40 = vmax.f32 %v684_v33, 0.0  ;;  %v2493_v0 = vor.u32 %v2492_v20, %v5421_v44 }
 0x19c   : > { %v862_v56 = vpack.c.bf16 %v790_v28, %v790_v28  ;;  %v4390_v3 = vrot.slane %v2638_v27, 9  ;;  %v2752_v60 = vrot.slane %v5499_v16, 5  ;;  %v1264_v10 = vsel %vm4860_vm8, %v1259_v30, %v1263_v24  ;;  %v1608_v24 = vld [vmem:[#allocation2 + $0x7c] sm:$0xf] }
 0x19d   : > { %v2503_v13 = vor.u32 %v2502_v62, %v2498_v59  ;;  %v872_v5 = vpack.c.bf16 %v800_v40, %v800_v40  ;;  %v5509_v49 = vld [vmem:[#allocation2 + $0x80] sm:$0x1]  ;;  %v4360_v52 = vrot.slane %v1419_v9, 9  ;;  %v2889_v50 = vunpack.c.l.b16 %v1264_v10 }
 0x19e   : > { %v5511_v42 = vld [vmem:[#allocation2 + $0x80] sm:$0x1]  ;;  %3112 = vrot.lane.b32.xlu2 %v4706_v34, %s4770_s26  ;;  %935 = vst.msk [vmem:[#allocation2 + $0x84] sm:$0xf] %vm901_vm3, %v862_v56  ;;  %v2494_v44 = vrot.slane %v2493_v0, 4  ;;  %v2753_v6 = vsel %vm4849_vm5, %v4390_v3, %v2752_v60  ;;  %v2754_v19 = vrot.slane %v2752_v60, 4  ;;  %v3699_v60 = vsel %vm3691_vm14, %v5455_v23, %v5408_v54 }
 0x19f   : > { %v2504_v12 = vrot.slane %v2503_v13, 4  ;;  %945 = vst.msk [vmem:[#allocation2 + $0xac] sm:$0xf] %vm901_vm3, %v872_v5  ;;  %v2755_v46 = vrot.slane %v5509_v49, 5  ;;  %v3478_v25 = vunpack.c.l.b16 %v2753_v6  ;;  %v2911_v14 = vpack.c.b16 %v2889_v50, %v2888_v35  ;;  %v1630_v48 = vld [vmem:[#allocation2 + $0x80] sm:$0x1] }
 0x1a0   : > { %v3009_v17 = vpop.permute.xlu0 %3008  ;;  %v2499_v26 = vsel %vm4860_vm8, %v2494_v44, %v2498_v59  ;;  %v1548_v22 = vrot.slane %v5505_v7, 5  ;;  %v1551_v11 = vrot.slane %v5511_v42, 5  ;;  %v1854_v8 = vshrl.u32 %v1607_v1, 16  ;;  %v2030_v34 = vld [vmem:[#allocation2 + $0x78] sm:$0xe] }
 0x1a1   : > { %v3571_v58 = vsel %vm3559_vm10, %v5475_v21, %v3009_v17  ;;  %v3183_v29 = vpop.permute.xlu1 %3182  ;;  %v2509_v32 = vsel %vm4860_vm8, %v2504_v12, %v2508_v63  ;;  %v3402_v21 = vunpack.c.l.b16 %v2499_v26  ;;  %v662_v57 = vpop.f32.mrf.mxu0  ;;  %v2756_v4 = vsel %vm4849_vm5, %v2754_v19, %v2755_v46  ;;  %2936 = vrot.lane.b32.xlu0 %v2911_v14, %s4769_s25  ;;  %v2214_v13 = vld [vmem:[#allocation2 + $0x78] sm:$0xf] }
 0x1a2   : > { %v5529_v33 = vsel %vm3625_vm12, %v5488_v53, %v3183_v29  ;;  %v3403_v36 = vunpack.c.l.b16 %v2509_v32  ;;  %v791_v37 = vmax.f32 %v662_v57, 0.0  ;;  %v3479_v38 = vunpack.c.l.b16 %v2756_v4  ;;  %v3185_v14 = vpop.permute.xlu2 %3184 }
 0x1a3   : > { %v1549_v45 = vsel %vm4849_vm5, %v4360_v52, %v1548_v22  ;;  %v1550_v39 = vrot.slane %v1548_v22, 4  ;;  %v1857_v55 = vshll.u32 %v1607_v1, 16  ;;  %v1863_v35 = vshll.u32 %v1608_v24, 16  ;;  %v689_v22 = vpop.f32.mrf.mxu3 }
 0x1a4   : > { %v2970_v43 = vunpack.c.l.b16 %v1549_v45  ;;  %v3424_v53 = vpack.c.b16 %v3403_v36, %v3402_v21  ;;  %v863_v51 = vpack.c.bf16 %v791_v37, %v791_v37  ;;  %v3502_v27 = vpack.c.b16 %v3479_v38, %v3478_v25 }
 0x1a5   : > { %v1552_v28 = vsel %vm4849_vm5, %v1550_v39, %v1551_v11  ;;  %v1856_v20 = vrot.slane %v1854_v8, 4  ;;  %v1859_v59 = vrot.slane %v1857_v55, 5  ;;  %v1867_v9 = vshrl.u32 %v1608_v24, 16 }
 0x1a6   : > { %3450 = vrot.lane.b32.xlu1 %v3424_v53, %s4773_s5  ;;  %936 = vst.msk [vmem:[#allocation2 + $0x88] sm:$0xf] %vm901_vm3, %v863_v51  ;;  %4634 = vmatmul.msk.bf16.gmra.mxu2 %vm3510_vm9, %v3502_v27  ;;  %v2971_v30 = vunpack.c.l.b16 %v1552_v28  ;;  %v1865_v63 = vrot.slane %v1863_v35, 5  ;;  %v1873_v40 = vshll.u32 %v1630_v48, 16  ;;  %v801_v56 = vmax.f32 %v687_v31, 0.0 }
 0x1a7   : > { %v1860_v0 = vor.u32 %v1859_v59, %v1856_v20  ;;  %v1869_v3 = vrot.slane %v1867_v9, 4  ;;  %v4375_v10 = vrot.slane %v2030_v34, 9  ;;  %v2150_v25 = vrot.slane %v1608_v24, 5  ;;  %v994_v53 = vld [vmem:[#allocation2 + $0x78] sm:$0xf] }
 0x1a8   : > { %v3437_v62 = vpop.permute.xlu0 %3436  ;;  %v2992_v5 = vpack.c.b16 %v2971_v30, %v2970_v43  ;;  %v1875_v52 = vrot.slane %v1873_v40, 5  ;;  %v873_v50 = vpack.c.bf16 %v801_v56, %v801_v56  ;;  %v2153_v54 = vrot.slane %v1630_v48, 5 }
 0x1a9   : > { %v3735_v44 = vsel %vm3724_vm15, %v3699_v60, %v3437_v62  ;;  %v3105_v17 = vpop.permute.xlu1 %3104  ;;  %v1861_v6 = vrot.slane %v1860_v0, 4  ;;  %v1870_v19 = vor.u32 %v1869_v3, %v1865_v63  ;;  %v664_v12 = vpop.f32.mrf.mxu0  ;;  %v2439_v23 = vshrl.u32 %v2214_v13, 16 }
 0x1aa   : > { %3920 = vmatmul.bf16.gmra.mxu1 %v3735_v44  ;;  %v3604_v46 = vsel %vm3592_vm11, %v3571_v58, %v3105_v17  ;;  %3018 = vrot.lane.b32.xlu2 %v2992_v5, %s4768_s24  ;;  %v792_v26 = vmax.f32 %v664_v12, 0.0  ;;  %946 = vst.msk [vmem:[#allocation2 + $0xb0] sm:$0xf] %vm901_vm3, %v873_v50  ;;  %v2442_v29 = vshll.u32 %v2214_v13, 16  ;;  %v2151_v31 = vsel %vm4849_vm5, %v4375_v10, %v2150_v25  ;;  %v4721_v58 = vld [vmem:[#allocation2 + $0x78] sm:$0xff]  ;;  %v5577_v5 = vpop.permute.xlu2 %3106 }
 0x1ab   : > { %v1866_v11 = vsel %vm4860_vm8, %v1861_v6, %v1865_v63  ;;  %v1871_v1 = vrot.slane %v1870_v19, 4  ;;  %v2152_v32 = vrot.slane %v2150_v25, 4  ;;  %v3224_v4 = vunpack.c.l.b16 %v2151_v31  ;;  %v2031_v6 = vld [vmem:[#allocation2 + $0x84] sm:$0xe] }
 0x1ac   : > { %v3144_v21 = vunpack.c.l.b16 %v1866_v11  ;;  %v864_v57 = vpack.c.bf16 %v792_v26, %v792_v26  ;;  %v2441_v24 = vrot.slane %v2439_v23, 4  ;;  %v2444_v38 = vrot.slane %v2442_v29, 5 }
 0x1ad   : > { %v1876_v36 = vsel %vm4860_vm8, %v1871_v1, %v1875_v52  ;;  %v2154_v37 = vsel %vm4849_vm5, %v2152_v32, %v2153_v54  ;;  %v2448_v45 = vshll.u32 %v5499_v16, 16  ;;  %v2452_v48 = vshrl.u32 %v5499_v16, 16  ;;  %v5575_v13 = vld [vmem:[#allocation2 + $0x88] sm:$0xf] }
 0x1ae   : > { %3366 = vrot.lane.b32.xlu1 %v4721_v58, %s4767_s23  ;;  %v3145_v39 = vunpack.c.l.b16 %v1876_v36  ;;  %937 = vst.msk [vmem:[#allocation2 + $0x8c] sm:$0xf] %vm901_vm3, %v864_v57  ;;  %v3225_v43 = vunpack.c.l.b16 %v2154_v37  ;;  %v2458_v8 = vshll.u32 %v5509_v49, 16  ;;  %v2445_v51 = vor.u32 %v2444_v38, %v2441_v24  ;;  %v5583_v11 = vld [vmem:[#allocation2 + $0x88] sm:$0xf] }
 0x1af   : > { %v2450_v27 = vrot.slane %v2448_v45, 5  ;;  %v3668_v35 = vsel %vm3658_vm13, %v5529_v33, %v5451_v15  ;;  %v802_v34 = vmax.f32 %v689_v22, 0.0  ;;  %v2454_v59 = vrot.slane %v2452_v48, 4  ;;  %v2639_v15 = vld [vmem:[#allocation2 + $0x84] sm:$0xe] }
 0x1b0   : > { %v3359_v55 = vpop.permute.xlu0 %3358  ;;  %v3167_v28 = vpack.c.b16 %v3145_v39, %v3144_v21  ;;  %v3247_v20 = vpack.c.b16 %v3225_v43, %v3224_v4  ;;  %v2460_v9 = vrot.slane %v2458_v8, 5  ;;  %v2446_v30 = vrot.slane %v2445_v51, 4  ;;  %v2216_v4 = vld [vmem:[#allocation2 + $0x84] sm:$0xf] }
 0x1b1   : > { %v5565_v62 = vsel %vm3691_vm14, %v3668_v35, %v3359_v55  ;;  %v874_v16 = vpack.c.bf16 %v802_v34, %v802_v34  ;;  %v1266_v63 = vshrl.u32 %v994_v53, 16  ;;  %v2455_v49 = vor.u32 %v2454_v59, %v2450_v27 }
 0x1b2   : > { %3192 = vrot.lane.b32.xlu0 %v3167_v28, %s4772_s30  ;;  %v1269_v40 = vshll.u32 %v994_v53, 16  ;;  %v1275_v56 = vshll.u32 %v5505_v7, 16  ;;  %v1279_v0 = vshrl.u32 %v5505_v7, 16  ;;  %v2451_v33 = vsel %vm4860_vm8, %v2446_v30, %v2450_v27  ;;  %v692_v7 = vpop.f32.mrf.mxu3 }
 0x1b3   : > { %947 = vst.msk [vmem:[#allocation2 + $0xb4] sm:$0xf] %vm901_vm3, %v874_v16  ;;  %v1268_v3 = vrot.slane %v1266_v63, 4  ;;  %v1285_v60 = vshll.u32 %v5511_v42, 16  ;;  %v3637_v10 = vsel %vm3625_vm12, %v3604_v46, %v3185_v14  ;;  %v2456_v52 = vrot.slane %v2455_v49, 4  ;;  %v4707_v46 = vld [vmem:[#allocation2 + $0x84] sm:$0xff] }
 0x1b4   : > { %v3398_v50 = vunpack.c.l.b16 %v2451_v33  ;;  %v1271_v44 = vrot.slane %v1269_v40, 5  ;;  %v1277_v17 = vrot.slane %v1275_v56, 5  ;;  %v1281_v19 = vrot.slane %v1279_v0, 4 }
 0x1b5   : > { %v1287_v12 = vrot.slane %v1285_v60, 5  ;;  %v803_v25 = vmax.f32 %v692_v7, 0.0  ;;  %v2239_v26 = vld [vmem:[#allocation2 + $0x8c] sm:$0x1]  ;;  %v4391_v54 = vrot.slane %v2639_v15, 9  ;;  %v2461_v42 = vsel %vm4860_vm8, %v2456_v52, %v2460_v9 }
 0x1b6   : > { %3272 = vrot.lane.b32.xlu1 %v3247_v20, %s4771_s29  ;;  %v1272_v14 = vor.u32 %v1271_v44, %v1268_v3  ;;  %v2759_v29 = vrot.slane %v5575_v13, 5  ;;  %v2762_v22 = vrot.slane %v2239_v26, 5  ;;  %v3399_v1 = vunpack.c.l.b16 %v2461_v42  ;;  %v5590_v57 = vld [vmem:[#allocation2 + $0x8c] sm:$0x1]  ;;  %v1609_v20 = vld [vmem:[#allocation2 + $0x84] sm:$0xf] }
 0x1b7   : > { %v1282_v31 = vor.u32 %v1281_v19, %v1277_v17  ;;  %v875_v21 = vpack.c.bf16 %v803_v25, %v803_v25  ;;  %v4376_v38 = vrot.slane %v2031_v6, 9  ;;  %v2157_v48 = vrot.slane %v5583_v11, 5  ;;  %v4722_v25 = vld [vmem:[#allocation2 + $0x84] sm:$0xff] }
 0x1b8   : > { %v3265_v23 = vpop.permute.xlu0 %3264  ;;  %v5588_v58 = vpop.permute.xlu1 %3010  ;;  %v1273_v24 = vrot.slane %v1272_v14, 4  ;;  %v2760_v36 = vsel %vm4849_vm5, %v4391_v54, %v2759_v29  ;;  %v2761_v37 = vrot.slane %v2759_v29, 4  ;;  %v3422_v45 = vpack.c.b16 %v3399_v1, %v3398_v50  ;;  %v4687_v14 = vld [vmem:[#allocation2 + $0x48] sm:$0xff] }
 0x1b9   : > { %v5586_v32 = vsel %vm3658_vm13, %v3637_v10, %v3265_v23  ;;  %v1283_v39 = vrot.slane %v1282_v31, 4  ;;  %948 = vst.msk [vmem:[#allocation2 + $0xb8] sm:$0xf] %vm901_vm3, %v875_v21  ;;  %v3480_v43 = vunpack.c.l.b16 %v2760_v36  ;;  %v2160_v53 = vrot.slane %v5590_v57, 5  ;;  %v5607_v9 = vpop.permute.xlu2 %3012 }
 0x1ba   : > { %3114 = vrot.lane.b32.xlu0 %v4707_v46, %s4770_s26  ;;  %v1278_v8 = vsel %vm4860_vm8, %v1273_v24, %v1277_v17  ;;  %v2763_v55 = vsel %vm4849_vm5, %v2761_v37, %v2762_v22  ;;  %v2463_v51 = vshrl.u32 %v2216_v4, 16  ;;  %3446 = vrot.lane.b32.xlu2 %v3422_v45, %s4773_s5  ;;  %v2158_v28 = vsel %vm4849_vm5, %v4376_v38, %v2157_v48  ;;  %v694_v7 = vpop.f32.mrf.mxu3  ;;  %v1611_v37 = vld [vmem:[#allocation2 + $0x90] sm:$0xf] }
 0x1bb   : > { %v1288_v27 = vsel %vm4860_vm8, %v1283_v39, %v1287_v12  ;;  %v2890_v35 = vunpack.c.l.b16 %v1278_v8  ;;  %v3481_v34 = vunpack.c.l.b16 %v2763_v55  ;;  %v2159_v30 = vrot.slane %v2157_v48, 4  ;;  %v5632_v55 = vld [vmem:[#allocation2 + $0x98] sm:$0x1] }
 0x1bc   : > { %v2891_v59 = vunpack.c.l.b16 %v1288_v27  ;;  %v3226_v16 = vunpack.c.l.b16 %v2158_v28  ;;  %v2465_v63 = vrot.slane %v2463_v51, 4  ;;  %v2466_v40 = vshll.u32 %v2216_v4, 16 }
 0x1bd   : > { %v3503_v49 = vpack.c.b16 %v3481_v34, %v3480_v43  ;;  %v2472_v56 = vshll.u32 %v5575_v13, 16  ;;  %v2476_v0 = vshrl.u32 %v5575_v13, 16  ;;  %v2161_v33 = vsel %vm4849_vm5, %v2159_v30, %v2160_v53  ;;  %v5622_v43 = vld [vmem:[#allocation2 + $0x94] sm:$0xf] }
 0x1be   : > { %v2912_v15 = vpack.c.b16 %v2891_v59, %v2890_v35  ;;  %v2482_v3 = vshll.u32 %v2239_v26, 16  ;;  %v1878_v60 = vshrl.u32 %v1609_v20, 16  ;;  %v3227_v10 = vunpack.c.l.b16 %v2161_v33 }
 0x1bf   : > { %4635 = vmatmul.msk.bf16.gmra.mxu2 %vm3510_vm9, %v3503_v49  ;;  %v2468_v50 = vrot.slane %v2466_v40, 5  ;;  %v2474_v44 = vrot.slane %v2472_v56, 5  ;;  %v2478_v17 = vrot.slane %v2476_v0, 4  ;;  %v1881_v12 = vshll.u32 %v1609_v20, 16  ;;  %v5644_v0 = vld [vmem:[#allocation2 + $0x8c] sm:$0x1] }
 0x1c0   : > { %v3439_v52 = vpop.permute.xlu1 %3438  ;;  %2938 = vrot.lane.b32.xlu1 %v2912_v15, %s4769_s25  ;;  %v2484_v6 = vrot.slane %v2482_v3, 5  ;;  %v1880_v19 = vrot.slane %v1878_v60, 4  ;;  %v1887_v13 = vshll.u32 %v5583_v11, 16  ;;  %v3248_v54 = vpack.c.b16 %v3227_v10, %v3226_v16  ;;  %v5639_v16 = vld [vmem:[#allocation2 + $0x88] sm:$0xf] }
 0x1c1   : > { %v2469_v42 = vor.u32 %v2468_v50, %v2465_v63  ;;  %v2479_v26 = vor.u32 %v2478_v17, %v2474_v44  ;;  %v1891_v46 = vshrl.u32 %v5583_v11, 16  ;;  %v1883_v23 = vrot.slane %v1881_v12, 5  ;;  %v5634_v53 = vpop.permute.xlu2 %3440  ;;  %v1420_v15 = vld [vmem:[#allocation2 + $0x84] sm:$0xe] }
 0x1c2   : > { %v1889_v29 = vrot.slane %v1887_v13, 5  ;;  %v1897_v22 = vshll.u32 %v5590_v57, 16  ;;  %v804_v1 = vmax.f32 %v694_v7, 0.0  ;;  %3368 = vrot.lane.b32.xlu2 %v4722_v25, %s4767_s23  ;;  %v2931_v31 = vpop.permute.xlu0 %2930  ;;  %v3738_v36 = vsel %vm3724_vm15, %v5565_v62, %v3439_v52  ;;  %v2640_v52 = vld [vmem:[#allocation2 + $0x90] sm:$0xe]  ;;  %v697_v25 = vpop.f32.mrf.mxu3 }
 0x1c3   : > { %v2470_v21 = vrot.slane %v2469_v42, 4  ;;  %v2480_v4 = vrot.slane %v2479_v26, 4  ;;  %v1893_v24 = vrot.slane %v1891_v46, 4  ;;  %v3531_v38 = vsel %vm3510_vm9, %v4687_v14, %v2931_v31  ;;  %3925 = vmatmul.bf16.gmra.mxu1 %v3738_v36 }
 0x1c4   : > { %v1884_v45 = vor.u32 %v1883_v23, %v1880_v19  ;;  %v1899_v11 = vrot.slane %v1897_v22, 5  ;;  %v876_v39 = vpack.c.bf16 %v804_v1, %v804_v1  ;;  %v5626_v57 = vsel %vm3559_vm10, %v3531_v38, %v5588_v58 }
 0x1c5   : > { %v2475_v48 = vsel %vm4860_vm8, %v2470_v21, %v2474_v44  ;;  %v2485_v8 = vsel %vm4860_vm8, %v2480_v4, %v2484_v6  ;;  %v1894_v62 = vor.u32 %v1893_v24, %v1889_v29  ;;  %v1902_v34 = vshrl.u32 %v1611_v37, 16  ;;  %v2220_v4 = vld [vmem:[#allocation2 + $0x9c] sm:$0xf] }
 0x1c6   : > { %v3400_v51 = vunpack.c.l.b16 %v2475_v48  ;;  %v3401_v27 = vunpack.c.l.b16 %v2485_v8  ;;  %v1885_v35 = vrot.slane %v1884_v45, 4  ;;  %949 = vst.msk [vmem:[#allocation2 + $0xbc] sm:$0xf] %vm901_vm3, %v876_v39  ;;  %v1905_v58 = vshll.u32 %v1611_v37, 16 }
 0x1c7   : > { %v1895_v28 = vrot.slane %v1894_v62, 4  ;;  %v1911_v20 = vshll.u32 %v5622_v43, 16  ;;  %v1915_v59 = vshrl.u32 %v5622_v43, 16  ;;  %v1904_v40 = vrot.slane %v1902_v34, 4  ;;  %v5674_v62 = vld [vmem:[#allocation2 + $0xa0] sm:$0xf] }
 0x1c8   : > { %v3361_v30 = vpop.permute.xlu1 %3360  ;;  %v3423_v63 = vpack.c.b16 %v3401_v27, %v3400_v51  ;;  %v1890_v49 = vsel %vm4860_vm8, %v1885_v35, %v1889_v29  ;;  %v1921_v56 = vshll.u32 %v5632_v55, 16  ;;  %v1907_v60 = vrot.slane %v1905_v58, 5  ;;  %v2032_v35 = vld [vmem:[#allocation2 + $0x90] sm:$0xe]  ;;  %v5676_v58 = vld [vmem:[#allocation2 + $0xa4] sm:$0x1] }
 0x1c9   : > { %v1900_v33 = vsel %vm4860_vm8, %v1895_v28, %v1899_v11  ;;  %v3146_v3 = vunpack.c.l.b16 %v1890_v49  ;;  %v1913_v10 = vrot.slane %v1911_v20, 5  ;;  %v1917_v44 = vrot.slane %v1915_v59, 4  ;;  %v5669_v11 = vpop.permute.xlu2 %3362 }
 0x1ca   : > { %3448 = vrot.lane.b32.xlu0 %v3423_v63, %s4773_s5  ;;  %v3147_v50 = vunpack.c.l.b16 %v1900_v33  ;;  %v1923_v17 = vrot.slane %v1921_v56, 5  ;;  %v5651_v7 = vsel %vm3691_vm14, %v5586_v32, %v3361_v30  ;;  %3274 = vrot.lane.b32.xlu2 %v3248_v54, %s4771_s29  ;;  %v1908_v6 = vor.u32 %v1907_v60, %v1904_v40  ;;  %v4708_v56 = vld [vmem:[#allocation2 + $0x90] sm:$0xff] }
 0x1cb   : > { %v4361_v19 = vrot.slane %v1420_v15, 9  ;;  %v1555_v12 = vrot.slane %v5639_v16, 5  ;;  %v1558_v13 = vrot.slane %v5644_v0, 5  ;;  %v1918_v26 = vor.u32 %v1917_v44, %v1913_v10  ;;  %v699_v44 = vpop.f32.mrf.mxu3 }
 0x1cc   : > { %v3168_v42 = vpack.c.b16 %v3147_v50, %v3146_v3  ;;  %v805_v46 = vmax.f32 %v697_v25, 0.0  ;;  %v4392_v14 = vrot.slane %v2640_v52, 9  ;;  %v1909_v23 = vrot.slane %v1908_v6, 4  ;;  %v996_v25 = vld [vmem:[#allocation2 + $0x84] sm:$0xf] }
 0x1cd   : > { %v1556_v29 = vsel %vm4849_vm5, %v4361_v19, %v1555_v12  ;;  %v1557_v22 = vrot.slane %v1555_v12, 4  ;;  %v2766_v32 = vrot.slane %v5483_v18, 5  ;;  %v1919_v54 = vrot.slane %v1918_v26, 4 }
 0x1ce   : > { %3194 = vrot.lane.b32.xlu1 %v3168_v42, %s4772_s30  ;;  %v2972_v1 = vunpack.c.l.b16 %v1556_v29  ;;  %v877_v31 = vpack.c.bf16 %v805_v46, %v805_v46  ;;  %v2769_v21 = vrot.slane %v5490_v61, 5  ;;  %v1914_v24 = vsel %vm4860_vm8, %v1909_v23, %v1913_v10 }
 0x1cf   : > { %v1559_v36 = vsel %vm4849_vm5, %v1557_v22, %v1558_v13  ;;  %v2767_v37 = vsel %vm4849_vm5, %v4392_v14, %v2766_v32  ;;  %v2768_v38 = vrot.slane %v2766_v32, 4  ;;  %v1924_v18 = vsel %vm4860_vm8, %v1919_v54, %v1923_v17 }
 0x1d0   : > { %v3148_v45 = vunpack.c.l.b16 %v1914_v24  ;;  %v2973_v39 = vunpack.c.l.b16 %v1559_v36  ;;  %950 = vst.msk [vmem:[#allocation2 + $0xc0] sm:$0xf] %vm901_vm3, %v877_v31  ;;  %v3482_v61 = vunpack.c.l.b16 %v2767_v37  ;;  %v3149_v48 = vunpack.c.l.b16 %v1924_v18  ;;  %v3267_v14 = vpop.permute.xlu1 %3266  ;;  %v1018_v24 = vld [vmem:[#allocation2 + $0x98] sm:$0x1] }
 0x1d1   : > { %v2770_v8 = vsel %vm4849_vm5, %v2768_v38, %v2769_v21  ;;  %v2511_v51 = vshrl.u32 %v2220_v4, 16  ;;  %v2514_v27 = vshll.u32 %v2220_v4, 16  ;;  %v2520_v20 = vshll.u32 %v5674_v62, 16  ;;  %v3187_v17 = vpop.permute.xlu0 %3186 }
 0x1d2   : > { %v2993_v34 = vpack.c.b16 %v2973_v39, %v2972_v1  ;;  %v3483_v28 = vunpack.c.l.b16 %v2770_v8  ;;  %v2524_v59 = vshrl.u32 %v5674_v62, 16  ;;  %v3169_v30 = vpack.c.b16 %v3149_v48, %v3148_v45  ;;  %v1421_v1 = vld [vmem:[#allocation2 + $0x90] sm:$0xe]  ;;  %v4724_v39 = vld [vmem:[#allocation2 + $0x9c] sm:$0xff] }
 0x1d3   : > { %v2513_v63 = vrot.slane %v2511_v51, 4  ;;  %v2516_v49 = vrot.slane %v2514_v27, 5  ;;  %v2530_v40 = vshll.u32 %v5676_v58, 16  ;;  %v2522_v33 = vrot.slane %v2520_v20, 5  ;;  %v998_v45 = vld [vmem:[#allocation2 + $0x90] sm:$0xf] }
 0x1d4   : > { %3020 = vrot.lane.b32.xlu0 %v2993_v34, %s4768_s24  ;;  %v3504_v15 = vpack.c.b16 %v3483_v28, %v3482_v61  ;;  %v2526_v3 = vrot.slane %v2524_v59, 4  ;;  %v4377_v60 = vrot.slane %v2032_v35, 9  ;;  %3196 = vrot.lane.b32.xlu2 %v3169_v30, %s4772_s30  ;;  %v2164_v52 = vrot.slane %v5622_v43, 5  ;;  %v999_v51 = vld [vmem:[#allocation2 + $0x94] sm:$0xf] }
 0x1d5   : > { %v2517_v10 = vor.u32 %v2516_v49, %v2513_v63  ;;  %v2167_v50 = vrot.slane %v5632_v55, 5  ;;  %v2532_v19 = vrot.slane %v2530_v40, 5  ;;  %v806_v12 = vmax.f32 %v699_v44, 0.0  ;;  %v702_v44 = vpop.f32.mrf.mxu3 }
 0x1d6   : > { %3116 = vrot.lane.b32.xlu1 %v4708_v56, %s4770_s26  ;;  %4636 = vmatmul.msk.bf16.gmra.mxu2 %vm3510_vm9, %v3504_v15  ;;  %v2527_v6 = vor.u32 %v2526_v3, %v2522_v33  ;;  %v3741_v13 = vsel %vm3724_vm15, %v5651_v7, %v5634_v53  ;;  %v2165_v43 = vsel %vm4849_vm5, %v4377_v60, %v2164_v52  ;;  %v2166_v26 = vrot.slane %v2164_v52, 4 }
 0x1d7   : > { %v2518_v42 = vrot.slane %v2517_v10, 4  ;;  %v3606_v55 = vsel %vm3592_vm11, %v5626_v57, %v5577_v5  ;;  %3930 = vmatmul.bf16.gmra.mxu1 %v3741_v13  ;;  %v3228_v23 = vunpack.c.l.b16 %v2165_v43  ;;  %v878_v29 = vpack.c.bf16 %v806_v12, %v806_v12  ;;  %v5702_v57 = vpop.permute.xlu2 %3268 }
 0x1d8   : > { %v2528_v46 = vrot.slane %v2527_v6, 4  ;;  %v3639_v22 = vsel %vm3625_vm12, %v3606_v55, %v3187_v17  ;;  %v2168_v7 = vsel %vm4849_vm5, %v2166_v26, %v2167_v50  ;;  %v1290_v32 = vshrl.u32 %v996_v25, 16  ;;  %v4688_v26 = vld [vmem:[#allocation2 + $0x54] sm:$0xff] }
 0x1d9   : > { %v2523_v53 = vsel %vm4860_vm8, %v2518_v42, %v2522_v33  ;;  %v1293_v54 = vshll.u32 %v996_v25, 16  ;;  %v3229_v21 = vunpack.c.l.b16 %v2168_v7  ;;  %951 = vst.msk [vmem:[#allocation2 + $0xc4] sm:$0xf] %vm901_vm3, %v878_v29  ;;  %v1299_v4 = vshll.u32 %v5639_v16, 16  ;;  %v2641_v25 = vld [vmem:[#allocation2 + $0x9c] sm:$0xe] }
 0x1da   : > { %v2533_v31 = vsel %vm4860_vm8, %v2528_v46, %v2532_v19  ;;  %v3404_v5 = vunpack.c.l.b16 %v2523_v53  ;;  %v1292_v37 = vrot.slane %v1290_v32, 4  ;;  %v1303_v18 = vshrl.u32 %v5639_v16, 16  ;;  %v4689_v29 = vld [vmem:[#allocation2 + $0x60] sm:$0xff] }
 0x1db   : > { %v3405_v36 = vunpack.c.l.b16 %v2533_v31  ;;  %v1295_v38 = vrot.slane %v1293_v54, 5  ;;  %v3249_v61 = vpack.c.b16 %v3229_v21, %v3228_v23  ;;  %v1301_v48 = vrot.slane %v1299_v4, 5  ;;  %v5725_v54 = vld [vmem:[%s6154_s3] ss:$0 sm:$0xff] }
 0x1dc   : > { %v1309_v8 = vshll.u32 %v5644_v0, 16  ;;  %v4362_v27 = vrot.slane %v1421_v1, 9  ;;  %v1305_v28 = vrot.slane %v1303_v18, 4  ;;  %v1562_v20 = vrot.slane %v999_v51, 5  ;;  %v2933_v6 = vpop.permute.xlu1 %2932  ;;  %v1614_v4 = vld [vmem:[#allocation2 + $0xa0] sm:$0xf] }
 0x1dd   : > { %v3425_v35 = vpack.c.b16 %v3405_v36, %v3404_v5  ;;  %v1296_v34 = vor.u32 %v1295_v38, %v1292_v37  ;;  %3276 = vrot.lane.b32.xlu0 %v3249_v61, %s4771_s29  ;;  %v1565_v59 = vrot.slane %v1018_v24, 5  ;;  %v1314_v30 = vshrl.u32 %v998_v45, 16  ;;  %v2033_v36 = vld [vmem:[#allocation2 + $0x9c] sm:$0xe] }
 0x1de   : > { %3372 = vrot.lane.b32.xlu1 %v4724_v39, %s4767_s23  ;;  %v1317_v63 = vshll.u32 %v998_v45, 16  ;;  %v5712_v16 = vsel %vm3658_vm13, %v3639_v22, %v3267_v14  ;;  %v1306_v0 = vor.u32 %v1305_v28, %v1301_v48  ;;  %v1311_v40 = vrot.slane %v1309_v8, 5  ;;  %v1633_v39 = vld [vmem:[#allocation2 + $0xa4] sm:$0x1]  ;;  %v1613_v61 = vld [vmem:[#allocation2 + $0x9c] sm:$0xf] }
 0x1df   : > { %3452 = vrot.lane.b32.xlu2 %v3425_v35, %s4773_s5  ;;  %v1297_v49 = vrot.slane %v1296_v34, 4  ;;  %v1563_v56 = vsel %vm4849_vm5, %v4362_v27, %v1562_v20  ;;  %v1564_v15 = vrot.slane %v1562_v20, 4  ;;  %v1316_v33 = vrot.slane %v1314_v30, 4  ;;  %v3906_v42 = vpop.f32.mrf.mxu1  ;;  %v2935_v22 = vpop.permute.xlu2 %2934 }
 0x1e0   : > { %v1319_v3 = vrot.slane %v1317_v63, 5  ;;  %v1307_v10 = vrot.slane %v1306_v0, 4  ;;  %v2974_v52 = vunpack.c.l.b16 %v1563_v56  ;;  %v1323_v50 = vshll.u32 %v999_v51, 16 }
 0x1e1   : > { %v1302_v60 = vsel %vm4860_vm8, %v1297_v49, %v1301_v48  ;;  %v1566_v19 = vsel %vm4849_vm5, %v1564_v15, %v1565_v59  ;;  %v1327_v13 = vshrl.u32 %v999_v51, 16  ;;  %v1333_v14 = vshll.u32 %v1018_v24, 16  ;;  %v3995_v24 = vpop.f32.mrf.mxu2 }
 0x1e2   : > { %v2892_v17 = vunpack.c.l.b16 %v1302_v60  ;;  %v1320_v12 = vor.u32 %v1319_v3, %v1316_v33  ;;  %v1312_v43 = vsel %vm4860_vm8, %v1307_v10, %v1311_v40  ;;  %v2975_v55 = vunpack.c.l.b16 %v1566_v19 }
 0x1e3   : > { %v1325_v46 = vrot.slane %v1323_v50, 5  ;;  %v2893_v23 = vunpack.c.l.b16 %v1312_v43  ;;  %v1329_v7 = vrot.slane %v1327_v13, 4  ;;  %v807_v32 = vmax.f32 %v702_v44, 0.0  ;;  %v704_v44 = vpop.f32.mrf.mxu3  ;;  %v4709_v43 = vld [vmem:[#allocation2 + $0x9c] sm:$0xff] }
 0x1e4   : > { %v1321_v53 = vrot.slane %v1320_v12, 4  ;;  %v3534_v1 = vsel %vm3510_vm9, %v4688_v26, %v2933_v6  ;;  %v2994_v31 = vpack.c.b16 %v2975_v55, %v2974_v52  ;;  %v1335_v5 = vrot.slane %v1333_v14, 5 }
 0x1e5   : > { %v4393_v21 = vrot.slane %v2641_v25, 9  ;;  %v2913_v37 = vpack.c.b16 %v2893_v23, %v2892_v17  ;;  %v1330_v18 = vor.u32 %v1329_v7, %v1325_v46  ;;  %v879_v45 = vpack.c.bf16 %v807_v32, %v807_v32  ;;  %v1000_v25 = vld [vmem:[#allocation2 + $0x9c] sm:$0xf]  ;;  %v3109_v7 = vpop.permute.xlu0 %3108 }
 0x1e6   : > { %v1326_v38 = vsel %vm4860_vm8, %v1321_v53, %v1325_v46  ;;  %v5732_v48 = vsel %vm3510_vm9, %v4689_v29, %v2935_v22  ;;  %3022 = vrot.lane.b32.xlu1 %v2994_v31, %s4768_s24  ;;  %v2773_v51 = vrot.slane %v5674_v62, 5  ;;  %v2776_v27 = vrot.slane %v5676_v58, 5 }
 0x1e7   : > { %v2894_v8 = vunpack.c.l.b16 %v1326_v38  ;;  %2940 = vrot.lane.b32.xlu2 %v2913_v37, %s4769_s25  ;;  %v1331_v35 = vrot.slane %v1330_v18, 4  ;;  %952 = vst.msk [vmem:[#allocation2 + $0xc8] sm:$0xf] %vm901_vm3, %v879_v45  ;;  %v3907_v34 = vadd.f32 %v5725_v54, %v3906_v42  ;;  %v4378_v28 = vrot.slane %v2033_v36, 9  ;;  %v3908_v17 = vpop.f32.mrf.mxu1 }
 0x1e8   : > { %v2171_v20 = vrot.slane %v1614_v4, 5  ;;  %v2774_v59 = vsel %vm4849_vm5, %v4393_v21, %v2773_v51  ;;  %v2775_v30 = vrot.slane %v2773_v51, 4  ;;  %v2174_v62 = vrot.slane %v1633_v39, 5 }
 0x1e9   : > { %v1926_v58 = vshrl.u32 %v1613_v61, 16  ;;  %v1336_v63 = vsel %vm4860_vm8, %v1331_v35, %v1335_v5  ;;  %v3484_v49 = vunpack.c.l.b16 %v2774_v59  ;;  %v3996_v0 = vadd.f32 %v3995_v24, %v3907_v34  ;;  %v3997_v53 = vpop.f32.mrf.mxu2 }
 0x1ea   : > { %v2172_v40 = vsel %vm4849_vm5, %v4378_v28, %v2171_v20  ;;  %v2895_v56 = vunpack.c.l.b16 %v1336_v63  ;;  %v2777_v15 = vsel %vm4849_vm5, %v2775_v30, %v2776_v27  ;;  %v2173_v33 = vrot.slane %v2171_v20, 4  ;;  %v2242_v30 = vld [vmem:[#allocation2 + $0xb0] sm:$0x1] }
 0x1eb   : > { %v3230_v3 = vunpack.c.l.b16 %v2172_v40  ;;  %v3485_v60 = vunpack.c.l.b16 %v2777_v15  ;;  %4075 = vst.msk [vmem:[%s5745_s10] sm:$0xff] %vm3625_vm12, %v3996_v0  ;;  %v1928_v10 = vrot.slane %v1926_v58, 4  ;;  %v1929_v52 = vshll.u32 %v1613_v61, 16 }
 0x1ec   : > { %v1935_v50 = vshll.u32 %v1614_v4, 16  ;;  %v2914_v6 = vpack.c.b16 %v2895_v56, %v2894_v8  ;;  %v2175_v19 = vsel %vm4849_vm5, %v2173_v33, %v2174_v62  ;;  %v1939_v12 = vshrl.u32 %v1614_v4, 16  ;;  %v2222_v4 = vld [vmem:[#allocation2 + $0xa8] sm:$0xf]  ;;  %v2223_v8 = vld [vmem:[#allocation2 + $0xac] sm:$0xf] }
 0x1ed   : > { %v1945_v13 = vshll.u32 %v1633_v39, 16  ;;  %v3505_v42 = vpack.c.b16 %v3485_v60, %v3484_v49  ;;  %v3231_v26 = vunpack.c.l.b16 %v2175_v19  ;;  %v1931_v55 = vrot.slane %v1929_v52, 5  ;;  %v4725_v56 = vld [vmem:[#allocation2 + $0xa8] sm:$0xff]  ;;  %v707_v60 = vpop.f32.mrf.mxu3  ;;  %v5782_v19 = vpop.permute.xlu0 %3014 }
 0x1ee   : > { %v1937_v46 = vrot.slane %v1935_v50, 5  ;;  %2942 = vrot.lane.b32.xlu0 %v2914_v6, %s4769_s25  ;;  %v3575_v14 = vsel %vm3559_vm10, %v3534_v1, %v5607_v9  ;;  %v1941_v23 = vrot.slane %v1939_v12, 4  ;;  %v808_v29 = vmax.f32 %v704_v44, 0.0  ;;  %v5763_v9 = vld [vmem:[#allocation2 + $0xa0] sm:$0xf] }
 0x1ef   : > { %v3909_v22 = vadd.f32 %v5725_v54, %v3908_v17  ;;  %4637 = vmatmul.msk.bf16.gmra.mxu2 %vm3510_vm9, %v3505_v42  ;;  %3118 = vrot.lane.b32.xlu2 %v4709_v43, %s4770_s26  ;;  %v3250_v32 = vpack.c.b16 %v3231_v26, %v3230_v3  ;;  %v1932_v31 = vor.u32 %v1931_v55, %v1928_v10  ;;  %v1947_v5 = vrot.slane %v1945_v13, 5  ;;  %v5765_v1 = vld [vmem:[#allocation2 + $0xa4] sm:$0x1] }
 0x1f0   : > { %v1338_v21 = vshrl.u32 %v1000_v25, 16  ;;  %v1942_v36 = vor.u32 %v1941_v23, %v1937_v46  ;;  %v880_v24 = vpack.c.bf16 %v808_v29, %v808_v29  ;;  %v1341_v38 = vshll.u32 %v1000_v25, 16  ;;  %v2642_v25 = vld [vmem:[#allocation2 + $0xa8] sm:$0xe]  ;;  %v1422_v23 = vld [vmem:[#allocation2 + $0x9c] sm:$0xe] }
 0x1f1   : > { %v3998_v37 = vadd.f32 %v3997_v53, %v3909_v22  ;;  %3278 = vrot.lane.b32.xlu1 %v3250_v32, %s4771_s29  ;;  %v1933_v18 = vrot.slane %v1932_v31, 4  ;;  %v1347_v39 = vshll.u32 %v5763_v9, 16  ;;  %v1351_v61 = vshrl.u32 %v5763_v9, 16 }
 0x1f2   : > { %v1340_v45 = vrot.slane %v1338_v21, 4  ;;  %v1943_v51 = vrot.slane %v1942_v36, 4  ;;  %953 = vst.msk [vmem:[#allocation2 + $0xcc] sm:$0xf] %vm901_vm3, %v880_v24  ;;  %v1343_v27 = vrot.slane %v1341_v38, 5  ;;  %v1357_v35 = vshll.u32 %v5765_v1, 16 }
 0x1f3   : > { %v2535_v34 = vshrl.u32 %v2222_v4, 16  ;;  %v1938_v28 = vsel %vm4860_vm8, %v1933_v18, %v1937_v46  ;;  %4076 = vst.msk [vmem:[%s5745_s10 + $0x8] sm:$0xff] %vm3625_vm12, %v3998_v37  ;;  %v1349_v20 = vrot.slane %v1347_v39, 5  ;;  %v1353_v59 = vrot.slane %v1351_v61, 4  ;;  %v5786_v46 = vpop.permute.xlu1 %3188  ;;  %v1615_v21 = vld [vmem:[#allocation2 + $0xa8] sm:$0xf] }
 0x1f4   : > { %v2538_v62 = vshll.u32 %v2222_v4, 16  ;;  %v1948_v58 = vsel %vm4860_vm8, %v1943_v51, %v1947_v5  ;;  %v3150_v63 = vunpack.c.l.b16 %v1938_v28  ;;  %v1344_v49 = vor.u32 %v1343_v27, %v1340_v45  ;;  %v5794_v61 = vld [vmem:[#allocation2 + $0xac] sm:$0xf] }
 0x1f5   : > { %v1359_v0 = vrot.slane %v1357_v35, 5  ;;  %v3151_v40 = vunpack.c.l.b16 %v1948_v58  ;;  %v1354_v15 = vor.u32 %v1353_v59, %v1349_v20  ;;  %v2537_v33 = vrot.slane %v2535_v34, 4  ;;  %v5805_v59 = vld [vmem:[#allocation2 + $0xb0] sm:$0x1] }
 0x1f6   : > { %v2540_v3 = vrot.slane %v2538_v62, 5  ;;  %v1345_v10 = vrot.slane %v1344_v49, 4  ;;  %v2544_v52 = vshll.u32 %v2223_v8, 16  ;;  %v2548_v50 = vshrl.u32 %v2223_v8, 16  ;;  %v4672_v49 = vld [vmem:[%s4817_s22 + $0xd8] sm:$0xff] }
 0x1f7   : > { %v2554_v44 = vshll.u32 %v2242_v30, 16  ;;  %v5779_v17 = vsel %vm3592_vm11, %v3575_v14, %v3109_v7  ;;  %v3170_v6 = vpack.c.b16 %v3151_v40, %v3150_v63  ;;  %3374 = vrot.lane.b32.xlu2 %v4725_v56, %s4767_s23  ;;  %v1355_v12 = vrot.slane %v1354_v15, 4  ;;  %4341 = vmatmul.msk.bf16.gmra.mxu3 %vm452_vm2, %v4672_v49 }
 0x1f8   : > { %v2541_v13 = vor.u32 %v2540_v3, %v2537_v33  ;;  %v1350_v42 = vsel %vm4860_vm8, %v1345_v10, %v1349_v20  ;;  %v2546_v43 = vrot.slane %v2544_v52, 5  ;;  %v2550_v26 = vrot.slane %v2548_v50, 4 }
 0x1f9   : > { %v2783_v55 = vrot.slane %v2242_v30, 5  ;;  %3198 = vrot.lane.b32.xlu0 %v3170_v6, %s4772_s30  ;;  %v1360_v14 = vsel %vm4860_vm8, %v1355_v12, %v1359_v0  ;;  %v2896_v29 = vunpack.c.l.b16 %v1350_v42  ;;  %v809_v53 = vmax.f32 %v707_v60, 0.0  ;;  %v3443_v60 = vpop.permute.xlu0 %3442 }
 0x1fa   : > { %v2542_v22 = vrot.slane %v2541_v13, 4  ;;  %v2897_v7 = vunpack.c.l.b16 %v1360_v14  ;;  %v2551_v32 = vor.u32 %v2550_v26, %v2546_v43  ;;  %v2556_v31 = vrot.slane %v2554_v44, 5  ;;  %v2224_v14 = vld [vmem:[#allocation2 + $0xb4] sm:$0xf] }
 0x1fb   : > { %v4394_v5 = vrot.slane %v2642_v25, 9  ;;  %v881_v36 = vpack.c.bf16 %v809_v53, %v809_v53  ;;  %v2780_v24 = vrot.slane %v2223_v8, 5  ;;  %v4363_v37 = vrot.slane %v1422_v23, 9  ;;  %v3111_v13 = vpop.permute.xlu1 %3110  ;;  %v2034_v25 = vld [vmem:[#allocation2 + $0xa8] sm:$0xe]  ;;  %v3911_v23 = vpop.f32.mrf.mxu1 }
 0x1fc   : > { %v2547_v4 = vsel %vm4860_vm8, %v2542_v22, %v2546_v43  ;;  %v2915_v38 = vpack.c.b16 %v2897_v7, %v2896_v29  ;;  %v2552_v18 = vrot.slane %v2551_v32, 4  ;;  %v1569_v39 = vrot.slane %v5763_v9, 5  ;;  %v5825_v32 = vpop.permute.xlu2 %3190 }
 0x1fd   : > { %v3406_v45 = vunpack.c.l.b16 %v2547_v4  ;;  %954 = vst.msk [vmem:[#allocation2 + $0xd0] sm:$0xf] %vm901_vm3, %v881_v36  ;;  %v2781_v51 = vsel %vm4849_vm5, %v4394_v5, %v2780_v24  ;;  %v2782_v27 = vrot.slane %v2780_v24, 4  ;;  %v1572_v35 = vrot.slane %v5765_v1, 5  ;;  %v709_v1 = vpop.f32.mrf.mxu3  ;;  %v4000_v36 = vpop.f32.mrf.mxu2 }
 0x1fe   : > { %v1950_v34 = vshrl.u32 %v1615_v21, 16  ;;  %2944 = vrot.lane.b32.xlu1 %v2915_v38, %s4769_s25  ;;  %v2557_v8 = vsel %vm4860_vm8, %v2552_v18, %v2556_v31  ;;  %v3486_v28 = vunpack.c.l.b16 %v2781_v51  ;;  %v1570_v9 = vsel %vm4849_vm5, %v4363_v37, %v1569_v39  ;;  %v2643_v51 = vld [vmem:[#allocation2 + $0xb4] sm:$0xe] }
 0x1ff   : > { %v1571_v20 = vrot.slane %v1569_v39, 4  ;;  %v3407_v30 = vunpack.c.l.b16 %v2557_v8  ;;  %v2784_v62 = vsel %vm4849_vm5, %v2782_v27, %v2783_v55  ;;  %v2976_v58 = vunpack.c.l.b16 %v1570_v9  ;;  %v2243_v39 = vld [vmem:[#allocation2 + $0xbc] sm:$0x1] }
 0x200   : > { %v1952_v63 = vrot.slane %v1950_v34, 4  ;;  %v3487_v0 = vunpack.c.l.b16 %v2784_v62  ;;  %v1953_v56 = vshll.u32 %v1615_v21, 16  ;;  %v1959_v15 = vshll.u32 %v5794_v61, 16  ;;  %v4710_v34 = vld [vmem:[#allocation2 + $0xa8] sm:$0xff] }
 0x201   : > { %v1573_v40 = vsel %vm4849_vm5, %v1571_v20, %v1572_v35  ;;  %v3426_v33 = vpack.c.b16 %v3407_v30, %v3406_v45  ;;  %v1963_v10 = vshrl.u32 %v5794_v61, 16  ;;  %v1969_v52 = vshll.u32 %v5805_v59, 16 }
 0x202   : > { %v2977_v3 = vunpack.c.l.b16 %v1573_v40  ;;  %v3506_v50 = vpack.c.b16 %v3487_v0, %v3486_v28  ;;  %v1955_v44 = vrot.slane %v1953_v56, 5  ;;  %v1961_v6 = vrot.slane %v1959_v15, 5  ;;  %v2225_v28 = vld [vmem:[#allocation2 + $0xb8] sm:$0xf]  ;;  %v5853_v56 = vld [vmem:[#allocation2 + $0xac] sm:$0xf] }
 0x203   : > { %v810_v12 = vmax.f32 %v709_v1, 0.0  ;;  %v3577_v42 = vsel %vm3559_vm10, %v5732_v48, %v5782_v19  ;;  %3454 = vrot.lane.b32.xlu0 %v3426_v33, %s4773_s5  ;;  %v1965_v26 = vrot.slane %v1963_v10, 4  ;;  %v3705_v55 = vsel %vm3691_vm14, %v5712_v16, %v5669_v11 }
 0x204   : > { %v2995_v43 = vpack.c.b16 %v2977_v3, %v2976_v58  ;;  %4638 = vmatmul.msk.bf16.gmra.mxu2 %vm3510_vm9, %v3506_v50  ;;  %v1956_v29 = vor.u32 %v1955_v44, %v1952_v63  ;;  %v1971_v22 = vrot.slane %v1969_v52, 5  ;;  %v3744_v7 = vsel %vm3724_vm15, %v3705_v55, %v3443_v60  ;;  %v1002_v58 = vld [vmem:[#allocation2 + $0xa8] sm:$0xf]  ;;  %v5850_v63 = vpop.permute.xlu1 %3016  ;;  %v3365_v55 = vpop.permute.xlu0 %3364 }
 0x205   : > { %v882_v53 = vpack.c.bf16 %v810_v12, %v810_v12  ;;  %v1966_v48 = vor.u32 %v1965_v26, %v1961_v6  ;;  %3935 = vmatmul.bf16.gmra.mxu1 %v3744_v7  ;;  %v4379_v19 = vrot.slane %v2034_v25, 9  ;;  %v2178_v31 = vrot.slane %v5794_v61, 5  ;;  %v5861_v26 = vpop.permute.xlu2 %3112 }
 0x206   : > { %3024 = vrot.lane.b32.xlu2 %v2995_v43, %s4768_s24  ;;  %v2181_v11 = vrot.slane %v5805_v59, 5  ;;  %v5833_v16 = vsel %vm3625_vm12, %v5779_v17, %v5786_v46  ;;  %v1957_v5 = vrot.slane %v1956_v29, 4  ;;  %v3912_v21 = vadd.f32 %v5725_v54, %v3911_v23 }
 0x207   : > { %955 = vst.msk [vmem:[#allocation2 + $0xd4] sm:$0xf] %vm901_vm3, %v882_v53  ;;  %v2559_v4 = vshrl.u32 %v2224_v14, 16  ;;  %v1967_v24 = vrot.slane %v1966_v48, 4  ;;  %v5838_v37 = vsel %vm3592_vm11, %v3577_v42, %v3111_v13  ;;  %v2179_v38 = vsel %vm4849_vm5, %v4379_v19, %v2178_v31  ;;  %v5857_v13 = vld [vmem:[#allocation2 + $0xb0] sm:$0x1] }
 0x208   : > { %v2180_v18 = vrot.slane %v2178_v31, 4  ;;  %v1962_v17 = vsel %vm4860_vm8, %v1957_v5, %v1961_v6  ;;  %v3232_v46 = vunpack.c.l.b16 %v2179_v38  ;;  %v4001_v45 = vadd.f32 %v4000_v36, %v3912_v21  ;;  %v3913_v6 = vpop.f32.mrf.mxu1  ;;  %v1423_v36 = vld [vmem:[#allocation2 + $0xa8] sm:$0xe] }
 0x209   : > { %v2561_v61 = vrot.slane %v2559_v4, 4  ;;  %v1972_v27 = vsel %vm4860_vm8, %v1967_v24, %v1971_v22  ;;  %v3152_v35 = vunpack.c.l.b16 %v1962_v17  ;;  %v2562_v9 = vshll.u32 %v2224_v14, 16 }
 0x20a   : > { %v2182_v8 = vsel %vm4849_vm5, %v2180_v18, %v2181_v11  ;;  %v3153_v20 = vunpack.c.l.b16 %v1972_v27  ;;  %4077 = vst.msk [vmem:[%s5745_s10 + $0x10] sm:$0xff] %vm3625_vm12, %v4001_v45  ;;  %v2568_v30 = vshll.u32 %v2225_v28, 16  ;;  %v2572_v62 = vshrl.u32 %v2225_v28, 16  ;;  %v4726_v11 = vld [vmem:[#allocation2 + $0xb4] sm:$0xff] }
 0x20b   : > { %v3233_v59 = vunpack.c.l.b16 %v2182_v8  ;;  %3120 = vrot.lane.b32.xlu0 %v4710_v34, %s4770_s26  ;;  %v2564_v1 = vrot.slane %v2562_v9, 5  ;;  %v2578_v49 = vshll.u32 %v2243_v39, 16  ;;  %v2790_v0 = vrot.slane %v2243_v39, 5  ;;  %v1617_v27 = vld [vmem:[#allocation2 + $0xb4] sm:$0xf] }
 0x20c   : > { %v4395_v40 = vrot.slane %v2643_v51, 9  ;;  %v3171_v15 = vpack.c.b16 %v3153_v20, %v3152_v35  ;;  %v2570_v3 = vrot.slane %v2568_v30, 5  ;;  %v2574_v60 = vrot.slane %v2572_v62, 4  ;;  %v3445_v9 = vpop.permute.xlu1 %3444 }
 0x20d   : > { %v3251_v33 = vpack.c.b16 %v3233_v59, %v3232_v46  ;;  %v2565_v10 = vor.u32 %v2564_v1, %v2561_v61  ;;  %v2580_v52 = vrot.slane %v2578_v49, 5  ;;  %v2787_v50 = vrot.slane %v2225_v28, 5  ;;  %v4002_v46 = vpop.f32.mrf.mxu2 }
 0x20e   : > { %v1362_v44 = vshrl.u32 %v1002_v58, 16  ;;  %3200 = vrot.lane.b32.xlu1 %v3171_v15, %s4772_s30  ;;  %v2575_v12 = vor.u32 %v2574_v60, %v2570_v3  ;;  %v1365_v25 = vshll.u32 %v1002_v58, 16  ;;  %v1371_v42 = vshll.u32 %v5853_v56, 16  ;;  %v5888_v15 = vpop.permute.xlu2 %3018 }
 0x20f   : > { %3280 = vrot.lane.b32.xlu2 %v3251_v33, %s4771_s29  ;;  %v1375_v43 = vshrl.u32 %v5853_v56, 16  ;;  %v2566_v23 = vrot.slane %v2565_v10, 4  ;;  %v2788_v14 = vsel %vm4849_vm5, %v4395_v40, %v2787_v50  ;;  %v2789_v29 = vrot.slane %v2787_v50, 4  ;;  %v1635_v50 = vld [vmem:[#allocation2 + $0xbc] sm:$0x1] }
 0x210   : > { %v1364_v22 = vrot.slane %v1362_v44, 4  ;;  %v2576_v53 = vrot.slane %v2575_v12, 4  ;;  %v3488_v7 = vunpack.c.l.b16 %v2788_v14  ;;  %v1367_v48 = vrot.slane %v1365_v25, 5  ;;  %v3916_v60 = vpop.f32.mrf.mxu1  ;;  %v3271_v12 = vpop.permute.xlu0 %3270 }
 0x211   : > { %v1373_v19 = vrot.slane %v1371_v42, 5  ;;  %v2571_v31 = vsel %vm4860_vm8, %v2566_v23, %v2570_v3  ;;  %v2791_v5 = vsel %vm4849_vm5, %v2789_v29, %v2790_v0  ;;  %v1377_v21 = vrot.slane %v1375_v43, 4 }
 0x212   : > { %v1381_v4 = vshll.u32 %v5857_v13, 16  ;;  %v2581_v24 = vsel %vm4860_vm8, %v2576_v53, %v2580_v52  ;;  %v3408_v38 = vunpack.c.l.b16 %v2571_v31  ;;  %v3489_v18 = vunpack.c.l.b16 %v2791_v5 }
 0x213   : > { %v1368_v17 = vor.u32 %v1367_v48, %v1364_v22  ;;  %v3409_v45 = vunpack.c.l.b16 %v2581_v24  ;;  %3376 = vrot.lane.b32.xlu0 %v4726_v11, %s4767_s23  ;;  %v1378_v39 = vor.u32 %v1377_v21, %v1373_v19  ;;  %v3914_v51 = vadd.f32 %v5725_v54, %v3913_v6  ;;  %v4673_v6 = vld [vmem:[%s4817_s22 + $0xe0] sm:$0xff]  ;;  %v4711_v24 = vld [vmem:[#allocation2 + $0xb4] sm:$0xff] }
 0x214   : > { %v1383_v61 = vrot.slane %v1381_v4, 5  ;;  %v3674_v35 = vsel %vm3658_vm13, %v5833_v16, %v5702_v57  ;;  %v3507_v34 = vpack.c.b16 %v3489_v18, %v3488_v7  ;;  %v4364_v28 = vrot.slane %v1423_v36, 9  ;;  %v1618_v57 = vld [vmem:[#allocation2 + $0xb8] sm:$0xf]  ;;  %4342 = vmatmul.msk.bf16.gmra.mxu3 %vm452_vm2, %v4673_v6  ;;  %v2644_v11 = vld [vmem:[#allocation2 + $0xc0] sm:$0xe] }
 0x215   : > { %v1369_v8 = vrot.slane %v1368_v17, 4  ;;  %v3707_v20 = vsel %vm3691_vm14, %v3674_v35, %v3365_v55  ;;  %v3427_v59 = vpack.c.b16 %v3409_v45, %v3408_v38  ;;  %v1379_v30 = vrot.slane %v1378_v39, 4  ;;  %v2035_v55 = vld [vmem:[#allocation2 + $0xb4] sm:$0xe]  ;;  %v4005_v53 = vpop.f32.mrf.mxu2  ;;  %v2227_v45 = vld [vmem:[#allocation2 + $0xc4] sm:$0xf] }
 0x216   : > { %v4003_v62 = vadd.f32 %v4002_v46, %v3914_v51  ;;  %4639 = vmatmul.msk.bf16.gmra.mxu2 %vm3510_vm9, %v3507_v34  ;;  %v1576_v1 = vrot.slane %v5853_v56, 5  ;;  %v1579_v49 = vrot.slane %v5857_v13, 5  ;;  %v1974_v16 = vshrl.u32 %v1617_v27, 16  ;;  %v2244_v39 = vld [vmem:[#allocation2 + $0xc8] sm:$0x1] }
 0x217   : > { %v1374_v58 = vsel %vm4860_vm8, %v1369_v8, %v1373_v19  ;;  %3456 = vrot.lane.b32.xlu1 %v3427_v59, %s4773_s5  ;;  %v1384_v0 = vsel %vm4860_vm8, %v1379_v30, %v1383_v61  ;;  %v1977_v33 = vshll.u32 %v1617_v27, 16  ;;  %v1983_v3 = vshll.u32 %v1618_v57, 16  ;;  %v2226_v59 = vld [vmem:[#allocation2 + $0xc0] sm:$0xf]  ;;  %v1424_v6 = vld [vmem:[#allocation2 + $0xb4] sm:$0xe] }
 0x218   : > { %v2898_v40 = vunpack.c.l.b16 %v1374_v58  ;;  %4078 = vst.msk [vmem:[%s5745_s10 + $0x18] sm:$0xff] %vm3625_vm12, %v4003_v62  ;;  %v2899_v10 = vunpack.c.l.b16 %v1384_v0  ;;  %v1577_v56 = vsel %vm4849_vm5, %v4364_v28, %v1576_v1  ;;  %v1578_v52 = vrot.slane %v1576_v1, 4  ;;  %v5907_v27 = vpop.permute.xlu1 %3450  ;;  %v5919_v1 = vpop.permute.xlu2 %3446 }
 0x219   : > { %v1976_v44 = vrot.slane %v1974_v16, 4  ;;  %v2978_v13 = vunpack.c.l.b16 %v1577_v56  ;;  %v1979_v25 = vrot.slane %v1977_v33, 5  ;;  %v1985_v42 = vrot.slane %v1983_v3, 5 }
 0x21a   : > { %v1987_v43 = vshrl.u32 %v1618_v57, 16  ;;  %v2916_v23 = vpack.c.b16 %v2899_v10, %v2898_v40  ;;  %v1580_v14 = vsel %vm4849_vm5, %v1578_v52, %v1579_v49  ;;  %v1993_v29 = vshll.u32 %v1635_v50, 16 }
 0x21b   : > { %v3917_v22 = vadd.f32 %v5725_v54, %v3916_v60  ;;  %v3643_v7 = vsel %vm3625_vm12, %v5838_v37, %v5825_v32  ;;  %v2979_v48 = vunpack.c.l.b16 %v1580_v14  ;;  %v1980_v19 = vor.u32 %v1979_v25, %v1976_v44  ;;  %v1005_v60 = vld [vmem:[#allocation2 + $0xb8] sm:$0xf]  ;;  %v3918_v44 = vpop.f32.mrf.mxu1  ;;  %v4727_v14 = vld [vmem:[#allocation2 + $0xc0] sm:$0xff] }
 0x21c   : > { %v1989_v31 = vrot.slane %v1987_v43, 4  ;;  %2946 = vrot.lane.b32.xlu2 %v2916_v23, %s4769_s25  ;;  %v5902_v5 = vsel %vm3658_vm13, %v3643_v7, %v3271_v12  ;;  %v1995_v21 = vrot.slane %v1993_v29, 5  ;;  %v4380_v36 = vrot.slane %v2035_v55, 9  ;;  %v1021_v43 = vld [vmem:[#allocation2 + $0xbc] sm:$0x1] }
 0x21d   : > { %v4006_v4 = vadd.f32 %v4005_v53, %v3917_v22  ;;  %v2996_v38 = vpack.c.b16 %v2979_v48, %v2978_v13  ;;  %v1981_v18 = vrot.slane %v1980_v19, 4  ;;  %v2185_v46 = vrot.slane %v1618_v57, 5  ;;  %v1004_v55 = vld [vmem:[#allocation2 + $0xb4] sm:$0xf]  ;;  %v4007_v23 = vpop.f32.mrf.mxu2  ;;  %v5926_v48 = vpop.permute.xlu0 %2936 }
 0x21e   : > { %v1990_v17 = vor.u32 %v1989_v31, %v1985_v42  ;;  %v2188_v32 = vrot.slane %v1635_v50, 5  ;;  %v3747_v37 = vsel %vm3724_vm15, %v3707_v20, %v3445_v9  ;;  %v4396_v61 = vrot.slane %v2644_v11, 9 }
 0x21f   : > { %4079 = vst.msk [vmem:[%s5745_s10 + $0x20] sm:$0xff] %vm3625_vm12, %v4006_v4  ;;  %v2794_v51 = vrot.slane %v2227_v45, 5  ;;  %3122 = vrot.lane.b32.xlu1 %v4711_v24, %s4770_s26  ;;  %3026 = vrot.lane.b32.xlu0 %v2996_v38, %s4768_s24  ;;  %v1986_v35 = vsel %vm4860_vm8, %v1981_v18, %v1985_v42  ;;  %v2186_v8 = vsel %vm4849_vm5, %v4380_v36, %v2185_v46  ;;  %v2187_v28 = vrot.slane %v2185_v46, 4 }
 0x220   : > { %v1991_v34 = vrot.slane %v1990_v17, 4  ;;  %v3154_v30 = vunpack.c.l.b16 %v1986_v35  ;;  %v3234_v9 = vunpack.c.l.b16 %v2186_v8  ;;  %3940 = vmatmul.bf16.gmra.mxu1 %v3747_v37  ;;  %v2797_v57 = vrot.slane %v2244_v39, 5  ;;  %v4674_v37 = vld [vmem:[%s4817_s22 + $0xe8] sm:$0xff] }
 0x221   : > { %v2795_v20 = vsel %vm4849_vm5, %v4396_v61, %v2794_v51  ;;  %v2796_v62 = vrot.slane %v2794_v51, 4  ;;  %v2189_v49 = vsel %vm4849_vm5, %v2187_v28, %v2188_v32  ;;  %v2583_v33 = vshrl.u32 %v2226_v59, 16  ;;  %v3367_v32 = vpop.permute.xlu1 %3366 }
 0x222   : > { %v1996_v58 = vsel %vm4860_vm8, %v1991_v34, %v1995_v21  ;;  %v3490_v16 = vunpack.c.l.b16 %v2795_v20  ;;  %v3235_v40 = vunpack.c.l.b16 %v2189_v49  ;;  %v2586_v3 = vshll.u32 %v2226_v59, 16  ;;  %v5944_v20 = vpop.permute.xlu2 %3368  ;;  %v2036_v49 = vld [vmem:[#allocation2 + $0xc0] sm:$0xe] }
 0x223   : > { %v3155_v0 = vunpack.c.l.b16 %v1996_v58  ;;  %v2798_v10 = vsel %vm4849_vm5, %v2796_v62, %v2797_v57  ;;  %v2592_v56 = vshll.u32 %v2227_v45, 16  ;;  %v2596_v52 = vshrl.u32 %v2227_v45, 16 }
 0x224   : > { %v2602_v50 = vshll.u32 %v2244_v39, 16  ;;  %v3252_v13 = vpack.c.b16 %v3235_v40, %v3234_v9  ;;  %v3491_v25 = vunpack.c.l.b16 %v2798_v10  ;;  %v2585_v42 = vrot.slane %v2583_v33, 4  ;;  %4343 = vmatmul.msk.bf16.gmra.mxu3 %vm452_vm2, %v4674_v37  ;;  %v1636_v33 = vld [vmem:[#allocation2 + $0xc8] sm:$0x1] }
 0x225   : > { %v3172_v12 = vpack.c.b16 %v3155_v0, %v3154_v30  ;;  %v2588_v29 = vrot.slane %v2586_v3, 5  ;;  %v2594_v22 = vrot.slane %v2592_v56, 5  ;;  %v2598_v53 = vrot.slane %v2596_v52, 4  ;;  %v1619_v3 = vld [vmem:[#allocation2 + $0xc0] sm:$0xf] }
 0x226   : > { %v2604_v7 = vrot.slane %v2602_v50, 5  ;;  %v3508_v19 = vpack.c.b16 %v3491_v25, %v3490_v16  ;;  %v3919_v31 = vadd.f32 %v5725_v54, %v3918_v44  ;;  %v4365_v11 = vrot.slane %v1424_v6, 9  ;;  %v1620_v44 = vld [vmem:[#allocation2 + $0xc4] sm:$0xf] }
 0x227   : > { %3202 = vrot.lane.b32.xlu2 %v3172_v12, %s4772_s30  ;;  %v1583_v21 = vrot.slane %v1005_v60, 5  ;;  %3378 = vrot.lane.b32.xlu1 %v4727_v14, %s4767_s23  ;;  %v2589_v4 = vor.u32 %v2588_v29, %v2585_v42  ;;  %v2599_v36 = vor.u32 %v2598_v53, %v2594_v22  ;;  %v1586_v24 = vrot.slane %v1021_v43, 5  ;;  %v5950_v42 = vpop.permute.xlu0 %3192 }
 0x228   : > { %3282 = vrot.lane.b32.xlu0 %v3252_v13, %s4771_s29  ;;  %v1386_v38 = vshrl.u32 %v1004_v55, 16  ;;  %4640 = vmatmul.msk.bf16.gmra.mxu2 %vm3510_vm9, %v3508_v19  ;;  %v4008_v18 = vadd.f32 %v4007_v23, %v3919_v31  ;;  %v1389_v45 = vshll.u32 %v1004_v55, 16  ;;  %v1395_v28 = vshll.u32 %v1005_v60, 16 }
 0x229   : > { %v1584_v17 = vsel %vm4849_vm5, %v4365_v11, %v1583_v21  ;;  %v1585_v46 = vrot.slane %v1583_v21, 4  ;;  %v2590_v39 = vrot.slane %v2589_v4, 4  ;;  %v2600_v61 = vrot.slane %v2599_v36, 4  ;;  %v4690_v4 = vld [vmem:[#allocation2 + $0x6c] sm:$0xff] }
 0x22a   : > { %v2980_v51 = vunpack.c.l.b16 %v1584_v17  ;;  %v1388_v35 = vrot.slane %v1386_v38, 4  ;;  %4080 = vst.msk [vmem:[%s5745_s10 + $0x28] sm:$0xff] %vm3625_vm12, %v4008_v18  ;;  %v1391_v8 = vrot.slane %v1389_v45, 5  ;;  %v1399_v59 = vshrl.u32 %v1005_v60, 16  ;;  %v5946_v60 = vpop.f32.mrf.mxu2  ;;  %v2645_v17 = vld [vmem:[#allocation2 + $0xcc] sm:$0xe] }
 0x22b   : > { %v1587_v34 = vsel %vm4849_vm5, %v1585_v46, %v1586_v24  ;;  %v2595_v30 = vsel %vm4860_vm8, %v2590_v39, %v2594_v22  ;;  %v2605_v9 = vsel %vm4860_vm8, %v2600_v61, %v2604_v7  ;;  %v1405_v58 = vshll.u32 %v1021_v43, 16  ;;  %v5952_v43 = vpop.f32.mrf.mxu1  ;;  %v5962_v46 = vpop.permute.xlu1 %3272  ;;  %v2229_v39 = vld [vmem:[#allocation2 + $0xd0] sm:$0xf] }
 0x22c   : > { %v2981_v62 = vunpack.c.l.b16 %v1587_v34  ;;  %v3410_v57 = vunpack.c.l.b16 %v2595_v30  ;;  %v3411_v16 = vunpack.c.l.b16 %v2605_v9  ;;  %v1392_v0 = vor.u32 %v1391_v8, %v1388_v35  ;;  %v2245_v8 = vld [vmem:[#allocation2 + $0xd4] sm:$0x1] }
 0x22d   : > { %v1397_v40 = vrot.slane %v1395_v28, 5  ;;  %v1401_v56 = vrot.slane %v1399_v59, 4  ;;  %v1407_v52 = vrot.slane %v1405_v58, 5  ;;  %v3709_v50 = vsel %vm3691_vm14, %v5902_v5, %v3367_v32  ;;  %v2228_v28 = vld [vmem:[#allocation2 + $0xcc] sm:$0xf]  ;;  %v5968_v59 = vpop.permute.xlu2 %3274 }
 0x22e   : > { %v2997_v10 = vpack.c.b16 %v2981_v62, %v2980_v51  ;;  %v3428_v6 = vpack.c.b16 %v3411_v16, %v3410_v57  ;;  %v1393_v12 = vrot.slane %v1392_v0, 4  ;;  %v4381_v13 = vrot.slane %v2036_v49, 9  ;;  %v4712_v57 = vld [vmem:[#allocation2 + $0xc0] sm:$0xff] }
 0x22f   : > { %v2192_v25 = vrot.slane %v1620_v44, 5  ;;  %v1402_v55 = vor.u32 %v1401_v56, %v1397_v40  ;;  %v2195_v23 = vrot.slane %v1636_v33, 5  ;;  %v1998_v14 = vshrl.u32 %v1619_v3, 16 }
 0x230   : > { %3028 = vrot.lane.b32.xlu1 %v2997_v10, %s4768_s24  ;;  %v2001_v29 = vshll.u32 %v1619_v3, 16  ;;  %3458 = vrot.lane.b32.xlu2 %v3428_v6, %s4773_s5  ;;  %v1398_v5 = vsel %vm4860_vm8, %v1393_v12, %v1397_v40  ;;  %v2007_v7 = vshll.u32 %v1620_v44, 16  ;;  %v2011_v18 = vshrl.u32 %v1620_v44, 16  ;;  %v4675_v40 = vld [vmem:[%s4817_s22 + $0xf0] sm:$0xff]  ;;  %v5982_v12 = vpop.permute.xlu0 %3114 }
 0x231   : > { %v2193_v22 = vsel %vm4849_vm5, %v4381_v13, %v2192_v25  ;;  %v2194_v53 = vrot.slane %v2192_v25, 4  ;;  %v1403_v19 = vrot.slane %v1402_v55, 4  ;;  %v2900_v31 = vunpack.c.l.b16 %v1398_v5 }
 0x232   : > { %v3236_v11 = vunpack.c.l.b16 %v2193_v22  ;;  %v2000_v21 = vrot.slane %v1998_v14, 4  ;;  %v2003_v24 = vrot.slane %v2001_v29, 5  ;;  %v2009_v38 = vrot.slane %v2007_v7, 5 }
 0x233   : > { %v2196_v36 = vsel %vm4849_vm5, %v2194_v53, %v2195_v23  ;;  %v1408_v45 = vsel %vm4860_vm8, %v1403_v19, %v1407_v52  ;;  %v2017_v37 = vshll.u32 %v1636_v33, 16  ;;  %v3540_v61 = vsel %vm3510_vm9, %v4690_v4, %v5926_v48  ;;  %v4012_v33 = vpop.f32.mrf.mxu2 }
 0x234   : > { %v3237_v32 = vunpack.c.l.b16 %v2196_v36  ;;  %v2901_v51 = vunpack.c.l.b16 %v1408_v45  ;;  %v2004_v35 = vor.u32 %v2003_v24, %v2000_v21  ;;  %v2013_v34 = vrot.slane %v2011_v18, 4  ;;  %4344 = vmatmul.msk.bf16.gmra.mxu3 %vm452_vm2, %v4675_v40  ;;  %v2939_v24 = vpop.permute.xlu1 %2938  ;;  %v4728_v45 = vld [vmem:[#allocation2 + $0xcc] sm:$0xff] }
 0x235   : > { %v2019_v9 = vrot.slane %v2017_v37, 5  ;;  %v3750_v62 = vsel %vm3724_vm15, %v3709_v50, %v5919_v1  ;;  %v4397_v58 = vrot.slane %v2645_v17, 9  ;;  %v2801_v48 = vrot.slane %v2229_v39, 5 }
 0x236   : > { %v3253_v30 = vpack.c.b16 %v3237_v32, %v3236_v11  ;;  %v2917_v49 = vpack.c.b16 %v2901_v51, %v2900_v31  ;;  %v2005_v16 = vrot.slane %v2004_v35, 4  ;;  %v2014_v0 = vor.u32 %v2013_v34, %v2009_v38  ;;  %3945 = vmatmul.bf16.gmra.mxu1 %v3750_v62  ;;  %v3197_v51 = vpop.permute.xlu2 %3196 }
 0x237   : > { %v3579_v3 = vsel %vm3559_vm10, %v3540_v61, %v5850_v63  ;;  %v2804_v10 = vrot.slane %v2245_v8, 5  ;;  %v2607_v56 = vshrl.u32 %v2228_v28, 16  ;;  %v2610_v52 = vshll.u32 %v2228_v28, 16  ;;  %v3923_v63 = vpop.f32.mrf.mxu1 }
 0x238   : > { %3284 = vrot.lane.b32.xlu1 %v3253_v30, %s4771_s29  ;;  %2948 = vrot.lane.b32.xlu0 %v2917_v49, %s4769_s25  ;;  %v2010_v1 = vsel %vm4860_vm8, %v2005_v16, %v2009_v38  ;;  %v2015_v50 = vrot.slane %v2014_v0, 4  ;;  %v2802_v44 = vsel %vm4849_vm5, %v4397_v58, %v2801_v48  ;;  %v2803_v6 = vrot.slane %v2801_v48, 4  ;;  %v4691_v58 = vld [vmem:[#allocation2 + $0x78] sm:$0xff] }
 0x239   : > { %3124 = vrot.lane.b32.xlu2 %v4712_v57, %s4770_s26  ;;  %v3156_v13 = vunpack.c.l.b16 %v2010_v1  ;;  %v3492_v25 = vunpack.c.l.b16 %v2802_v44  ;;  %v2609_v55 = vrot.slane %v2607_v56, 4  ;;  %v2612_v23 = vrot.slane %v2610_v52, 5 }
 0x23a   : > { %v2020_v14 = vsel %vm4860_vm8, %v2015_v50, %v2019_v9  ;;  %v2805_v29 = vsel %vm4849_vm5, %v2803_v6, %v2804_v10  ;;  %v2616_v5 = vshll.u32 %v2229_v39, 16  ;;  %v2620_v22 = vshrl.u32 %v2229_v39, 16 }
 0x23b   : > { %v3157_v53 = vunpack.c.l.b16 %v2020_v14  ;;  %v3493_v7 = vunpack.c.l.b16 %v2805_v29  ;;  %v2613_v19 = vor.u32 %v2612_v23, %v2609_v55  ;;  %v2626_v31 = vshll.u32 %v2245_v8, 16  ;;  %v4015_v61 = vpop.f32.mrf.mxu2  ;;  %v4692_v55 = vld [vmem:[#allocation2 + $0x84] sm:$0xff] }
 0x23c   : > { %v3612_v11 = vsel %vm3592_vm11, %v3579_v3, %v5861_v26  ;;  %v2618_v21 = vrot.slane %v2616_v5, 5  ;;  %v2622_v4 = vrot.slane %v2620_v22, 4  ;;  %v3922_v36 = vadd.f32 %v5725_v54, %v5952_v43  ;;  %v4677_v29 = vld [vmem:[%s4817_s22 + $0x100] sm:$0xff] }
 0x23d   : > { %v3173_v38 = vpack.c.b16 %v3157_v53, %v3156_v13  ;;  %v3645_v41 = vsel %vm3625_vm12, %v3612_v11, %v5950_v42  ;;  %v3509_v18 = vpack.c.b16 %v3493_v7, %v3492_v25  ;;  %v2614_v17 = vrot.slane %v2613_v19, 4 }
 0x23e   : > { %v2623_v32 = vor.u32 %v2622_v4, %v2618_v21  ;;  %v2628_v37 = vrot.slane %v2626_v31, 5  ;;  %v4011_v39 = vadd.f32 %v5946_v60, %v3922_v36  ;;  %v3924_v26 = vadd.f32 %v5725_v54, %v3923_v63  ;;  %v3449_v60 = vpop.permute.xlu0 %3448  ;;  %v3453_v10 = vpop.permute.xlu2 %3452 }
 0x23f   : > { %4641 = vmatmul.msk.bf16.gmra.mxu2 %vm3510_vm9, %v3509_v18  ;;  %v3678_v43 = vsel %vm3658_vm13, %v3645_v41, %v5962_v46  ;;  %v2619_v42 = vsel %vm4860_vm8, %v2614_v17, %v2618_v21  ;;  %v6009_v46 = vld [vmem:[%s6154_s3] ss:$0 sm:$0xff]  ;;  %v3543_v0 = vsel %vm3510_vm9, %v4691_v58, %v2939_v24  ;;  %v4693_v18 = vld [vmem:[#allocation2 + $0x90] sm:$0xff]  ;;  %v4678_v17 = vld [vmem:[%s4817_s22 + $0x108] sm:$0xff] }
 0x240   : > { %3204 = vrot.lane.b32.xlu0 %v3173_v38, %s4772_s30  ;;  %v2624_v35 = vrot.slane %v2623_v32, 4  ;;  %4081 = vst.msk [vmem:[%s5745_s10 + $0x30] sm:$0xff] %vm3625_vm12, %v4011_v39  ;;  %v4013_v54 = vadd.f32 %v4012_v33, %v3924_v26  ;;  %v3926_v34 = vpop.f32.mrf.mxu1  ;;  %v3412_v30 = vunpack.c.l.b16 %v2619_v42  ;;  %v3711_v9 = vsel %vm3691_vm14, %v3678_v43, %v5944_v20  ;;  %v3195_v16 = vpop.permute.xlu1 %3194 }
 0x241   : > { %3380 = vrot.lane.b32.xlu2 %v4728_v45, %s4767_s23  ;;  %v3927_v8 = vadd.f32 %v6009_v46, %v3926_v34  ;;  %v3753_v49 = vsel %vm3724_vm15, %v3711_v9, %v3449_v60  ;;  %v3581_v40 = vsel %vm3559_vm10, %v3543_v0, %v5888_v15 }
 0x242   : > { %v2629_v28 = vsel %vm4860_vm8, %v2624_v35, %v2628_v37  ;;  %4082 = vst.msk [vmem:[%s5745_s10 + $0x38] sm:$0xff] %vm3625_vm12, %v4013_v54  ;;  %v3614_v56 = vsel %vm3592_vm11, %v3581_v40, %v5982_v12 }
 0x243   : > { %v3413_v62 = vunpack.c.l.b16 %v2629_v28  ;;  %v4016_v57 = vadd.f32 %v4015_v61, %v3927_v8  ;;  %v4017_v3 = vpop.f32.mrf.mxu2  ;;  %v3647_v1 = vsel %vm3625_vm12, %v3614_v56, %v3195_v16  ;;  %v4679_v8 = vld [vmem:[%s4817_s22 + $0x110] sm:$0xff]  ;;  %v4694_v28 = vld [vmem:[#allocation2 + $0x9c] sm:$0xff] }
 0x244   : > { %4345 = vmatmul.msk.bf16.gmra.mxu3 %vm452_vm2, %v4676_v2  ;;  %v3680_v15 = vsel %vm3658_vm13, %v3647_v1, %v5968_v59 }
 0x245   : > { %4083 = vst.msk [vmem:[%s5745_s10 + $0x40] sm:$0xff] %vm3625_vm12, %v4016_v57  ;;  %v3429_v48 = vpack.c.b16 %v3413_v62, %v3412_v30  ;;  %v3713_v6 = vsel %vm3691_vm14, %v3680_v15, %v5111_v47  ;;  %v4680_v15 = vld [vmem:[%s4817_s22 + $0x118] sm:$0xff] }
 0x246   : > { %3950 = vmatmul.bf16.gmra.mxu1 %v3753_v49  ;;  %v3021_v50 = vpop.permute.xlu0 %3020  ;;  %v2941_v25 = vpop.permute.xlu2 %2940  ;;  %v3756_v23 = vsel %vm3724_vm15, %v3713_v6, %v5907_v27 }
 0x247   : > { %v3546_v5 = vsel %vm3510_vm9, %v4692_v55, %v2941_v25 }
 0x248   : > { %3460 = vrot.lane.b32.xlu0 %v3429_v48, %s4773_s5  ;;  %v3928_v20 = vpop.f32.mrf.mxu1  ;;  %v3117_v44 = vpop.permute.xlu1 %3116  ;;  %v3583_v59 = vsel %vm3559_vm10, %v3546_v5, %v3021_v50 }
 0x249   : > { %v3929_v33 = vadd.f32 %v6009_v46, %v3928_v20  ;;  %v3616_v47 = vsel %vm3592_vm11, %v3583_v59, %v3117_v44 }
 0x24a   : > { %v3649_v11 = vsel %vm3625_vm12, %v3616_v47, %v3197_v51 }
 0x24b   : > { %v4018_v52 = vadd.f32 %v4017_v3, %v3929_v33  ;;  %v4020_v63 = vpop.f32.mrf.mxu2 }
 0x24d   : > { %4084 = vst.msk [vmem:[%s5745_s10 + $0x48] sm:$0xff] %vm3625_vm12, %v4018_v52 }
 0x24e   : > { %v3119_v31 = vpop.permute.xlu2 %3118 }
 0x24f   : > { %v3277_v22 = vpop.permute.xlu0 %3276 }
 0x250   : > { %v3373_v53 = vpop.permute.xlu1 %3372  ;;  %v3682_v4 = vsel %vm3658_vm13, %v3649_v11, %v3277_v22 }
 0x251   : > { %v3715_v38 = vsel %vm3691_vm14, %v3682_v4, %v3373_v53 }
 0x252   : > { %v3759_v41 = vsel %vm3724_vm15, %v3715_v38, %v3453_v10 }
 0x253   : > { %v4022_v19 = vpop.f32.mrf.mxu2 }
 0x254   : > { %v3931_v13 = vpop.f32.mrf.mxu1  ;;  %4346 = vmatmul.msk.bf16.gmra.mxu3 %vm452_vm2, %v4677_v29 }
 0x255   : > { %v3932_v12 = vadd.f32 %v6009_v46, %v3931_v13  ;;  %v4695_v13 = vld [vmem:[#allocation2 + $0xa8] sm:$0xff] }
 0x256   : > { %3955 = vmatmul.bf16.gmra.mxu1 %v3756_v23  ;;  %v3375_v45 = vpop.permute.xlu2 %3374 }
 0x257   : > { %v4021_v14 = vadd.f32 %v4020_v63, %v3932_v12 }
 0x258   : > { %v3023_v24 = vpop.permute.xlu1 %3022 }
 0x259   : > { %4085 = vst.msk [vmem:[%s5745_s10 + $0x50] sm:$0xff] %vm3625_vm12, %v4021_v14 }
 0x25b   : > { %v4025_v49 = vpop.f32.mrf.mxu2 }
 0x25c   : > { %v3933_v7 = vpop.f32.mrf.mxu1 }
 0x25d   : > { %v3934_v27 = vadd.f32 %v6009_v46, %v3933_v7 }
 0x25f   : > { %v4023_v21 = vadd.f32 %v4022_v19, %v3934_v27 }
 0x260   : > { %v2943_v36 = vpop.permute.xlu0 %2942  ;;  %v3025_v51 = vpop.permute.xlu2 %3024 }
 0x261   : > { %4086 = vst.msk [vmem:[%s5745_s10 + $0x58] sm:$0xff] %vm3625_vm12, %v4023_v21  ;;  %v3549_v32 = vsel %vm3510_vm9, %v4693_v18, %v2943_v36 }
 0x262   : > { %v3585_v37 = vsel %vm3559_vm10, %v3549_v32, %v3023_v24 }
 0x263   : > { %v3279_v26 = vpop.permute.xlu1 %3278  ;;  %v3618_v61 = vsel %vm3592_vm11, %v3585_v37, %v3119_v31  ;;  %v4027_v52 = vpop.f32.mrf.mxu2 }
 0x264   : > { %4347 = vmatmul.msk.bf16.gmra.mxu3 %vm452_vm2, %v4678_v17 }
 0x266   : > { %3960 = vmatmul.bf16.gmra.mxu1 %v3759_v41 }
 0x269   : > { %v3281_v30 = vpop.permute.xlu2 %3280 }
 0x26b   : > { %v3199_v39 = vpop.permute.xlu0 %3198  ;;  %v4030_v23 = vpop.f32.mrf.mxu2 }
 0x26c   : > { %v3651_v43 = vsel %vm3625_vm12, %v3618_v61, %v3199_v39  ;;  %v4696_v39 = vld [vmem:[#allocation2 + $0xb4] sm:$0xff] }
 0x26d   : > { %v3684_v42 = vsel %vm3658_vm13, %v3651_v43, %v3279_v26 }
 0x26e   : > { %v3717_v54 = vsel %vm3691_vm14, %v3684_v42, %v3375_v45 }
 0x270   : > { %v2945_v60 = vpop.permute.xlu1 %2944 }
 0x271   : > { %v3552_v9 = vsel %vm3510_vm9, %v4694_v28, %v2945_v60 }
 0x272   : > { %v3587_v58 = vsel %vm3559_vm10, %v3552_v9, %v3025_v51 }
 0x273   : > { %v4032_v31 = vpop.f32.mrf.mxu2 }
 0x274   : > { %4348 = vmatmul.msk.bf16.gmra.mxu3 %vm452_vm2, %v4679_v8 }
 0x275   : > { %v3455_v35 = vpop.permute.xlu0 %3454 }
 0x276   : > { %v3762_v34 = vsel %vm3724_vm15, %v3717_v54, %v3455_v35  ;;  %v2947_v33 = vpop.permute.xlu2 %2946 }
 0x277   : > { %3965 = vmatmul.bf16.gmra.mxu1 %v3762_v34  ;;  %v3555_v14 = vsel %vm3510_vm9, %v4695_v13, %v2947_v33 }
 0x27a   : > { %v712_v6 = vpop.f32.mrf.mxu3 }
 0x27b   : > { %v4035_v38 = vpop.f32.mrf.mxu2 }
 0x27d   : > { %v3121_v62 = vpop.permute.xlu0 %3120 }
 0x27e   : > { %v3620_v16 = vsel %vm3592_vm11, %v3587_v58, %v3121_v62 }
 0x280   : > { %v3201_v57 = vpop.permute.xlu1 %3200 }
 0x281   : > { %v3653_v48 = vsel %vm3625_vm12, %v3620_v16, %v3201_v57  ;;  %v3203_v25 = vpop.permute.xlu2 %3202 }
 0x282   : > { %v3936_v0 = vpop.f32.mrf.mxu1  ;;  %v3686_v3 = vsel %vm3658_vm13, %v3653_v48, %v3281_v30  ;;  %v714_v5 = vpop.f32.mrf.mxu3 }
 0x283   : > { %v3937_v2 = vadd.f32 %v6009_v46, %v3936_v0  ;;  %v4037_v43 = vpop.f32.mrf.mxu2 }
 0x284   : > { %4349 = vmatmul.msk.bf16.gmra.mxu3 %vm452_vm2, %v4680_v15 }
 0x285   : > { %v3377_v40 = vpop.permute.xlu0 %3376  ;;  %v4026_v20 = vadd.f32 %v4025_v49, %v3937_v2 }
 0x286   : > { %v3719_v10 = vsel %vm3691_vm14, %v3686_v3, %v3377_v40 }
 0x287   : > { %4087 = vst.msk [vmem:[%s5745_s10 + $0x60] sm:$0xff] %vm3625_vm12, %v4026_v20 }
 0x289   : > { %v3457_v56 = vpop.permute.xlu1 %3456 }
 0x28a   : > { %v3765_v1 = vsel %vm3724_vm15, %v3719_v10, %v3457_v56  ;;  %v3938_v50 = vpop.f32.mrf.mxu1  ;;  %v3459_v27 = vpop.permute.xlu2 %3458 }
 0x28b   : > { %3970 = vmatmul.bf16.gmra.mxu1 %v3765_v1  ;;  %v3939_v44 = vadd.f32 %v6009_v46, %v3938_v50  ;;  %v4040_v9 = vpop.f32.mrf.mxu2 }
 0x28d   : > { %v4028_v63 = vadd.f32 %v4027_v52, %v3939_v44 }
 0x28f   : > { %4088 = vst.msk [vmem:[%s5745_s10 + $0x68] sm:$0xff] %vm3625_vm12, %v4028_v63 }
 0x291   : > { %v3123_v12 = vpop.permute.xlu1 %3122  ;;  %v3027_v55 = vpop.permute.xlu0 %3026 }
 0x292   : > { %v3589_v29 = vsel %vm3559_vm10, %v3555_v14, %v3027_v55 }
 0x293   : > { %v3622_v22 = vsel %vm3592_vm11, %v3589_v29, %v3123_v12  ;;  %v3125_v51 = vpop.permute.xlu2 %3124  ;;  %v4042_v33 = vpop.f32.mrf.mxu2 }
 0x294   : > { %v3655_v47 = vsel %vm3625_vm12, %v3622_v22, %v3203_v25 }
 0x297   : > { %v717_v4 = vpop.f32.mrf.mxu3 }
 0x299   : > { %v3379_v59 = vpop.permute.xlu1 %3378 }
 0x29a   : > { %v3283_v53 = vpop.permute.xlu0 %3282 }
 0x29b   : > { %v3688_v7 = vsel %vm3658_vm13, %v3655_v47, %v3283_v53  ;;  %v3381_v49 = vpop.permute.xlu2 %3380  ;;  %v4045_v1 = vpop.f32.mrf.mxu2 }
 0x29c   : > { %v3721_v19 = vsel %vm3691_vm14, %v3688_v7, %v3379_v59 }
 0x29d   : > { %v3768_v11 = vsel %vm3724_vm15, %v3721_v19, %v3459_v27  ;;  %v3941_v21 = vpop.f32.mrf.mxu1 }
 0x29e   : > { %3975 = vmatmul.bf16.gmra.mxu1 %v3768_v11  ;;  %v3942_v36 = vadd.f32 %v6009_v46, %v3941_v21 }
 0x29f   : > { %v719_v18 = vpop.f32.mrf.mxu3 }
 0x2a0   : > { %v4031_v24 = vadd.f32 %v4030_v23, %v3942_v36 }
 0x2a2   : > { %4089 = vst.msk [vmem:[%s5745_s10 + $0x70] sm:$0xff] %vm3625_vm12, %v4031_v24  ;;  %v3029_v32 = vpop.permute.xlu1 %3028 }
 0x2a3   : > { %v4047_v13 = vpop.f32.mrf.mxu2 }
 0x2a5   : > { %v3943_v41 = vpop.f32.mrf.mxu1 }
 0x2a6   : > { %v3944_v17 = vadd.f32 %v6009_v46, %v3943_v41 }
 0x2a7   : > { %v722_v61 = vpop.f32.mrf.mxu3 }
 0x2a8   : > { %v4033_v45 = vadd.f32 %v4032_v31, %v3944_v17 }
 0x2aa   : > { %v2949_v37 = vpop.permute.xlu0 %2948  ;;  %4090 = vst.msk [vmem:[%s5745_s10 + $0x78] sm:$0xff] %vm3625_vm12, %v4033_v45  ;;  %v3285_v34 = vpop.permute.xlu1 %3284 }
 0x2ab   : > { %v3558_v26 = vsel %vm3510_vm9, %v4696_v39, %v2949_v37  ;;  %v4050_v5 = vpop.f32.mrf.mxu2 }
 0x2ac   : > { %v3591_v42 = vsel %vm3559_vm10, %v3558_v26, %v3029_v32 }
 0x2ad   : > { %v3624_v54 = vsel %vm3592_vm11, %v3591_v42, %v3125_v51 }
 0x2af   : > { %v724_v30 = vpop.f32.mrf.mxu3 }
 0x2b2   : > { %v3205_v35 = vpop.permute.xlu0 %3204 }
 0x2b3   : > { %v3946_v60 = vpop.f32.mrf.mxu1  ;;  %v3657_v8 = vsel %vm3625_vm12, %v3624_v54, %v3205_v35  ;;  %v4052_v27 = vpop.f32.mrf.mxu2 }
 0x2b4   : > { %v3947_v28 = vadd.f32 %v6009_v46, %v3946_v60  ;;  %v3690_v58 = vsel %vm3658_vm13, %v3657_v8, %v3285_v34 }
 0x2b5   : > { %v3723_v16 = vsel %vm3691_vm14, %v3690_v58, %v3381_v49 }
 0x2b6   : > { %v4036_v62 = vadd.f32 %v4035_v38, %v3947_v28 }
 0x2b7   : > { %v727_v40 = vpop.f32.mrf.mxu3 }
 0x2b8   : > { %4091 = vst.msk [vmem:[%s5745_s10 + $0x80] sm:$0xff] %vm3625_vm12, %v4036_v62 }
 0x2ba   : > { %v3461_v57 = vpop.permute.xlu0 %3460 }
 0x2bb   : > { %v3771_v0 = vsel %vm3724_vm15, %v3723_v16, %v3461_v57  ;;  %v3948_v48 = vpop.f32.mrf.mxu1  ;;  %v4055_v4 = vpop.f32.mrf.mxu2 }
 0x2bc   : > { %3980 = vmatmul.bf16.gmra.mxu1 %v3771_v0  ;;  %v3949_v2 = vadd.f32 %v6009_v46, %v3948_v48 }
 0x2be   : > { %v4038_v20 = vadd.f32 %v4037_v43, %v3949_v2 }
 0x2bf   : > { %v729_v56 = vpop.f32.mrf.mxu3 }
 0x2c0   : > { %4092 = vst.msk [vmem:[%s5745_s10 + $0x88] sm:$0xff] %vm3625_vm12, %v4038_v20 }
 0x2c3   : > { %v3951_v3 = vpop.f32.mrf.mxu1  ;;  %v4057_v18 = vpop.f32.mrf.mxu2 }
 0x2c4   : > { %v3952_v10 = vadd.f32 %v6009_v46, %v3951_v3 }
 0x2c6   : > { %v4041_v52 = vadd.f32 %v4040_v9, %v3952_v10 }
 0x2c7   : > { %v732_v15 = vpop.f32.mrf.mxu3 }
 0x2c8   : > { %4093 = vst.msk [vmem:[%s5745_s10 + $0x90] sm:$0xff] %vm3625_vm12, %v4041_v52 }
 0x2cb   : > { %v3953_v50 = vpop.f32.mrf.mxu1  ;;  %v4060_v26 = vpop.f32.mrf.mxu2 }
 0x2cc   : > { %v3954_v44 = vadd.f32 %v6009_v46, %v3953_v50 }
 0x2ce   : > { %v4043_v6 = vadd.f32 %v4042_v33, %v3954_v44 }
 0x2cf   : > { %v734_v12 = vpop.f32.mrf.mxu3 }
 0x2d0   : > { %4094 = vst.msk [vmem:[%s5745_s10 + $0x98] sm:$0xff] %vm3625_vm12, %v4043_v6 }
 0x2d3   : > { %v3956_v63 = vpop.f32.mrf.mxu1  ;;  %v4062_v42 = vpop.f32.mrf.mxu2 }
 0x2d4   : > { %v3957_v25 = vadd.f32 %v6009_v46, %v3956_v63 }
 0x2d6   : > { %v4046_v55 = vadd.f32 %v4045_v1, %v3957_v25 }
 0x2d7   : > { %v737_v29 = vpop.f32.mrf.mxu3 }
 0x2d8   : > { %4095 = vst.msk [vmem:[%s5745_s10 + $0xa0] sm:$0xff] %vm3625_vm12, %v4046_v55 }
 0x2db   : > { %v3958_v23 = vpop.f32.mrf.mxu1  ;;  %v4065_v28 = vpop.f32.mrf.mxu2 }
 0x2dc   : > { %v3959_v14 = vadd.f32 %v6009_v46, %v3958_v23 }
 0x2de   : > { %v4048_v22 = vadd.f32 %v4047_v13, %v3959_v14 }
 0x2df   : > { %v739_v47 = vpop.f32.mrf.mxu3 }
 0x2e0   : > { %4096 = vst.msk [vmem:[%s5745_s10 + $0xa8] sm:$0xff] %vm3625_vm12, %v4048_v22 }
 0x2e3   : > { %v3961_v59 = vpop.f32.mrf.mxu1  ;;  %v4067_v57 = vpop.f32.mrf.mxu2 }
 0x2e4   : > { %v3962_v53 = vadd.f32 %v6009_v46, %v3961_v59 }
 0x2e6   : > { %v4051_v7 = vadd.f32 %v4050_v5, %v3962_v53 }
 0x2e7   : > { %v742_v11 = vpop.f32.mrf.mxu3 }
 0x2e8   : > { %4097 = vst.msk [vmem:[%s5745_s10 + $0xb0] sm:$0xff] %vm3625_vm12, %v4051_v7 }
 0x2eb   : > { %v3963_v19 = vpop.f32.mrf.mxu1  ;;  %v4070_v0 = vpop.f32.mrf.mxu2 }
 0x2ec   : > { %v3964_v31 = vadd.f32 %v6009_v46, %v3963_v19 }
 0x2ee   : > { %v4053_v21 = vadd.f32 %v4052_v27, %v3964_v31 }
 0x2ef   : > { %v744_v38 = vpop.f32.mrf.mxu3 }
 0x2f0   : > { %4098 = vst.msk [vmem:[%s5745_s10 + $0xb8] sm:$0xff] %vm3625_vm12, %v4053_v21 }
 0x2f3   : > { %v4072_v3 = vpop.f32.mrf.mxu2 }
 0x2f4   : > { %v3966_v36 = vpop.f32.mrf.mxu1 }
 0x2f5   : > { %v3967_v24 = vadd.f32 %v6009_v46, %v3966_v36 }
 0x2f7   : > { %v4056_v41 = vadd.f32 %v4055_v4, %v3967_v24  ;;  %v747_v32 = vpop.f32.mrf.mxu3 }
 0x2f9   : > { %4099 = vst.msk [vmem:[%s5745_s10 + $0xc0] sm:$0xff] %vm3625_vm12, %v4056_v41 }
 0x2fc   : > { %v3968_v17 = vpop.f32.mrf.mxu1 }
 0x2fd   : > { %v3969_v45 = vadd.f32 %v6009_v46, %v3968_v17 }
 0x2ff   : > { %v4058_v37 = vadd.f32 %v4057_v18, %v3969_v45  ;;  %v749_v39 = vpop.f32.mrf.mxu3 }
 0x301   : > { %4100 = vst.msk [vmem:[%s5745_s10 + $0xc8] sm:$0xff] %vm3625_vm12, %v4058_v37 }
 0x307   : > { %v752_v60 = vpop.f32.mrf.mxu3 }
 0x308   : > { %v3971_v61 = vpop.f32.mrf.mxu1 }
 0x309   : > { %v3972_v43 = vadd.f32 %v6009_v46, %v3971_v61 }
 0x30b   : > { %v4061_v51 = vadd.f32 %v4060_v26, %v3972_v43 }
 0x30d   : > { %4101 = vst.msk [vmem:[%s5745_s10 + $0xd0] sm:$0xff] %vm3625_vm12, %v4061_v51 }
 0x30f   : > { %v754_v8 = vpop.f32.mrf.mxu3 }
 0x310   : > { %v3973_v35 = vpop.f32.mrf.mxu1 }
 0x311   : > { %v3974_v54 = vadd.f32 %v6009_v46, %v3973_v35 }
 0x313   : > { %v4063_v34 = vadd.f32 %v4062_v42, %v3974_v54 }
 0x315   : > { %4102 = vst.msk [vmem:[%s5745_s10 + $0xd8] sm:$0xff] %vm3625_vm12, %v4063_v34 }
 0x31b   : > { %v3976_v30 = vpop.f32.mrf.mxu1 }
 0x31c   : > { %v3977_v9 = vadd.f32 %v6009_v46, %v3976_v30 }
 0x31e   : > { %v4066_v62 = vadd.f32 %v4065_v28, %v3977_v9 }
 0x320   : > { %4103 = vst.msk [vmem:[%s5745_s10 + $0xe0] sm:$0xff] %vm3625_vm12, %v4066_v62 }
 0x323   : > { %v3978_v58 = vpop.f32.mrf.mxu1 }
 0x324   : > { %v3979_v49 = vadd.f32 %v6009_v46, %v3978_v58 }
 0x326   : > { %v4068_v16 = vadd.f32 %v4067_v57, %v3979_v49 }
 0x328   : > { %4104 = vst.msk [vmem:[%s5745_s10 + $0xe8] sm:$0xff] %vm3625_vm12, %v4068_v16 }
 0x339   : > { %v3981_v48 = vpop.f32.mrf.mxu1 }
 0x33a   : > { %v3982_v2 = vadd.f32 %v6009_v46, %v3981_v48 }
 0x33c   : > { %v4071_v40 = vadd.f32 %v4070_v0, %v3982_v2 }
 0x33e   : > { %4105 = vst.msk [vmem:[%s5745_s10 + $0xf0] sm:$0xff] %vm3625_vm12, %v4071_v40 }
 0x341   : > { %v3983_v20 = vpop.f32.mrf.mxu1 }
 0x342   : > { %v3984_v33 = vadd.f32 %v6009_v46, %v3983_v20 }
 0x344   : > { %v4073_v10 = vadd.f32 %v4072_v3, %v3984_v33 }
 0x346   : > { %4106 = vst.msk [vmem:[%s5745_s10 + $0xf8] sm:$0xff] %vm3625_vm12, %v4073_v10 }
 0x347 PF: > { %s14_s15 = sadd.s32 1, %s4764_s15  }
 0x348   : > { %p11_p4 = scmp.ge.s32.totalorder %s14_s15, 4  }
 0x34a   :  { %13 = sbr.rel (!%p11_p4) target bundleno = 1 (0x1), region = 68 }

// kernel: upconv_block.3
= control target key start
LH: loop header
LB: loop body
LE: loop exit
PB: predicated region body
PF: predicated region fallthrough
CT: control target
= control target key end

     0   :  { %s2301_s0 = inlined_call_operand.vmem [shape: bf16[2,17,34,34], index: 0, kind: input, shape index: {}]   ;;  %s2302_s1 = inlined_call_operand.vmem [shape: f32[17], index: 1, kind: input, shape index: {}]   ;;  %s2303_s2 = inlined_call_operand.vmem [shape: f32[16], index: 2, kind: input, shape index: {}]   ;;  %s2304_s3 = inlined_call_operand.<no memory space> [shape: f32[1], index: 3, kind: input, shape index: {}]   ;;  %s2305_s4 = inlined_call_operand.vmem [shape: f32[2,2,32,64], index: 4, kind: output, shape index: {}]  }
   0x1   :  { %9 = sst [smem:[#allocation2]] %s2304_s3 }
   0x2   :  { %10 = vsyncpa [#allocation4], 0 }
   0x3   :  { %11 = vsyncpa [#allocation6], 0  ;;  %s1643_s17 = smov 0  }
   0x4 LB: > { %s1271_s18 = sadd.s32 4294967295, %s1608_s17   ;;  %p1273_p0 = scmp.ge.s32.totalorder %s1608_s17, 1  ;;  %s1608_s17 = sphi %s1643_s17, %s17_s17  }
   0x5   : > { %p137_p1 = scmp.lt.s32.totalorder %s1608_s17, 3  ;;  %s149_s21 = sshll.u32 %s2302_s1, 4  ;;  %s150_s21 = int_to_ptr.vmem [resolvable:$true] %s149_s21 }
   0x6   : > { %p1547_p3 = scmp.eq.s32.totalorder %s1271_s18, 0  ;;  %s159_s23 = sshll.u32 %s2303_s2, 4  ;;  %s160_s23 = int_to_ptr.vmem [resolvable:$true] %s159_s23 }
   0x7   : > { %p138_p2 = pnand %p1273_p0, %p137_p1  ;;  %s1610_s24 = smov [#allocation3]  }
   0x8   : > { %s1611_s25 = smov [#allocation5]  }
   0x9   : > { %p1540_p4 = pneg %p138_p2 }
   0xa   : > { %183 = sbr.rel (%p138_p2) target bundleno = 449 (0x1c1), region = 36 }
   0xb   : > { %p1541_p5 = pnand %p1547_p3, %p1540_p4 }
   0xd   : > { %1543 = dma.vmem_to_smem (!%p1541_p5), %s150_s21, 16, %s1610_s24, [#allocation4]  }
   0xe   : > { %1546 = dma.vmem_to_smem (!%p1541_p5), %s160_s23, 16, %s1611_s25, [#allocation6]  }
   0xf   : > { %1599 = dma.done.wait (%p1547_p3), [#allocation4], 16  }
  0x10   : > { %1601 = vsyncadd (%p1547_p3), [#allocation4], 4294967280 }
  0x11   : > { %1603 = dma.done.wait (%p1547_p3), [#allocation6], 16  }
  0x12   : > { %1605 = vsyncadd (%p1547_p3), [#allocation6], 4294967280 }
  0x13   : > { %195 = sfence }
  0x14   : > { %p216_p6 = scmp.lt.s32.totalorder %s1271_s18, 1  ;;  %s236_s26 = sld [smem:[#allocation3]]  ;;  %vm671_vm0 = vcmask 1040384   ;;  %vm885_vm1 = vcmask 261120   ;;  %vm893_vm2 = vcmask 523264   ;;  %vm891_vm3 = vcmask 523265  }
  0x15   : > { %s1288_s27 = sld [smem:[#allocation3 + $0x1]]  ;;  %s1612_s23 = smov 1   ;;  %vm897_vm4 = vcmask 516096   ;;  %vm1192_vm5 = vcmask 517120   ;;  %vm1187_vm6 = vcmask 523266  }
  0x16   : > { %s2350_s18 = smov (!%p216_p6, %s1271_s18), 1  ;;  %s1294_s28 = sld [smem:[#allocation3 + $0x2]] }
  0x17   : > { %s1531_s29 = smul.u32 340, %s2350_s18  ;;  %s1300_s30 = sld [smem:[#allocation3 + $0x3]] }
  0x18   : > { %s1306_s5 = sld [smem:[#allocation3 + $0x4]] }
  0x19   : > { %s1668_s8 = scalar_lea.vmem %s2301_s0, %s1531_s29  ;;  %s1312_s9 = sld [smem:[#allocation3 + $0x5]] }
  0x1a   : > { %v1670_v0 = vstv %s236_s26  ;;  %v1673_v1 = vld [vmem:[%s1668_s8 + $0x8] sm:$0xff]   ;;  %v1676_v2 = vld [vmem:[%s1668_s8 + $0x18] sm:$0xff]   ;;  %v1681_v4 = vld [vmem:[%s1668_s8 + $0x30] sm:$0xff]   ;;  %s1318_s10 = sld [smem:[#allocation3 + $0x6]] }
  0x1b   : > { %v1678_v3 = vstv %s1288_s27  ;;  %v1408_v5 = vunpack.c.l.bf16 %v1673_v1  ;;  %v1413_v6 = vunpack.c.h.bf16 %v1676_v2  ;;  %v1686_v7 = vld [vmem:[%s1668_s8 + $0x40] sm:$0xff]   ;;  %v1689_v8 = vld [vmem:[%s1668_s8 + $0x58] sm:$0xff]   ;;  %v1420_v9 = vunpack.c.l.bf16 %v1681_v4  ;;  %v1695_v11 = vld [vmem:[%s1668_s8 + $0x68] sm:$0xff]   ;;  %s1324_s11 = sld [smem:[#allocation3 + $0x7]] }
  0x1c   : > { %v1692_v10 = vstv %s1294_s28  ;;  %v1425_v14 = vunpack.c.h.bf16 %v1686_v7  ;;  %v1432_v17 = vunpack.c.l.bf16 %v1689_v8  ;;  %v1707_v19 = vld [vmem:[%s1668_s8 + $0x80] sm:$0xff]   ;;  %s1330_s12 = sld [smem:[#allocation3 + $0x8]]  ;;  %v1437_v22 = vunpack.c.h.bf16 %v1695_v11  ;;  %v1714_v24 = vld [vmem:[%s1668_s8 + $0x90] sm:$0xff]   ;;  %v1721_v29 = vld [vmem:[%s1668_s8 + $0xa8] sm:$0xff]  }
  0x1d   : > { %v240_v12 = vmul.f32 %v1408_v5, %v1670_v0  ;;  %v258_v13 = vmul.f32 %v1413_v6, %v1678_v3  ;;  %v1700_v15 = vstv %s1300_s30  ;;  %v281_v16 = vmul.f32 %v1420_v9, %v1692_v10  ;;  %s1336_s13 = sld [smem:[#allocation3 + $0x9]]  ;;  %v1728_v34 = vld [vmem:[%s1668_s8 + $0xb8] sm:$0xff]   ;;  %v1735_v39 = vld [vmem:[%s1668_s8 + $0xd0] sm:$0xff]   ;;  %v1740_v43 = vld [vmem:[%s1668_s8 + $0xe0] sm:$0xff]  }
  0x1e   : > { %v1704_v18 = vstv %s1306_s5  ;;  %v304_v21 = vmul.f32 %v1425_v14, %v1700_v15  ;;  %v1444_v27 = vunpack.c.l.bf16 %v1707_v19  ;;  %s1342_s14 = sld [smem:[#allocation3 + $0xa]]  ;;  %v1449_v32 = vunpack.c.h.bf16 %v1714_v24  ;;  %2317 = vst [vmem:[#allocation9_spill] sm:$0xff] %v1740_v43  ;;  %v1752_v50 = vld [vmem:[%s1668_s8 + $0xf8] sm:$0xff]   ;;  %v1757_v51 = vld [vmem:[%s1668_s8] sm:$0xff]   ;;  %v1283_v55 = vld [vmem:[%s1668_s8 + $0x14] sm:$0xf] }
  0x1f   : > { %v263_v20 = vadd.f32 %v258_v13, %v240_v12  ;;  %v1711_v23 = vstv %s1312_s9  ;;  %v327_v26 = vmul.f32 %v1432_v17, %v1704_v18  ;;  %s1348_s15 = sld [smem:[#allocation3 + $0xb]]  ;;  %v1456_v37 = vunpack.c.l.bf16 %v1721_v29  ;;  %v1764_v56 = vld [vmem:[%s1668_s8 + $0x28] sm:$0xff]   ;;  %v1295_v59 = vld [vmem:[%s1668_s8 + $0x3c] sm:$0xf]  ;;  %v1777_v5 = vld [vmem:[%s1668_s8 + $0x50] sm:$0xff]  }
  0x20   : > { %v1718_v28 = vstv %s1318_s10  ;;  %v350_v31 = vmul.f32 %v1437_v22, %v1711_v23  ;;  %s1354_s16 = sld [smem:[#allocation3 + $0xc]]  ;;  %v1461_v42 = vunpack.c.h.bf16 %v1728_v34  ;;  %v1468_v47 = vunpack.c.l.bf16 %v1735_v39  ;;  %v1768_v58 = vld [vmem:[%s1668_s8 + $0x108] sm:$0xff]   ;;  %v1783_v12 = vld [vmem:[%s1668_s8 + $0x120] sm:$0xff]  }
  0x21   : > { %v286_v25 = vadd.f32 %v281_v16, %v263_v20  ;;  %v1725_v33 = vstv %s1324_s11  ;;  %v373_v36 = vmul.f32 %v1444_v27, %v1718_v28  ;;  %s1744_s19 = sld [smem:[#allocation3 + $0xd]]  ;;  %v1473_v49 = vunpack.c.h.bf16 %v1740_v43  ;;  %2318 = vst [vmem:[#allocation10_spill] sm:$0xff] %v1768_v58  ;;  %v1307_v22 = vld [vmem:[%s1668_s8 + $0x64] sm:$0xf] }
  0x22   : > { %v1732_v38 = vstv %s1330_s12  ;;  %v396_v41 = vmul.f32 %v1449_v32, %v1725_v33  ;;  %s1754_s20 = sld [smem:[#allocation3 + $0xe]]  ;;  %v1480_v62 = vunpack.c.l.bf16 %v1752_v50  ;;  %v1404_v63 = vunpack.c.l.bf16 %v1757_v51  ;;  %2319 = vst [vmem:[#allocation11_spill] sm:$0xff] %v1783_v12 }
  0x23   : > { %v309_v30 = vadd.f32 %v304_v21, %v286_v25  ;;  %v1742_v44 = vstv %s1336_s13  ;;  %v419_v46 = vmul.f32 %v1456_v37, %v1732_v38  ;;  %s1770_s21 = sld [smem:[#allocation3 + $0xf]]  ;;  %v249_v13 = vunpack.c.l.bf16 %v1283_v55  ;;  %s1614_s13 = smov 30  }
  0x24   : > { %v1748_v48 = vstv %s1342_s14  ;;  %v442_v53 = vmul.f32 %v1461_v42, %v1742_v44  ;;  %s1785_s3 = sld [smem:[#allocation3 + $0x10]]  ;;  %v1416_v14 = vunpack.c.l.bf16 %v1764_v56  ;;  %v1485_v17 = vunpack.c.h.bf16 %v1768_v58  ;;  %v1810_v42 = vld [vmem:[%s1668_s8 + $0x148] sm:$0xff]  }
  0x25   : > { %v332_v35 = vadd.f32 %v327_v26, %v309_v30  ;;  %v1760_v54 = vstv %s1348_s15  ;;  %v465_v61 = vmul.f32 %v1468_v47, %v1748_v48  ;;  %v238_v20 = vmul.f32 %v1404_v63, %v1670_v0  ;;  %v1795_v26 = vld [vmem:[%s1668_s8 + $0x130] sm:$0xff]   ;;  %2321 = vst [vmem:[#allocation13_spill] sm:$0xff] %v1810_v42  ;;  %s1828_s22 = sld [smem:[#allocation5 + $0x1]] }
  0x26   : > { %v488_v6 = vmul.f32 %v1473_v49, %v1760_v54  ;;  %v1780_v9 = vstv %s1354_s16  ;;  %v295_v21 = vunpack.c.l.bf16 %v1295_v59  ;;  %2320 = vst [vmem:[#allocation12_spill] sm:$0xff] %v1795_v26  ;;  %v256_v27 = vmul.f32 %v1678_v3, %v249_v13  ;;  %v1319_v59 = vld [vmem:[%s1668_s8 + $0x8c] sm:$0xf]  ;;  %v1823_v13 = vld [vmem:[%s1668_s8 + $0xa0] sm:$0xff]   ;;  %s1383_s24 = sld [smem:[#allocation5 + $0x5]]  ;;  %s1401_s16 = sshll.u32 %s2350_s18, 6 }
  0x27   : > { %v355_v40 = vadd.f32 %v350_v31, %v332_v35  ;;  %v1792_v25 = vstv %s1744_s19  ;;  %v279_v30 = vmul.f32 %v1416_v14, %v1692_v10  ;;  %v1428_v31 = vunpack.c.l.bf16 %v1777_v5  ;;  %v1305_v14 = vld [vmem:[%s1668_s8 + $0x60] sm:$0x1]  ;;  %s1381_s25 = sld [smem:[#allocation5 + $0x3]] }
  0x28   : > { %v1492_v37 = vunpack.c.l.bf16 %v1783_v12  ;;  %v341_v47 = vunpack.c.l.bf16 %v1307_v22  ;;  %v1497_v55 = vunpack.c.h.bf16 %v1795_v26  ;;  %s1385_s26 = sld [smem:[#allocation5 + $0x7]] }
  0x29   : > { %v378_v45 = vadd.f32 %v373_v36, %v355_v40  ;;  %v511_v36 = vmul.f32 %v1480_v62, %v1780_v9  ;;  %v1804_v40 = vld [vmem:[%s1668_s8 + $0x78] sm:$0xff]   ;;  %v325_v62 = vmul.f32 %v1428_v31, %v1704_v18  ;;  %s1387_s27 = sld [smem:[#allocation5 + $0x9]] }
  0x2a   : > { %v1440_v63 = vunpack.c.l.bf16 %v1804_v40  ;;  %v348_v22 = vmul.f32 %v1711_v23, %v341_v47  ;;  %s1391_s28 = sld [smem:[#allocation5 + $0xd]] }
  0x2b   : > { %v401_v52 = vadd.f32 %v396_v41, %v378_v45  ;;  %v1807_v41 = vstv %s1754_s20  ;;  %v261_v45 = vadd.f32 %v256_v27, %v238_v20  ;;  %v1831_v20 = vstv %s1785_s3  ;;  %s1389_s29 = sld [smem:[#allocation5 + $0xb]] }
  0x2c   : > { %v387_v27 = vunpack.c.l.bf16 %v1319_v59  ;;  %v371_v47 = vmul.f32 %v1440_v63, %v1718_v28  ;;  %v1843_v59 = vld [vmem:[%s1668_s8 + $0xc8] sm:$0xff]   ;;  %s1393_s30 = sld [smem:[#allocation5 + $0xf]] }
  0x2d   : > { %v424_v60 = vadd.f32 %v419_v46, %v401_v52  ;;  %v302_v46 = vmul.f32 %v1700_v15, %v295_v21  ;;  %2322 = vst [vmem:[#allocation14_spill] sm:$0xff] %v1843_v59  ;;  %s617_s5 = sld [smem:[#allocation5]] }
  0x2e   : > { %s1380_s6 = sld [smem:[#allocation5 + $0x2]] }
  0x2f   : > { %v447_v16 = vadd.f32 %v442_v53, %v424_v60  ;;  %v534_v53 = vmul.f32 %v1485_v17, %v1792_v25  ;;  %v1818_v60 = vstv %s1770_s21  ;;  %v1504_v17 = vunpack.c.l.bf16 %v1810_v42  ;;  %s616_s7 = sld [smem:[#allocation2]]  ;;  %s2270_s21 = scalar_lea.vmem %s2305_s4, %s1401_s16 }
  0x30   : > { %s1382_s9 = sld [smem:[#allocation5 + $0x4]] }
  0x31   : > { %v470_v35 = vadd.f32 %v465_v61, %v447_v16  ;;  %v284_v61 = vadd.f32 %v279_v30, %v261_v45  ;;  %v230_v45 = vld [vmem:[%s1668_s8 + $0x10] sm:$0x1]  ;;  %v603_v32 = vmul.f32 %v1504_v17, %v1831_v20  ;;  %v1293_v30 = vld [vmem:[%s1668_s8 + $0x38] sm:$0x1]  ;;  %s1384_s10 = sld [smem:[#allocation5 + $0x6]] }
  0x32   : > { %s1388_s11 = sld [smem:[#allocation5 + $0xa]] }
  0x33   : > { %v493_v52 = vadd.f32 %v488_v6, %v470_v35  ;;  %v557_v6 = vmul.f32 %v1492_v37, %v1807_v41  ;;  %v307_v21 = vadd.f32 %v302_v46, %v284_v61  ;;  %v580_v35 = vmul.f32 %v1497_v55, %v1818_v60  ;;  %v1331_v37 = vld [vmem:[%s1668_s8 + $0xb4] sm:$0xf]  ;;  %v1287_v61 = vld [vmem:[%s1668_s8 + $0x24] sm:$0x1]  ;;  %s1386_s12 = sld [smem:[#allocation5 + $0x8]] }
  0x34   : > { %v433_v63 = vunpack.c.l.bf16 %v1331_v37  ;;  %v1464_v55 = vunpack.c.l.bf16 %v1843_v59  ;;  %v1859_v37 = vstv %s1828_s22  ;;  %v1353_v59 = vld [vmem:[%s1668_s8 + $0x100] sm:$0x1]  ;;  %s1392_s14 = sld [smem:[#allocation5 + $0xe]] }
  0x35   : > { %v516_v16 = vadd.f32 %v511_v36, %v493_v52  ;;  %v1452_v36 = vunpack.c.l.bf16 %v1823_v13  ;;  %v330_v46 = vadd.f32 %v325_v62, %v307_v21  ;;  %v1299_v52 = vld [vmem:[%s1668_s8 + $0x4c] sm:$0x1]  ;;  %v394_v62 = vmul.f32 %v1725_v33, %v387_v27  ;;  %v1311_v27 = vld [vmem:[%s1668_s8 + $0x74] sm:$0x1]  ;;  %s1390_s15 = sld [smem:[#allocation5 + $0xc]] }
  0x36   : > { %v235_v21 = vunpack.c.l.bf16 %v230_v45  ;;  %v1862_v45 = vld [vmem:[%s1668_s8 + $0xf0] sm:$0xff]   ;;  %v345_v43 = vunpack.c.l.bf16 %v1311_v27 }
  0x37   : > { %v539_v31 = vadd.f32 %v534_v53, %v516_v16  ;;  %v353_v49 = vadd.f32 %v348_v22, %v330_v46  ;;  %v417_v53 = vmul.f32 %v1452_v36, %v1732_v38  ;;  %v276_v22 = vunpack.c.l.bf16 %v1293_v30  ;;  %2323 = vst [vmem:[#allocation15_spill] sm:$0xff] %v1862_v45  ;;  %v1317_v30 = vld [vmem:[%s1668_s8 + $0x88] sm:$0x1] }
  0x38   : > { %v242_v26 = vmul.f32 %v1670_v0, %v235_v21  ;;  %v299_v46 = vunpack.c.l.bf16 %v1299_v52 }
  0x39   : > { %v562_v16 = vadd.f32 %v557_v6, %v539_v31  ;;  %v1343_v6 = vld [vmem:[%s1668_s8 + $0xdc] sm:$0xf]  ;;  %v253_v31 = vunpack.c.l.bf16 %v1287_v61  ;;  %v376_v17 = vadd.f32 %v371_v47, %v353_v49  ;;  %v440_v61 = vmul.f32 %v1742_v44, %v433_v63 }
  0x3a   : > { %v479_v49 = vunpack.c.l.bf16 %v1343_v6  ;;  %v283_v47 = vmul.f32 %v1692_v10, %v276_v22  ;;  %v306_v21 = vmul.f32 %v1700_v15, %v299_v46  ;;  %v1323_v6 = vld [vmem:[%s1668_s8 + $0x9c] sm:$0x1] }
  0x3b   : > { %v585_v57 = vadd.f32 %v580_v35, %v562_v16  ;;  %v1355_v35 = vld [vmem:[%s1668_s8 + $0x104] sm:$0xf]  ;;  %v260_v36 = vmul.f32 %v1678_v3, %v253_v31  ;;  %v322_v16 = vunpack.c.l.bf16 %v1305_v14  ;;  %v399_v42 = vadd.f32 %v394_v62, %v376_v17 }
  0x3c   : > { %v463_v14 = vmul.f32 %v1464_v55, %v1748_v48  ;;  %v1476_v62 = vunpack.c.l.bf16 %v1862_v45  ;;  %v525_v63 = vunpack.c.l.bf16 %v1355_v35  ;;  %v1367_v55 = vld [vmem:[%s1668_s8 + $0x12c] sm:$0xf] }
  0x3d   : > { %v608_v58 = vadd.f32 %v603_v32, %v585_v57  ;;  %v1872_v57 = vld [vmem:[%s1668_s8 + $0x118] sm:$0xff]   ;;  %v265_v32 = vadd.f32 %v260_v36, %v242_v26  ;;  %v422_v31 = vadd.f32 %v417_v53, %v399_v42  ;;  %v329_v22 = vmul.f32 %v1704_v18, %v322_v16  ;;  %v1329_v36 = vld [vmem:[%s1668_s8 + $0xb0] sm:$0x1] }
  0x3e   : > { %2325 = vst [vmem:[#allocation17_spill] sm:$0xff] %v1872_v57  ;;  %v368_v26 = vunpack.c.l.bf16 %v1317_v30  ;;  %v486_v42 = vmul.f32 %v1760_v54, %v479_v49  ;;  %v1488_v53 = vunpack.c.l.bf16 %v1872_v57  ;;  %v352_v30 = vmul.f32 %v1711_v23, %v345_v43  ;;  %v1298_v43 = vld [vmem:[%s1668_s8 + $0x48] sm:$0xf] }
  0x3f   : > { %v1869_v52 = vmax.f32 %v608_v58, 0.0  ;;  %v288_v58 = vadd.f32 %v283_v47, %v265_v32  ;;  %v445_v27 = vadd.f32 %v440_v61, %v422_v31  ;;  %v1889_v47 = vld [vmem:[%s1668_s8 + $0x140] sm:$0xff]   ;;  %v391_v32 = vunpack.c.l.bf16 %v1323_v6 }
  0x40   : > { %2326 = vst [vmem:[#allocation18_spill] sm:$0xff] %v1889_v47  ;;  %v1335_v61 = vld [vmem:[%s1668_s8 + $0xc4] sm:$0x1]  ;;  %v509_v46 = vmul.f32 %v1476_v62, %v1780_v9  ;;  %v532_v57 = vmul.f32 %v1792_v25, %v525_v63  ;;  %v571_v35 = vunpack.c.l.bf16 %v1367_v55  ;;  %v375_v12 = vmul.f32 %v1718_v28, %v368_v26 }
  0x41   : > { %2324 = vst [vmem:[#allocation16_spill] sm:$0xff] %v1869_v52  ;;  %v633_v17 = vmul.f32 %v1859_v37, %v1869_v52  ;;  %v311_v16 = vadd.f32 %v306_v21, %v288_v58  ;;  %v468_v31 = vadd.f32 %v463_v14, %v445_v27  ;;  %v414_v52 = vunpack.c.l.bf16 %v1329_v36  ;;  %v1341_v21 = vld [vmem:[%s1668_s8 + $0xd8] sm:$0x1]  ;;  %v1347_v27 = vld [vmem:[%s1668_s8 + $0xec] sm:$0x1] }
  0x42   : > { %v555_v58 = vmul.f32 %v1488_v53, %v1807_v41  ;;  %v1500_v49 = vunpack.c.l.bf16 %v1889_v47  ;;  %v437_v14 = vunpack.c.l.bf16 %v1335_v61  ;;  %v398_v36 = vmul.f32 %v1725_v33, %v391_v32 }
  0x43   : > { %645 = vrot.lane.b32.xlu1 %v633_v17, %s1612_s23  ;;  %v1286_v17 = vld [vmem:[%s1668_s8 + $0x20] sm:$0xf]  ;;  %v334_v45 = vadd.f32 %v329_v22, %v311_v16  ;;  %v491_v6 = vadd.f32 %v486_v42, %v468_v31  ;;  %v2327_v63 = vunpack.c.h.bf16 %v1673_v1  ;;  %v421_v42 = vmul.f32 %v1732_v38, %v414_v52  ;;  %v1310_v31 = vld [vmem:[%s1668_s8 + $0x70] sm:$0xf] }
  0x44   : > { %v252_v26 = vunpack.c.l.bf16 %v1286_v17  ;;  %v460_v16 = vunpack.c.l.bf16 %v1341_v21  ;;  %v298_v53 = vunpack.c.l.bf16 %v1298_v43  ;;  %v483_v61 = vunpack.c.l.bf16 %v1347_v27  ;;  %v1359_v21 = vld [vmem:[%s1668_s8 + $0x114] sm:$0x1]  ;;  %v1365_v43 = vld [vmem:[%s1668_s8 + $0x128] sm:$0x1] }
  0x45   : > { %v357_v62 = vadd.f32 %v352_v30, %v334_v45  ;;  %v241_v22 = vmul.f32 %v2327_v63, %v1670_v0  ;;  %v514_v55 = vadd.f32 %v509_v46, %v491_v6  ;;  %v2328_v30 = vunpack.c.h.bf16 %v1681_v4 }
  0x46   : > { %v259_v45 = vmul.f32 %v1678_v3, %v252_v26  ;;  %v578_v63 = vmul.f32 %v1818_v60, %v571_v35  ;;  %v444_v46 = vmul.f32 %v1742_v44, %v437_v14  ;;  %v506_v17 = vunpack.c.l.bf16 %v1353_v59  ;;  %v1371_v59 = vld [vmem:[%s1668_s8 + $0x13c] sm:$0x1] }
  0x47   : > { %v380_v47 = vadd.f32 %v375_v12, %v357_v62  ;;  %v282_v32 = vmul.f32 %v2328_v30, %v1692_v10  ;;  %v537_v1 = vadd.f32 %v532_v57, %v514_v55  ;;  %v305_v12 = vmul.f32 %v1700_v15, %v298_v53  ;;  %v1322_v55 = vld [vmem:[%s1668_s8 + $0x98] sm:$0xf] }
  0x48   : > { %v264_v6 = vadd.f32 %v259_v45, %v241_v22  ;;  %v344_v27 = vunpack.c.l.bf16 %v1310_v31  ;;  %v1441_v62 = vunpack.c.h.bf16 %v1804_v40  ;;  %v601_v4 = vmul.f32 %v1500_v49, %v1831_v20 }
  0x49   : > { %v403_v52 = vadd.f32 %v398_v36, %v380_v47  ;;  %v560_v26 = vadd.f32 %v555_v58, %v537_v1  ;;  %v467_v57 = vmul.f32 %v1748_v48, %v460_v16  ;;  %v490_v14 = vmul.f32 %v1760_v54, %v483_v61  ;;  %v1334_v61 = vld [vmem:[%s1668_s8 + $0xc0] sm:$0xf] }
  0x4a   : > { %v287_v47 = vadd.f32 %v282_v32, %v264_v6  ;;  %v2329_v36 = vunpack.c.h.bf16 %v1689_v8  ;;  %v513_v40 = vmul.f32 %v1780_v9, %v506_v17  ;;  %v529_v58 = vunpack.c.l.bf16 %v1359_v21  ;;  %v1377_v21 = vld [vmem:[%s1668_s8 + $0x150] sm:$0x1] }
  0x4b   : > { %v426_v35 = vadd.f32 %v421_v42, %v403_v52  ;;  %v583_v53 = vadd.f32 %v578_v63, %v560_v26  ;;  %v552_v31 = vunpack.c.l.bf16 %v1365_v43  ;;  %v351_v16 = vmul.f32 %v1711_v23, %v344_v27 }
  0x4c   : > { %v328_v22 = vmul.f32 %v2329_v36, %v1704_v18  ;;  %v310_v45 = vadd.f32 %v305_v12, %v287_v47  ;;  %v390_v30 = vunpack.c.l.bf16 %v1322_v55  ;;  %v575_v1 = vunpack.c.l.bf16 %v1371_v59 }
  0x4d   : > { %v449_v49 = vadd.f32 %v444_v46, %v426_v35  ;;  %v606_v42 = vadd.f32 %v601_v4, %v583_v53  ;;  %v2330_v32 = vunpack.c.h.bf16 %v1757_v51  ;;  %v2331_v8 = vunpack.c.l.bf16 %v1676_v2 }
  0x4e   : > { %v333_v43 = vadd.f32 %v328_v22, %v310_v45  ;;  %v2332_v46 = vunpack.c.h.bf16 %v1707_v19  ;;  %v2333_v12 = vunpack.c.h.bf16 %v1764_v56  ;;  %v2334_v2 = vunpack.c.l.bf16 %v1686_v7  ;;  %v1346_v56 = vld [vmem:[%s1668_s8 + $0xe8] sm:$0xf] }
  0x4f   : > { %v239_v52 = vmul.f32 %v2330_v32, %v1670_v0  ;;  %v257_v63 = vmul.f32 %v2331_v8, %v1678_v3  ;;  %v472_v17 = vadd.f32 %v467_v57, %v449_v49  ;;  %v1944_v26 = vmax.f32 %v606_v42, 0.0 }
  0x50   : > { %v374_v6 = vmul.f32 %v2332_v46, %v1718_v28  ;;  %v280_v27 = vmul.f32 %v2333_v12, %v1692_v10  ;;  %v536_v0 = vmul.f32 %v1792_v25, %v529_v58  ;;  %v303_v3 = vmul.f32 %v2334_v2, %v1700_v15 }
  0x51   : > { %v262_v51 = vadd.f32 %v257_v63, %v239_v52  ;;  %v495_v4 = vadd.f32 %v490_v14, %v472_v17  ;;  %v356_v57 = vadd.f32 %v351_v16, %v333_v43  ;;  %v397_v55 = vmul.f32 %v1725_v33, %v390_v30 }
  0x52   : > { %v436_v35 = vunpack.c.l.bf16 %v1334_v61  ;;  %v631_v19 = vmul.f32 %v1859_v37, %v1944_v26  ;;  %v598_v59 = vunpack.c.l.bf16 %v1377_v21  ;;  %v2335_v47 = vunpack.c.h.bf16 %v1777_v5 }
  0x53   : > { %v285_v10 = vadd.f32 %v280_v27, %v262_v51  ;;  %v518_v22 = vadd.f32 %v513_v40, %v495_v4  ;;  %v559_v7 = vmul.f32 %v1807_v41, %v552_v31  ;;  %v379_v15 = vadd.f32 %v374_v6, %v356_v57  ;;  %v2339_v6 = vld [vmem:[#allocation14_spill] sm:$0xff] }
  0x54   : > { %v326_v36 = vmul.f32 %v2335_v47, %v1704_v18  ;;  %v2336_v14 = vunpack.c.h.bf16 %v1721_v29  ;;  %v1448_v58 = vunpack.c.l.bf16 %v1714_v24  ;;  %641 = vrot.lane.b32.xlu0 %v631_v19, %s1612_s23  ;;  %v582_v49 = vmul.f32 %v1818_v60, %v575_v1  ;;  %v1358_v24 = vld [vmem:[%s1668_s8 + $0x110] sm:$0xf] }
  0x55   : > { %v308_v45 = vadd.f32 %v303_v3, %v285_v10  ;;  %v2337_v5 = vunpack.c.l.bf16 %v1695_v11  ;;  %v541_v16 = vadd.f32 %v536_v0, %v518_v22  ;;  %v402_v40 = vadd.f32 %v397_v55, %v379_v15  ;;  %v2340_v0 = vld [vmem:[#allocation11_spill] sm:$0xff]  ;;  %v2341_v3 = vld [vmem:[#allocation9_spill] sm:$0xff] }
  0x56   : > { %v420_v53 = vmul.f32 %v2336_v14, %v1732_v38  ;;  %v443_v31 = vmul.f32 %v1742_v44, %v436_v35  ;;  %v482_v30 = vunpack.c.l.bf16 %v1346_v56  ;;  %v1481_v42 = vunpack.c.h.bf16 %v1752_v50  ;;  %v2342_v56 = vld [vmem:[#allocation15_spill] sm:$0xff] }
  0x57   : > { %v349_v18 = vmul.f32 %v2337_v5, %v1711_v23  ;;  %v1453_v29 = vunpack.c.h.bf16 %v1823_v13  ;;  %v331_v61 = vadd.f32 %v326_v36, %v308_v45  ;;  %v372_v32 = vmul.f32 %v1441_v62, %v1718_v28  ;;  %v1370_v62 = vld [vmem:[%s1668_s8 + $0x138] sm:$0xf]  ;;  %v2343_v36 = vld [vmem:[#allocation13_spill] sm:$0xff]  ;;  %s1613_s8 = smov 127  }
  0x58   : > { %v564_v1 = vadd.f32 %v559_v7, %v541_v16  ;;  %v605_v52 = vmul.f32 %v1831_v20, %v598_v59  ;;  %v425_v8 = vadd.f32 %v420_v53, %v402_v40  ;;  %v2338_v11 = vunpack.c.h.bf16 %v1735_v39 }
  0x59   : > { %v1460_v63 = vunpack.c.l.bf16 %v1728_v34  ;;  %v354_v17 = vadd.f32 %v349_v18, %v331_v61  ;;  %v395_v50 = vmul.f32 %v1448_v58, %v1725_v33  ;;  %v489_v43 = vmul.f32 %v1760_v54, %v482_v30  ;;  %v2345_v18 = vld [vmem:[#allocation17_spill] sm:$0xff] }
  0x5a   : > { %v466_v23 = vmul.f32 %v2338_v11, %v1748_v48  ;;  %v587_v21 = vadd.f32 %v582_v49, %v564_v1  ;;  %v448_v13 = vadd.f32 %v443_v31, %v425_v8  ;;  %v528_v46 = vunpack.c.l.bf16 %v1358_v24 }
  0x5b   : > { %v1465_v28 = vunpack.c.h.bf16 %v2339_v6  ;;  %v377_v12 = vadd.f32 %v372_v32, %v354_v17  ;;  %v418_v27 = vmul.f32 %v1453_v29, %v1732_v38  ;;  %v1493_v51 = vunpack.c.h.bf16 %v2340_v0 }
  0x5c   : > { %v610_v39 = vadd.f32 %v605_v52, %v587_v21  ;;  %v471_v2 = vadd.f32 %v466_v23, %v448_v13  ;;  %v512_v34 = vmul.f32 %v1481_v42, %v1780_v9  ;;  %v1472_v4 = vunpack.c.l.bf16 %v2341_v3  ;;  %v2346_v42 = vld [vmem:[#allocation12_spill] sm:$0xff] }
  0x5d   : > { %v400_v33 = vadd.f32 %v395_v50, %v377_v12  ;;  %v441_v57 = vmul.f32 %v1460_v63, %v1742_v44  ;;  %v535_v19 = vmul.f32 %v1792_v25, %v528_v46  ;;  %v574_v59 = vunpack.c.l.bf16 %v1370_v62  ;;  %v2344_v44 = vld [vmem:[#allocation10_spill] sm:$0xff] }
  0x5e   : > { %v1986_v55 = vmax.f32 %v610_v39, 0.0  ;;  %v494_v35 = vadd.f32 %v489_v43, %v471_v2  ;;  %v1477_v10 = vunpack.c.h.bf16 %v2342_v56  ;;  %v464_v47 = vmul.f32 %v1465_v28, %v1748_v48 }
  0x5f   : > { %v423_v38 = vadd.f32 %v418_v27, %v400_v33  ;;  %v1505_v22 = vunpack.c.h.bf16 %v2343_v36  ;;  %v558_v14 = vmul.f32 %v1493_v51, %v1807_v41  ;;  %v1484_v53 = vunpack.c.l.bf16 %v2344_v44 }
  0x60   : > { %v635_v7 = vmul.f32 %v1859_v37, %v1986_v55  ;;  %v517_v15 = vadd.f32 %v512_v34, %v494_v35  ;;  %v487_v49 = vmul.f32 %v1472_v4, %v1760_v54  ;;  %v581_v5 = vmul.f32 %v1818_v60, %v574_v59  ;;  %v2347_v54 = vld [vmem:[#allocation18_spill] sm:$0xff] }
  0x61   : > { %v446_v58 = vadd.f32 %v441_v57, %v423_v38  ;;  %v1489_v48 = vunpack.c.h.bf16 %v2345_v18  ;;  %v510_v40 = vmul.f32 %v1477_v10, %v1780_v9  ;;  %v604_v30 = vmul.f32 %v1505_v22, %v1831_v20 }
  0x62   : > { %649 = vrot.lane.b32.xlu2 %v635_v7, %s1612_s23  ;;  %v540_v45 = vadd.f32 %v535_v19, %v517_v15  ;;  %v1496_v29 = vunpack.c.l.bf16 %v2346_v42  ;;  %v533_v61 = vmul.f32 %v1484_v53, %v1792_v25  ;;  %v1501_v1 = vunpack.c.h.bf16 %v2347_v54 }
  0x63   : > { %v469_v16 = vadd.f32 %v464_v47, %v446_v58  ;;  %v556_v8 = vmul.f32 %v1489_v48, %v1807_v41  ;;  %v745_v43 = vstv %s1383_s24  ;;  %v690_v27 = vstv %s1381_s25 }
  0x64   : > { %v563_v31 = vadd.f32 %v558_v14, %v540_v45  ;;  %v579_v63 = vmul.f32 %v1496_v29, %v1818_v60  ;;  %v602_v50 = vmul.f32 %v1501_v1, %v1831_v20  ;;  %v746_v41 = vmul.f32 %v745_v43, %v1944_v26  ;;  %v2348_v20 = vld [vmem:[#allocation16_spill] sm:$0xff] }
  0x65   : > { %v492_v24 = vadd.f32 %v487_v49, %v469_v16  ;;  %v748_v28 = vmul.f32 %v745_v43, %v2348_v20  ;;  %v750_v62 = vmul.f32 %v745_v43, %v1986_v55  ;;  %v804_v0 = vstv %s1385_s26 }
  0x66   : > { %v586_v32 = vadd.f32 %v581_v5, %v563_v31  ;;  %v691_v51 = vmul.f32 %v690_v27, %v1944_v26  ;;  %v693_v4 = vmul.f32 %v690_v27, %v2348_v20  ;;  %v805_v57 = vmul.f32 %v804_v0, %v1944_v26 }
  0x67   : > { %v515_v52 = vadd.f32 %v510_v40, %v492_v24  ;;  %v807_v38 = vmul.f32 %v804_v0, %v2348_v20  ;;  %v912_v44 = vstv %s1387_s27  ;;  %v1033_v45 = vstv %s1391_s28 }
  0x68   : > { %v609_v11 = vadd.f32 %v604_v30, %v586_v32  ;;  %v699_v34 = vrot.slane %v691_v51, 7  ;;  %v702_v35 = vrot.slane %v693_v4, 7  ;;  %v813_v59 = vrot.slane %v805_v57, 7 }
  0x69   : > { %v538_v23 = vadd.f32 %v533_v61, %v515_v52  ;;  %v816_v22 = vrot.slane %v807_v38, 7  ;;  %v915_v53 = vmul.f32 %v912_v44, %v2348_v20  ;;  %v913_v5 = vmul.f32 %v912_v44, %v1944_v26 }
  0x6a   : > { %v2007_v9 = vmax.f32 %v609_v11, 0.0  ;;  %v1034_v18 = vmul.f32 %v1033_v45, %v1944_v26  ;;  %v917_v48 = vmul.f32 %v912_v44, %v1986_v55  ;;  %v975_v40 = vstv %s1389_s29 }
  0x6b   : > { %v561_v17 = vadd.f32 %v556_v8, %v538_v23  ;;  %v1036_v30 = vmul.f32 %v1033_v45, %v2348_v20  ;;  %v976_v42 = vmul.f32 %v975_v40, %v1944_v26  ;;  %v980_v1 = vmul.f32 %v975_v40, %v1986_v55 }
  0x6c   : > { %v634_v21 = vmul.f32 %v1859_v37, %v2007_v9  ;;  %v749_v12 = vmul.f32 %v745_v43, %v2007_v9  ;;  %v808_v39 = vmul.f32 %v804_v0, %v2007_v9  ;;  %v916_v16 = vmul.f32 %v912_v44, %v2007_v9 }
  0x6d   : > { %v584_v25 = vadd.f32 %v579_v63, %v561_v17  ;;  %v1037_v31 = vmul.f32 %v1033_v45, %v2007_v9  ;;  %v986_v24 = vrot.slane %v976_v42, 7  ;;  %v978_v52 = vmul.f32 %v975_v40, %v2348_v20 }
  0x6e   : > { %647 = vrot.lane.b32.xlu1 %v634_v21, %s1612_s23  ;;  %v818_v3 = vrot.slane %v808_v39, 7  ;;  %v979_v8 = vmul.f32 %v975_v40, %v2007_v9  ;;  %v993_v11 = vrot.slane %v980_v1, 7  ;;  %v1096_v17 = vstv %s1393_s30 }
  0x6f   : > { %v607_v13 = vadd.f32 %v602_v50, %v584_v25  ;;  %v989_v23 = vrot.slane %v978_v52, 7  ;;  %v1038_v50 = vmul.f32 %v1033_v45, %v1986_v55  ;;  %v2102_v4 = vstv %s617_s5 }
  0x70   : > { %v819_v58 = vsel %vm671_vm0, %v816_v22, %v818_v3  ;;  %v991_v63 = vrot.slane %v979_v8, 7  ;;  %v621_v1 = vmul.f32 %v2102_v4, %v2348_v20 }
  0x71   : > { %v2013_v46 = vmax.f32 %v607_v13, 0.0  ;;  %v1097_v13 = vmul.f32 %v1096_v17, %v1944_v26 }
  0x72   : > { %v994_v21 = vsel %vm671_vm0, %v991_v63, %v993_v11  ;;  %v992_v25 = vsel %vm671_vm0, %v989_v23, %v991_v63 }
  0x73   : > { %v632_v60 = vmul.f32 %v1859_v37, %v2013_v46  ;;  %v747_v6 = vmul.f32 %v745_v43, %v2013_v46  ;;  %v694_v37 = vmul.f32 %v690_v27, %v2007_v9  ;;  %v692_v33 = vmul.f32 %v690_v27, %v2013_v46 }
  0x74   : > { %v806_v10 = vmul.f32 %v804_v0, %v2013_v46  ;;  %v914_v49 = vmul.f32 %v912_v44, %v2013_v46  ;;  %v977_v29 = vmul.f32 %v975_v40, %v2013_v46  ;;  %v1035_v32 = vmul.f32 %v1033_v45, %v2013_v46 }
  0x75   : > { %643 = vrot.lane.b32.xlu0 %v632_v60, %s1612_s23  ;;  %758 = vrot.lane.b32.xlu2 %v747_v6, %s1612_s23  ;;  %v704_v2 = vrot.slane %v694_v37, 7  ;;  %v700_v19 = vrot.slane %v692_v33, 7  ;;  %v1098_v43 = vmul.f32 %v1096_v17, %v2013_v46  ;;  %v1107_v60 = vrot.slane %v1097_v13, 7 }
  0x76   : > { %756 = vrot.lane.b32.xlu1 %v746_v41, %s1612_s23  ;;  %v814_v36 = vrot.slane %v806_v10, 7  ;;  %v987_v61 = vrot.slane %v977_v29, 7  ;;  %v1099_v41 = vmul.f32 %v1096_v17, %v2348_v20  ;;  %v1100_v0 = vmul.f32 %v1096_v17, %v2007_v9 }
  0x77   : > { %v705_v56 = vsel %vm671_vm0, %v702_v35, %v704_v2  ;;  %v703_v47 = vsel %vm671_vm0, %v700_v19, %v702_v35  ;;  %v701_v7 = vsel %vm671_vm0, %v699_v34, %v700_v19  ;;  %v1108_v6 = vrot.slane %v1098_v43, 7 }
  0x78   : > { %v817_v15 = vsel %vm671_vm0, %v814_v36, %v816_v22  ;;  %v815_v14 = vsel %vm671_vm0, %v813_v59, %v814_v36  ;;  %v988_v54 = vsel %vm671_vm0, %v986_v24, %v987_v61  ;;  %v1101_v37 = vmul.f32 %v1096_v17, %v1986_v55 }
  0x79   : > { %v1109_v27 = vsel %vm671_vm0, %v1107_v60, %v1108_v6  ;;  %v1112_v39 = vrot.slane %v1100_v0, 7  ;;  %v662_v33 = vstv %s1380_s6  ;;  %v619_v35 = vmul.f32 %v2102_v4, %v1944_v26 }
  0x7a   : > { %v2108_v19 = vmul.f32 %v662_v33, %v1944_v26  ;;  %v665_v36 = vmul.f32 %v662_v33, %v2348_v20  ;;  %v2116_v22 = vmul.f32 %v662_v33, %v2007_v9  ;;  %v620_v43 = vmul.f32 %v2102_v4, %v2013_v46 }
  0x7d   : > { %760 = vrot.lane.b32.xlu0 %v748_v28, %s1612_s23  ;;  %764 = vrot.lane.b32.xlu2 %v750_v62, %s1612_s23  ;;  %v1110_v28 = vrot.slane %v1099_v41, 7  ;;  %v990_v62 = vsel %vm671_vm0, %v987_v61, %v989_v23  ;;  %v733_v23 = vstv %s1382_s9 }
  0x7e   : > { %762 = vrot.lane.b32.xlu1 %v749_v12, %s1612_s23  ;;  %v738_v0 = vmul.f32 %v733_v23, %v1986_v55 }
  0x7f   : > { %v1111_v12 = vsel %vm671_vm0, %v1108_v6, %v1110_v28  ;;  %v1113_v57 = vsel %vm671_vm0, %v1110_v28, %v1112_v39 }
  0x85   : > { %714 = vrot.lane.b32.xlu0 %v704_v2, %s1612_s23  ;;  %706 = vrot.lane.b32.xlu2 %v699_v34, %s1612_s23  ;;  %v1114_v2 = vrot.slane %v1101_v37, 7 }
  0x86   : > { %828 = vrot.lane.b32.xlu1 %v818_v3, %s1612_s23 }
  0x87   : > { %v1115_v34 = vsel %vm671_vm0, %v1112_v39, %v1114_v2 }
  0x8d   : > { %820 = vrot.lane.b32.xlu0 %v813_v59, %s1612_s23  ;;  %712 = vrot.lane.b32.xlu2 %v705_v56, %s1612_s23 }
  0x8e   : > { %710 = vrot.lane.b32.xlu1 %v703_v47, %s1612_s23  ;;  %v672_v47 = vrot.slane %v2108_v19, 7 }
  0x95   : > { %708 = vrot.lane.b32.xlu0 %v701_v7, %s1612_s23  ;;  %824 = vrot.lane.b32.xlu2 %v817_v15, %s1612_s23  ;;  %v622_v15 = vmul.f32 %v2102_v4, %v2007_v9 }
  0x96   : > { %822 = vrot.lane.b32.xlu1 %v815_v14, %s1612_s23  ;;  %v2120_v14 = vstv %s616_s7 }
  0x9d   : > { %826 = vrot.lane.b32.xlu0 %v819_v58, %s1612_s23  ;;  %927 = vrot.lane.b32.xlu2 %v915_v53, %s1612_s23  ;;  %v675_v53 = vrot.slane %v665_v36, 7  ;;  %v677_v58 = vrot.slane %v2116_v22, 7  ;;  %v737_v36 = vmul.f32 %v733_v23, %v2007_v9 }
  0x9e   : > { %925 = vrot.lane.b32.xlu1 %v914_v49, %s1612_s23 }
  0xa5   : > { %923 = vrot.lane.b32.xlu0 %v913_v5, %s1612_s23  ;;  %1044 = vrot.lane.b32.xlu2 %v1034_v18, %s1612_s23  ;;  %v678_v18 = vsel %vm671_vm0, %v675_v53, %v677_v58 }
  0xa6   : > { %931 = vrot.lane.b32.xlu1 %v917_v48, %s1612_s23 }
  0xad   : > { %929 = vrot.lane.b32.xlu0 %v916_v16, %s1612_s23  ;;  %1050 = vrot.lane.b32.xlu2 %v1037_v31, %s1612_s23 }
  0xae   : > { %1048 = vrot.lane.b32.xlu1 %v1036_v30, %s1612_s23 }
  0xb5   : > { %1046 = vrot.lane.b32.xlu0 %v1035_v32, %s1612_s23  ;;  %997 = vrot.lane.b32.xlu2 %v988_v54, %s1612_s23  ;;  %v646_v56 = vpop.permute.xlu1 %645  ;;  %v664_v54 = vmul.f32 %v662_v33, %v2013_v46 }
  0xb6   : > { %995 = vrot.lane.b32.xlu1 %v986_v24, %s1612_s23  ;;  %v658_v17 = vadd.f32 %v646_v56, %v621_v1  ;;  %v944_v1 = vstv %s1388_s11 }
  0xb7   : > { %v673_v63 = vrot.slane %v664_v54, 7 }
  0xb9   : > { %v676_v13 = vsel %vm671_vm0, %v673_v63, %v675_v53 }
  0xbc   : > { %v2093_v51 = vpop.permute.xlu2 %649 }
  0xbd   : > { %1052 = vrot.lane.b32.xlu0 %v1038_v50, %s1612_s23  ;;  %1003 = vrot.lane.b32.xlu2 %v994_v21, %s1612_s23  ;;  %v734_v50 = vmul.f32 %v733_v23, %v1944_v26  ;;  %v777_v21 = vstv %s1384_s10 }
  0xbe   : > { %1001 = vrot.lane.b32.xlu1 %v992_v25, %s1612_s23  ;;  %v778_v25 = vmul.f32 %v777_v21, %v1944_v26  ;;  %v779_v41 = vmul.f32 %v777_v21, %v2013_v46  ;;  %v781_v19 = vmul.f32 %v777_v21, %v2007_v9 }
  0xc0   : > { %v787_v33 = vrot.slane %v779_v41, 7 }
  0xc5   : > { %999 = vrot.lane.b32.xlu0 %v990_v62, %s1612_s23  ;;  %1120 = vrot.lane.b32.xlu2 %v1111_v12, %s1612_s23  ;;  %v686_v62 = vadd.f32 %v676_v13, %v658_v17  ;;  %v786_v12 = vrot.slane %v778_v25, 7  ;;  %v2182_v25 = vmul.f32 %v944_v1, %v2013_v46 }
  0xc6   : > { %1118 = vrot.lane.b32.xlu1 %v1109_v27, %s1612_s23  ;;  %v642_v59 = vpop.permute.xlu0 %641 }
  0xc7   : > { %v656_v38 = vadd.f32 %v642_v59, %v619_v35 }
  0xc9   : > { %v684_v7 = vadd.f32 %v672_v47, %v656_v38  ;;  %v623_v38 = vmul.f32 %v2102_v4, %v1986_v55 }
  0xcd   : > { %1116 = vrot.lane.b32.xlu0 %v1107_v60, %s1612_s23  ;;  %v735_v60 = vmul.f32 %v733_v23, %v2013_v46 }
  0xce   : > { %1124 = vrot.lane.b32.xlu1 %v1115_v34, %s1612_s23  ;;  %v780_v34 = vmul.f32 %v777_v21, %v2348_v20  ;;  %v2178_v21 = vstv %s1386_s12 }
  0xcf   : > { %v2100_v3 = vpop.permute.xlu2 %758 }
  0xd0   : > { %v772_v35 = vadd.f32 %v2100_v3, %v735_v60  ;;  %v791_v3 = vrot.slane %v781_v19, 7 }
  0xd5   : > { %1122 = vrot.lane.b32.xlu0 %v1113_v57, %s1612_s23  ;;  %v674_v57 = vsel %vm671_vm0, %v672_v47, %v673_v63 }
  0xd7   : > { %v2111_v10 = vpop.permute.xlu2 %764 }
  0xd8   : > { %v775_v47 = vadd.f32 %v2111_v10, %v738_v0  ;;  %v949_v0 = vmul.f32 %v944_v1, %v1986_v55 }
  0xda   : > { %v962_v19 = vrot.slane %v949_v0, 7 }
  0xdf   : > { %v707_v44 = vpop.permute.xlu2 %706 }
  0xe0   : > { %v721_v49 = vadd.f32 %v707_v44, %v684_v7  ;;  %v648_v45 = vpop.permute.xlu1 %647  ;;  %v788_v7 = vsel %vm671_vm0, %v786_v12, %v787_v33 }
  0xe1   : > { %v659_v5 = vadd.f32 %v648_v45, %v622_v15  ;;  %v789_v15 = vrot.slane %v780_v34, 7  ;;  %v799_v45 = vadd.f32 %v788_v7, %v772_v35  ;;  %v948_v34 = vmul.f32 %v944_v1, %v2007_v9 }
  0xe2   : > { %v727_v48 = vadd.f32 %v2120_v14, %v721_v49  ;;  %v1065_v7 = vstv %s1392_s14 }
  0xe3   : > { %v687_v16 = vadd.f32 %v678_v18, %v659_v5  ;;  %v660_v5 = vadd.f32 %v2093_v51, %v623_v38  ;;  %v790_v63 = vsel %vm671_vm0, %v787_v33, %v789_v15  ;;  %v905_v33 = vmul.f32 %v2178_v21, %v1986_v55 }
  0xe4   : > { %850 = vrot.lane.b32.xlu2 %v727_v48, %s1613_s8 }
  0xe5   : > { %v688_v51 = vadd.f32 %v677_v58, %v660_v5  ;;  %v945_v58 = vmul.f32 %v944_v1, %v1944_v26 }
  0xe7   : > { %v644_v40 = vpop.permute.xlu0 %643  ;;  %v713_v31 = vpop.permute.xlu2 %712 }
  0xe8   : > { %v724_v30 = vadd.f32 %v713_v31, %v687_v16  ;;  %v757_v42 = vpop.permute.xlu1 %756  ;;  %v657_v2 = vadd.f32 %v644_v40, %v620_v43  ;;  %v792_v40 = vsel %vm671_vm0, %v789_v15, %v791_v3  ;;  %v736_v31 = vmul.f32 %v733_v23, %v2348_v20 }
  0xe9   : > { %v771_v6 = vadd.f32 %v757_v42, %v734_v50  ;;  %v802_v42 = vadd.f32 %v791_v3, %v775_v47  ;;  %v902_v43 = vmul.f32 %v2178_v21, %v2013_v46  ;;  %v2204_v15 = vstv %s1390_s15 }
  0xea   : > { %v730_v29 = vadd.f32 %v2120_v14, %v724_v30  ;;  %v685_v44 = vadd.f32 %v674_v57, %v657_v2 }
  0xeb   : > { %v798_v59 = vadd.f32 %v786_v12, %v771_v6 }
  0xec   : > { %856 = vrot.lane.b32.xlu2 %v730_v29, %s1613_s8 }
  0xef   : > { %v2130_v24 = vpop.permute.xlu0 %760  ;;  %v2132_v61 = vpop.permute.xlu2 %824 }
  0xf0   : > { %v763_v32 = vpop.permute.xlu1 %762  ;;  %v773_v23 = vadd.f32 %v2130_v24, %v736_v31 }
  0xf1   : > { %v774_v18 = vadd.f32 %v763_v32, %v737_v36 }
  0xf2   : > { %v800_v60 = vadd.f32 %v790_v63, %v773_v23 }
  0xf3   : > { %v801_v32 = vadd.f32 %v792_v40, %v774_v18 }
  0xf7   : > { %v2137_v52 = vpop.permute.xlu0 %714  ;;  %v2139_v8 = vpop.permute.xlu2 %927 }
  0xf8   : > { %v829_v11 = vpop.permute.xlu1 %828  ;;  %v725_v17 = vadd.f32 %v2137_v52, %v688_v51 }
  0xf9   : > { %v839_v50 = vadd.f32 %v829_v11, %v802_v42  ;;  %v955_v11 = vrot.slane %v945_v58, 7  ;;  %v947_v42 = vmul.f32 %v944_v1, %v2348_v20 }
  0xfa   : > { %v731_v24 = vadd.f32 %v2120_v14, %v725_v17 }
  0xfb   : > { %v844_v6 = vadd.f32 %v839_v50, %v2120_v14  ;;  %v958_v17 = vrot.slane %v947_v42, 7 }
  0xff   : > { %v821_v28 = vpop.permute.xlu0 %820  ;;  %v2149_v39 = vpop.permute.xlu2 %1044 }
 0x100   : > { %v711_v27 = vpop.permute.xlu1 %710  ;;  %v835_v53 = vadd.f32 %v821_v28, %v798_v59  ;;  %v956_v28 = vrot.slane %v2182_v25, 7 }
 0x101   : > { %v723_v37 = vadd.f32 %v711_v27, %v686_v62 }
 0x102   : > { %v840_v10 = vadd.f32 %v835_v53, %v2120_v14  ;;  %v957_v12 = vsel %vm671_vm0, %v955_v11, %v956_v28  ;;  %v1067_v53 = vmul.f32 %v1065_v7, %v2013_v46 }
 0x103   : > { %v729_v56 = vadd.f32 %v2120_v14, %v723_v37  ;;  %v837_v37 = vadd.f32 %v2132_v61, %v800_v60  ;;  %v1066_v60 = vmul.f32 %v1065_v7, %v1944_v26 }
 0x105   : > { %854 = vrot.lane.b32.xlu1 %v729_v56, %s1613_s8  ;;  %v842_v59 = vadd.f32 %v837_v37, %v2120_v14  ;;  %v960_v56 = vrot.slane %v948_v34, 7 }
 0x107   : > { %v709_v49 = vpop.permute.xlu0 %708  ;;  %v2168_v54 = vpop.permute.xlu2 %1050  ;;  %v963_v61 = vsel %vm671_vm0, %v960_v56, %v962_v19  ;;  %v961_v1 = vsel %vm671_vm0, %v958_v17, %v960_v56 }
 0x108   : > { %v722_v4 = vadd.f32 %v709_v49, %v685_v44  ;;  %v823_v48 = vpop.permute.xlu1 %822  ;;  %v901_v44 = vmul.f32 %v2178_v21, %v1944_v26  ;;  %v2210_v49 = vmul.f32 %v1065_v7, %v2348_v20 }
 0x109   : > { %v836_v16 = vadd.f32 %v823_v48, %v799_v45  ;;  %v1024_v45 = vmul.f32 %v2204_v15, %v2348_v20 }
 0x10a   : > { %v728_v30 = vadd.f32 %v2120_v14, %v722_v4  ;;  %v1079_v40 = vrot.slane %v2210_v49, 7 }
 0x10b   : > { %v841_v29 = vadd.f32 %v836_v16, %v2120_v14  ;;  %v1077_v16 = vrot.slane %v1067_v53, 7 }
 0x10c   : > { %852 = vrot.lane.b32.xlu0 %v728_v30, %s1613_s8 }
 0x10d   : > { %870 = vrot.lane.b32.xlu1 %v840_v10, %s1614_s13  ;;  %872 = vrot.lane.b32.xlu2 %v841_v29, %s1614_s13  ;;  %v1080_v10 = vsel %vm671_vm0, %v1077_v16, %v1079_v40  ;;  %v904_v29 = vmul.f32 %v2178_v21, %v2007_v9 }
 0x10f   : > { %v827_v22 = vpop.permute.xlu0 %826  ;;  %v998_v27 = vpop.permute.xlu2 %997 }
 0x110   : > { %v838_v13 = vadd.f32 %v827_v22, %v801_v32  ;;  %v926_v41 = vpop.permute.xlu1 %925 }
 0x111   : > { %v939_v62 = vadd.f32 %v926_v41, %v902_v43 }
 0x112   : > { %v843_v52 = vadd.f32 %v838_v13, %v2120_v14 }
 0x113   : > { %v970_v35 = vadd.f32 %v957_v12, %v939_v62 }
 0x114   : > { %858 = vrot.lane.b32.xlu0 %v731_v24, %s1613_s8  ;;  %v903_v24 = vmul.f32 %v2178_v21, %v2348_v20  ;;  %v1069_v20 = vmul.f32 %v1065_v7, %v2007_v9  ;;  %v1070_v21 = vmul.f32 %v1065_v7, %v1986_v55 }
 0x115   : > { %876 = vrot.lane.b32.xlu1 %v843_v52, %s1614_s13  ;;  %878 = vrot.lane.b32.xlu2 %v844_v6, %s1614_s13  ;;  %v1011_v36 = vadd.f32 %v998_v27, %v970_v35  ;;  %v1023_v6 = vmul.f32 %v2204_v15, %v2013_v46  ;;  %v1076_v27 = vrot.slane %v1066_v60, 7  ;;  %v1026_v35 = vmul.f32 %v2204_v15, %v1986_v55 }
 0x116   : > { %v940_v37 = vadd.f32 %v2139_v8, %v903_v24  ;;  %v1022_v8 = vmul.f32 %v2204_v15, %v1944_v26  ;;  %v1081_v56 = vrot.slane %v1069_v20, 7  ;;  %v1025_v55 = vmul.f32 %v2204_v15, %v2007_v9 }
 0x117   : > { %v924_v2 = vpop.permute.xlu0 %923  ;;  %v1004_v3 = vpop.permute.xlu2 %1003  ;;  %v1016_v18 = vadd.f32 %v1011_v36, %v2120_v14  ;;  %v1078_v46 = vsel %vm671_vm0, %v1076_v27, %v1077_v16 }
 0x118   : > { %v932_v57 = vpop.permute.xlu1 %931  ;;  %v938_v48 = vadd.f32 %v924_v2, %v901_v44 }
 0x119   : > { %v942_v38 = vadd.f32 %v932_v57, %v905_v33  ;;  %v959_v33 = vsel %vm671_vm0, %v956_v28, %v958_v17 }
 0x11a   : > { %v969_v32 = vadd.f32 %v955_v11, %v938_v48  ;;  %v971_v57 = vadd.f32 %v959_v33, %v940_v37 }
 0x11b   : > { %v973_v4 = vadd.f32 %v963_v61, %v942_v38  ;;  %v1083_v38 = vrot.slane %v1070_v21, 7  ;;  %v1059_v61 = vadd.f32 %v2149_v39, %v1022_v8 }
 0x11c   : > { %874 = vrot.lane.b32.xlu0 %v842_v59, %s1614_s13 }
 0x11d   : > { %v1014_v30 = vadd.f32 %v1004_v3, %v973_v4  ;;  %v1084_v26 = vsel %vm671_vm0, %v1081_v56, %v1083_v38  ;;  %v1090_v3 = vadd.f32 %v1076_v27, %v1059_v61  ;;  %v1062_v4 = vadd.f32 %v2168_v54, %v1025_v55 }
 0x11f   : > { %v930_v47 = vpop.permute.xlu0 %929  ;;  %v1019_v63 = vadd.f32 %v1014_v30, %v2120_v14  ;;  %v1121_v58 = vpop.permute.xlu2 %1120 }
 0x120   : > { %v1049_v5 = vpop.permute.xlu1 %1048  ;;  %v941_v13 = vadd.f32 %v930_v47, %v904_v29 }
 0x121   : > { %v1061_v31 = vadd.f32 %v1049_v5, %v1024_v45 }
 0x122   : > { %v972_v11 = vadd.f32 %v961_v1, %v941_v13 }
 0x123   : > { %v1092_v50 = vadd.f32 %v1080_v10, %v1061_v31  ;;  %v1082_v31 = vsel %vm671_vm0, %v1079_v40, %v1081_v56 }
 0x124   : > { %1148 = vrot.lane.b32.xlu0 %v1016_v18, %s1613_s8  ;;  %v1093_v9 = vadd.f32 %v1082_v31, %v1062_v4 }
 0x125   : > { %v1133_v41 = vadd.f32 %v1121_v58, %v1092_v50 }
 0x127   : > { %v1047_v51 = vpop.permute.xlu0 %1046  ;;  %v1138_v12 = vadd.f32 %v1133_v41, %v2120_v14 }
 0x128   : > { %v996_v23 = vpop.permute.xlu1 %995  ;;  %v1060_v2 = vadd.f32 %v1047_v51, %v1023_v6 }
 0x129   : > { %v1010_v22 = vadd.f32 %v996_v23, %v969_v32 }
 0x12a   : > { %v1091_v19 = vadd.f32 %v1078_v46, %v1060_v2 }
 0x12b   : > { %v1015_v43 = vadd.f32 %v1010_v22, %v2120_v14 }
 0x12c   : > { %1154 = vrot.lane.b32.xlu0 %v1019_v63, %s1613_s8 }
 0x12d   : > { %1146 = vrot.lane.b32.xlu2 %v1015_v43, %s1613_s8 }
 0x12f   : > { %v1053_v52 = vpop.permute.xlu0 %1052 }
 0x130   : > { %v1002_v62 = vpop.permute.xlu1 %1001  ;;  %v1063_v44 = vadd.f32 %v1053_v52, %v1026_v35 }
 0x131   : > { %v1013_v0 = vadd.f32 %v1002_v62, %v972_v11 }
 0x132   : > { %v1094_v45 = vadd.f32 %v1084_v26, %v1063_v44 }
 0x133   : > { %v1018_v34 = vadd.f32 %v1013_v0, %v2120_v14 }
 0x134   : > { %1170 = vrot.lane.b32.xlu0 %v1138_v12, %s1614_s13 }
 0x135   : > { %1152 = vrot.lane.b32.xlu2 %v1018_v34, %s1613_s8 }
 0x137   : > { %v1000_v25 = vpop.permute.xlu0 %999 }
 0x138   : > { %v1012_v28 = vadd.f32 %v1000_v25, %v971_v57  ;;  %v1119_v59 = vpop.permute.xlu1 %1118 }
 0x139   : > { %v1132_v36 = vadd.f32 %v1119_v59, %v1091_v19 }
 0x13a   : > { %v1017_v7 = vadd.f32 %v1012_v28, %v2120_v14 }
 0x13b   : > { %v1137_v47 = vadd.f32 %v1132_v36, %v2120_v14 }
 0x13c   : > { %1150 = vrot.lane.b32.xlu1 %v1017_v7, %s1613_s8 }
 0x13d   : > { %1168 = vrot.lane.b32.xlu2 %v1137_v47, %s1614_s13 }
 0x13e   : > { %v851_v54 = vpop.permute.xlu2 %850 }
 0x13f   : > { %v1117_v53 = vpop.permute.xlu0 %1116 }
 0x140   : > { %v1131_v5 = vadd.f32 %v1117_v53, %v1090_v3  ;;  %v1125_v18 = vpop.permute.xlu1 %1124 }
 0x141   : > { %v1135_v39 = vadd.f32 %v1125_v18, %v1094_v45 }
 0x142   : > { %v1136_v48 = vadd.f32 %v1131_v5, %v2120_v14 }
 0x143   : > { %v1140_v16 = vadd.f32 %v1135_v39, %v2120_v14 }
 0x144   : > { %1166 = vrot.lane.b32.xlu1 %v1136_v48, %s1614_s13 }
 0x145   : > { %1174 = vrot.lane.b32.xlu2 %v1140_v16, %s1614_s13 }
 0x146   : > { %v857_v10 = vpop.permute.xlu2 %856 }
 0x147   : > { %v1123_v15 = vpop.permute.xlu0 %1122 }
 0x148   : > { %v1134_v30 = vadd.f32 %v1123_v15, %v1093_v9 }
 0x14a   : > { %v1139_v42 = vadd.f32 %v1134_v30, %v2120_v14 }
 0x14c   : > { %1172 = vrot.lane.b32.xlu1 %v1139_v42, %s1614_s13 }
 0x167   : > { %v873_v29 = vpop.permute.xlu2 %872 }
 0x16f   : > { %v879_v14 = vpop.permute.xlu2 %878 }
 0x177   : > { %v855_v51 = vpop.permute.xlu1 %854 }
 0x17e   : > { %v853_v49 = vpop.permute.xlu0 %852 }
 0x17f   : > { %v887_v40 = vsel %vm885_vm1, %v853_v49, %v873_v29  ;;  %v871_v32 = vpop.permute.xlu1 %870 }
 0x180   : > { %894 = vst.msk [vmem:[%s2270_s21 + $0x7] sm:$0xff] %vm893_vm2, %v887_v40  ;;  %v886_v23 = vsel %vm885_vm1, %v851_v54, %v871_v32 }
 0x181   : > { %892 = vst.msk [vmem:[%s2270_s21 - $0x1] sm:$0xfe] %vm891_vm3, %v886_v23 }
 0x186   : > { %v859_v63 = vpop.permute.xlu0 %858 }
 0x187   : > { %v890_v17 = vsel %vm885_vm1, %v859_v63, %v879_v14  ;;  %v877_v50 = vpop.permute.xlu1 %876  ;;  %v1147_v22 = vpop.permute.xlu2 %1146 }
 0x188   : > { %898 = vst.msk [vmem:[%s2270_s21 + $0x1f] sm:$0x1] %vm897_vm4, %v890_v17  ;;  %v889_v58 = vsel %vm885_vm1, %v857_v10, %v877_v50 }
 0x189   : > { %896 = vst.msk [vmem:[%s2270_s21 + $0x17] sm:$0xff] %vm893_vm2, %v889_v58 }
 0x18e   : > { %v875_v13 = vpop.permute.xlu0 %874 }
 0x18f   : > { %v888_v43 = vsel %vm885_vm1, %v855_v51, %v875_v13  ;;  %v1153_v1 = vpop.permute.xlu2 %1152 }
 0x190   : > { %895 = vst.msk [vmem:[%s2270_s21 + $0xf] sm:$0xff] %vm893_vm2, %v888_v43 }
 0x196   : > { %v1149_v41 = vpop.permute.xlu0 %1148 }
 0x197   : > { %v1169_v60 = vpop.permute.xlu2 %1168 }
 0x198   : > { %v1182_v24 = vsel %vm885_vm1, %v1149_v41, %v1169_v60 }
 0x199   : > { %1395 = vst.msk [vmem:[%s2270_s21 + $0x26] sm:$0xff] %vm893_vm2, %v1182_v24 }
 0x19e   : > { %v1155_v6 = vpop.permute.xlu0 %1154 }
 0x19f   : > { %v1175_v52 = vpop.permute.xlu2 %1174 }
 0x1a0   : > { %v1185_v11 = vsel %vm885_vm1, %v1155_v6, %v1175_v52 }
 0x1a1   : > { %1398 = vst.msk [vmem:[%s2270_s21 + $0x3e] sm:$0x3] %vm1192_vm5, %v1185_v11 }
 0x1a6   : > { %v1171_v62 = vpop.permute.xlu0 %1170 }
 0x1ae   : > { %v1151_v12 = vpop.permute.xlu1 %1150 }
 0x1af   : > { %v1183_v27 = vsel %vm885_vm1, %v1151_v12, %v1171_v62 }
 0x1b0   : > { %1396 = vst.msk [vmem:[%s2270_s21 + $0x2e] sm:$0xff] %vm893_vm2, %v1183_v27 }
 0x1b6   : > { %v1167_v0 = vpop.permute.xlu1 %1166 }
 0x1b7   : > { %v1181_v37 = vsel %vm885_vm1, %v1147_v22, %v1167_v0 }
 0x1b8   : > { %1394 = vst.msk [vmem:[%s2270_s21 + $0x1e] sm:$0xfc] %vm1187_vm6, %v1181_v37 }
 0x1be   : > { %v1173_v2 = vpop.permute.xlu1 %1172 }
 0x1bf   : > { %v1184_v34 = vsel %vm885_vm1, %v1153_v1, %v1173_v2 }
 0x1c0   : > { %1397 = vst.msk [vmem:[%s2270_s21 + $0x36] sm:$0xff] %vm893_vm2, %v1184_v34 }
 0x1c1 PF: > { %s17_s17 = sadd.s32 1, %s1608_s17  }
 0x1c2   : > { %p14_p7 = scmp.ge.s32.totalorder %s17_s17, 4  }
 0x1c4   :  { %16 = sbr.rel (!%p14_p7) target bundleno = 4 (0x4), region = 92 }
 0x1c9   :  { %1215 = vsyncpa [#allocation4], 1 }
 0x1ca   :  { %1217 = vsyncpa [#allocation4 + $0x1], 1 }
 0x1cb   :  { %1218 = vsyncpa [#allocation6], 1 }

</bundles_post_ra>
